<compile_context>
chip_gen: v7x
topology: tpu7x:2x2x1
jax: 0.10.0
libtpu: 0.0.40
codegen_flags: <defaults>
</compile_context>

<pallas_src>
import functools

import jax
import jax.numpy as jnp
import numpy as np
from jax.experimental import pallas as pl
from jax.experimental.pallas import tpu as pltpu


def _tensorcores_per_device() -> int:
    """Best-effort TensorCore count per device; falls back to 1 (v5e/v6e)."""
    try:
        info = pltpu.get_tpu_info()
        for name in ("num_tensorcores", "tensorcore_count", "num_cores",
                     "core_count", "cores_per_chip"):
            v = getattr(info, name, None)
            if isinstance(v, int) and v > 0:
                return int(v)
    except Exception:
        pass
    return 1


def _lbp_kernel(kern_ref, proj_ref, x_ref, mask_ref, out_ref, shift_ref, *,
                n_filters, num_points, h_filter, w_filter, d_x, padw, w_x, hw):
    """LBP forward for one batch block.

    kern_ref:  SMEM (n_filters*num_points*2,) int32 -- flattened (dy, dx)
    proj_ref:  SMEM (n_filters*num_points,)   int32 -- flattened channel ids
    x_ref:     VMEM (d_x, nb, hw) f32               -- this block's input
    mask_ref:  VMEM (h_f*w_f, 1, hw) f32            -- 1.0 in-image, 0.0 at pad
    out_ref:   VMEM (nb, n_filters*hw) f32          -- (batch, filter, spatial)
    shift_ref: VMEM scratch (h_f*w_f*d_x, nb, hw) f32 -- shifted planes
    """
    n_shifts = h_filter * w_filter

    # pltpu.roll's rotate direction is probed at runtime with a lane iota so
    # the kernel is correct under either rotate convention (uniform mask, so
    # the extra roll + select is a one-time XLU/VALU blip).
    # TODO(synk): drop the probe once the rotate direction is pinned by a test
    #             on this jax version.
    lane = jax.lax.broadcasted_iota(jnp.int32, (1, hw), 1)
    fwd_expected = jnp.where(lane == 0, hw - 1, lane - 1)   # == jnp.roll(lane, 1)
    roll_fwd = pltpu.roll(lane, 1, axis=1) == fwd_expected  # uniform (1, hw) bool

    # ---- Phase 1: build every (dy, dx, channel) shifted plane in scratch ----
    # Static roll amounts + host-built masks only: guaranteed-to-lower ops.
    planes = [x_ref[c] for c in range(d_x)]                  # d_x static loads
    for k in range(n_shifts):
        dy, dx = k // w_filter, k % w_filter
        s = (dy - padw) * w_x + (dx - padw)                  # flat lane shift
        m = mask_ref[k]                                      # (1, hw)
        for c in range(d_x):
            if s == 0:
                shift_ref[k * d_x + c] = planes[c]           # center: no shift
            else:
                rolled = jnp.where(roll_fwd,
                                   pltpu.roll(planes[c], (-s) % hw, axis=1),
                                   pltpu.roll(planes[c], s % hw, axis=1))
                shift_ref[k * d_x + c] = rolled * m          # zero padded border

    # ---- Phase 2: LBP compare + bit-weight accumulation ----
    for f in range(n_filters):                               # static unroll
        acc = jnp.zeros(x_ref.shape[1:], dtype=jnp.float32)  # (nb, hw)
        for p in range(num_points):                          # static unroll
            q = f * num_points + p
            # Clip the learnable indices: dynamic VMEM indexing has no runtime
            # bounds check, so out-of-range parameters must not escape.
            dy = jnp.clip(kern_ref[2 * q + 0], 0, h_filter - 1)
            dx = jnp.clip(kern_ref[2 * q + 1], 0, w_filter - 1)
            c = jnp.clip(proj_ref[q], 0, d_x - 1)
            sampled = shift_ref[(dy * w_filter + dx) * d_x + c]  # dynamic load
            center = x_ref[c]                                    # dynamic load
            # Fused compare + weight: no cast, no multiply.
            acc = acc + jnp.where(sampled >= center,
                                  jnp.float32(2 ** p), jnp.float32(0.0))
        # Lane-dense, 128-aligned store (hw = 256 here).
        out_ref[:, f * hw:(f + 1) * hw] = acc


def lbp_forward(x, kernels, projection_map, *, h_filter, w_filter):
    """x: (n_x, d_x, h_x, w_x) f32.  Returns (n_x, n_filters, h_x, w_x) f32."""
    n_x, d_x, h_x, w_x = x.shape
    n_filters, num_points, _ = kernels.shape
    padw = w_filter // 2
    hw = h_x * w_x
    n_shifts = h_filter * w_filter

    # Only 1x layout glue: (n,d,h,w) -> (d,n,h*w); no padding, no 9x stack.
    x_cnl = jnp.transpose(x, (1, 0, 2, 3)).reshape(d_x, n_x, hw)
    x_cnl = x_cnl.astype(jnp.float32)

    # Host-built boundary masks, one per (dy, dx) window offset (data-size
    # independent of batch; ~n_shifts*hw floats).
    masks = np.zeros((n_shifts, 1, hw), np.float32)
    for k in range(n_shifts):
        dy, dx = k // w_filter, k % w_filter
        sy, sx = dy - padw, dx - padw
        m = np.zeros((h_x, w_x), np.float32)
        i0, i1 = max(0, -sy), min(h_x, h_x - sy)
        j0, j1 = max(0, -sx), min(w_x, w_x - sx)
        m[i0:i1, j0:j1] = 1.0
        masks[k, 0] = m.reshape(hw)
    masks = jnp.asarray(masks)

    # Flattened 1-D scalar-prefetch tables (avoid 2-D SMEM (8,128) padding).
    kern_flat = kernels.astype(jnp.int32).reshape(-1)
    proj_flat = projection_map.astype(jnp.int32).reshape(-1)

    # One grid step on 1-TC chips; split the BATCH across cores on megacore
    # parts (each core then DMAs/holds only its share of the input).
    cores = _tensorcores_per_device()
    if cores >= 2 and n_x % cores == 0 and (n_x // cores) % 8 == 0:
        n_groups = cores
    else:
        n_groups = 1
    nb = n_x // n_groups

    kernel = functools.partial(
        _lbp_kernel, n_filters=n_filters, num_points=num_points,
        h_filter=h_filter, w_filter=w_filter, d_x=d_x, padw=padw,
        w_x=w_x, hw=hw)

    out = pl.pallas_call(
        kernel,
        out_shape=jax.ShapeDtypeStruct((n_x, n_filters * hw), jnp.float32),
        grid_spec=pltpu.PrefetchScalarGridSpec(
            num_scalar_prefetch=2,
            grid=(n_groups,),
            in_specs=[
                # Input fetched exactly once per batch block (1x HBM traffic).
                pl.BlockSpec((d_x, nb, hw), lambda g, kern, proj: (0, g, 0)),
                # Tiny constant masks (constant block index -> fetched once).
                pl.BlockSpec((n_shifts, 1, hw), lambda g, kern, proj: (0, 0, 0)),
            ],
            out_specs=pl.BlockSpec((nb, n_filters * hw),
                                   lambda g, kern, proj: (g, 0)),
            scratch_shapes=[pltpu.VMEM((n_shifts * d_x, nb, hw), jnp.float32)],
        ),
        compiler_params=pltpu.CompilerParams(
            dimension_semantics=("parallel",)),
    )(kern_flat, proj_flat, x_cnl, masks)

    # Free (row-major) un-flatten straight into the PyTorch output layout.
    return out.reshape(n_x, n_filters, h_x, w_x)


def lbp_reference(x, kernels, projection_map, *, h_filter, w_filter):
    """Pure-numpy reference of the same forward semantics."""
    x = np.asarray(x)
    kernels = np.asarray(kernels)
    projection_map = np.asarray(projection_map)
    n_x, d_x, h_x, w_x = x.shape
    n_filters, num_points, _ = kernels.shape
    padw = w_filter // 2
    xp = np.pad(x, ((0, 0), (0, 0), (padw, padw), (padw, padw)))
    out = np.zeros((n_x, n_filters, h_x, w_x), np.float32)
    for f in range(n_filters):
        for p in range(num_points):
            dy, dx = int(kernels[f, p, 0]), int(kernels[f, p, 1])
            c = int(projection_map[f, p])
            sampled = xp[:, c, dy:dy + h_x, dx:dx + w_x]
            center = x[:, c, :, :]
            out[:, f] += (sampled >= center).astype(np.float32) * float(2 ** p)
    return out


if __name__ == "__main__":
    # Module config: Xshape=(2,4,16,16), Wshape=(8,4,3,3), number_of_points=4
    n_x, d_x, h_x, w_x = 2, 4, 16, 16
    n_filters, d_filter, h_filter, w_filter = 8, 4, 3, 3
    number_of_points = 4

    key = jax.random.PRNGKey(0)
    kx, kk, kp = jax.random.split(key, 3)
    x = jax.random.normal(kx, (n_x, d_x, h_x, w_x), dtype=jnp.float32)
    # nn.Parameter(torch.randint(0, h_filter, (n_filters, num_points, 2)))
    kernels = jax.random.randint(kk, (n_filters, number_of_points, 2),
                                 0, h_filter, dtype=jnp.int32)
    # nn.Parameter(torch.randint(0, d_filter, (n_filters, num_points)))
    projection_map = jax.random.randint(kp, (n_filters, number_of_points),
                                        0, d_filter, dtype=jnp.int32)

    out = lbp_forward(x, kernels, projection_map,
                      h_filter=h_filter, w_filter=w_filter)
    out = jax.block_until_ready(out)

    ref = lbp_reference(x, kernels, projection_map,
                        h_filter=h_filter, w_filter=w_filter)
    np.testing.assert_allclose(np.asarray(out), ref, rtol=0, atol=0)

    print("KERNEL_OK")
</pallas_src>

<mosaic_0001>
module attributes {stable_mosaic.version = 11 : i64} {
  func.func @_lbp_kernel(%arg0: i32, %arg1: memref<64xi32, #tpu.memory_space<smem>>, %arg2: memref<32xi32, #tpu.memory_space<smem>>, %arg3: memref<4x2x256xf32, #tpu.memory_space<vmem>>, %arg4: memref<9x1x256xf32, #tpu.memory_space<vmem>>, %arg5: memref<2x2048xf32, #tpu.memory_space<vmem>>, %arg6: memref<36x2x256xf32, #tpu.memory_space<vmem>>) attributes {dimension_semantics = [#tpu.dimension_semantics<parallel>], iteration_bounds = array<i64: 1>, scalar_prefetch = 2 : i64, scratch_operands = 1 : i64, tpu.core_type = #tpu.core_type<tc>, window_params = [{transform_indices = @transform_0, window_bounds = array<i64: 4, 2, 256>}, {pipeline_mode = #tpu.pipeline_mode<synchronous>, transform_indices = @transform_1, window_bounds = array<i64: 9, 1, 256>}, {transform_indices = @transform_2, window_bounds = array<i64: 2, 2048>}]} {
    %0 = tpu.iota {dimensions = array<i32: 1>} : vector<1x256xi32>
    %c0_i32 = arith.constant 0 : i32
    %1 = vector.broadcast %c0_i32 : i32 to vector<1x256xi32>
    %2 = arith.cmpi eq, %0, %1 : vector<1x256xi32>
    %c1_i32 = arith.constant 1 : i32
    %3 = vector.broadcast %c1_i32 : i32 to vector<1x256xi32>
    %4 = arith.subi %0, %3 : vector<1x256xi32>
    %c255_i32 = arith.constant 255 : i32
    %5 = vector.broadcast %c255_i32 : i32 to vector<1x256xi32>
    %6 = arith.select %2, %5, %4 : vector<1x256xi1>, vector<1x256xi32>
    %c1_i32_0 = arith.constant 1 : i32
    %7 = tpu.dynamic_rotate %0 by %c1_i32_0 dim 1 : vector<1x256xi32>, i32 -> vector<1x256xi32>
    %8 = arith.cmpi eq, %7, %6 : vector<1x256xi32>
    %c0 = arith.constant 0 : index
    %c0_1 = arith.constant 0 : index
    %c0_2 = arith.constant 0 : index
    %9 = vector.load %arg3[%c0, %c0_1, %c0_2] : memref<4x2x256xf32, #tpu.memory_space<vmem>>, vector<1x2x256xf32>
    %10 = vector.shape_cast %9 : vector<1x2x256xf32> to vector<2x256xf32>
    %c1 = arith.constant 1 : index
    %c0_3 = arith.constant 0 : index
    %c0_4 = arith.constant 0 : index
    %11 = vector.load %arg3[%c1, %c0_3, %c0_4] : memref<4x2x256xf32, #tpu.memory_space<vmem>>, vector<1x2x256xf32>
    %12 = vector.shape_cast %11 : vector<1x2x256xf32> to vector<2x256xf32>
    %c2 = arith.constant 2 : index
    %c0_5 = arith.constant 0 : index
    %c0_6 = arith.constant 0 : index
    %13 = vector.load %arg3[%c2, %c0_5, %c0_6] : memref<4x2x256xf32, #tpu.memory_space<vmem>>, vector<1x2x256xf32>
    %14 = vector.shape_cast %13 : vector<1x2x256xf32> to vector<2x256xf32>
    %c3 = arith.constant 3 : index
    %c0_7 = arith.constant 0 : index
    %c0_8 = arith.constant 0 : index
    %15 = vector.load %arg3[%c3, %c0_7, %c0_8] : memref<4x2x256xf32, #tpu.memory_space<vmem>>, vector<1x2x256xf32>
    %16 = vector.shape_cast %15 : vector<1x2x256xf32> to vector<2x256xf32>
    %c0_9 = arith.constant 0 : index
    %c0_10 = arith.constant 0 : index
    %c0_11 = arith.constant 0 : index
    %17 = vector.load %arg4[%c0_9, %c0_10, %c0_11] : memref<9x1x256xf32, #tpu.memory_space<vmem>>, vector<1x1x256xf32>
    %18 = vector.shape_cast %17 : vector<1x1x256xf32> to vector<1x256xf32>
    %c17_i32 = arith.constant 17 : i32
    %19 = tpu.dynamic_rotate %10 by %c17_i32 dim 1 : vector<2x256xf32>, i32 -> vector<2x256xf32>
    %c239_i32 = arith.constant 239 : i32
    %20 = tpu.dynamic_rotate %10 by %c239_i32 dim 1 : vector<2x256xf32>, i32 -> vector<2x256xf32>
    %21 = vector.shape_cast %8 : vector<1x256xi1> to vector<1x256xi1>
    %22 = vector.broadcast %21 : vector<1x256xi1> to vector<2x256xi1>
    %23 = arith.select %22, %19, %20 : vector<2x256xi1>, vector<2x256xf32>
    %24 = vector.broadcast %18 : vector<1x256xf32> to vector<2x256xf32>
    %25 = arith.mulf %23, %24 : vector<2x256xf32>
    %c0_12 = arith.constant 0 : index
    %c0_13 = arith.constant 0 : index
    %c0_14 = arith.constant 0 : index
    %26 = vector.load %arg6[%c0_12, %c0_13, %c0_14] : memref<36x2x256xf32, #tpu.memory_space<vmem>>, vector<1x2x256xf32>
    %27 = vector.shape_cast %26 : vector<1x2x256xf32> to vector<2x256xf32>
    %28 = vector.shape_cast %25 : vector<2x256xf32> to vector<1x2x256xf32>
    tpu.vector_store %arg6[%c0_12, %c0_13, %c0_14], %28 {strides = array<i32>} : memref<36x2x256xf32, #tpu.memory_space<vmem>>, vector<1x2x256xf32>,
    %c17_i32_15 = arith.constant 17 : i32
    %29 = tpu.dynamic_rotate %12 by %c17_i32_15 dim 1 : vector<2x256xf32>, i32 -> vector<2x256xf32>
    %c239_i32_16 = arith.constant 239 : i32
    %30 = tpu.dynamic_rotate %12 by %c239_i32_16 dim 1 : vector<2x256xf32>, i32 -> vector<2x256xf32>
    %31 = vector.shape_cast %8 : vector<1x256xi1> to vector<1x256xi1>
    %32 = vector.broadcast %31 : vector<1x256xi1> to vector<2x256xi1>
    %33 = arith.select %32, %29, %30 : vector<2x256xi1>, vector<2x256xf32>
    %34 = vector.broadcast %18 : vector<1x256xf32> to vector<2x256xf32>
    %35 = arith.mulf %33, %34 : vector<2x256xf32>
    %c1_17 = arith.constant 1 : index
    %c0_18 = arith.constant 0 : index
    %c0_19 = arith.constant 0 : index
    %36 = vector.load %arg6[%c1_17, %c0_18, %c0_19] : memref<36x2x256xf32, #tpu.memory_space<vmem>>, vector<1x2x256xf32>
    %37 = vector.shape_cast %36 : vector<1x2x256xf32> to vector<2x256xf32>
    %38 = vector.shape_cast %35 : vector<2x256xf32> to vector<1x2x256xf32>
    tpu.vector_store %arg6[%c1_17, %c0_18, %c0_19], %38 {strides = array<i32>} : memref<36x2x256xf32, #tpu.memory_space<vmem>>, vector<1x2x256xf32>,
    %c17_i32_20 = arith.constant 17 : i32
    %39 = tpu.dynamic_rotate %14 by %c17_i32_20 dim 1 : vector<2x256xf32>, i32 -> vector<2x256xf32>
    %c239_i32_21 = arith.constant 239 : i32
    %40 = tpu.dynamic_rotate %14 by %c239_i32_21 dim 1 : vector<2x256xf32>, i32 -> vector<2x256xf32>
    %41 = vector.shape_cast %8 : vector<1x256xi1> to vector<1x256xi1>
    %42 = vector.broadcast %41 : vector<1x256xi1> to vector<2x256xi1>
    %43 = arith.select %42, %39, %40 : vector<2x256xi1>, vector<2x256xf32>
    %44 = vector.broadcast %18 : vector<1x256xf32> to vector<2x256xf32>
    %45 = arith.mulf %43, %44 : vector<2x256xf32>
    %c2_22 = arith.constant 2 : index
    %c0_23 = arith.constant 0 : index
    %c0_24 = arith.constant 0 : index
    %46 = vector.load %arg6[%c2_22, %c0_23, %c0_24] : memref<36x2x256xf32, #tpu.memory_space<vmem>>, vector<1x2x256xf32>
    %47 = vector.shape_cast %46 : vector<1x2x256xf32> to vector<2x256xf32>
    %48 = vector.shape_cast %45 : vector<2x256xf32> to vector<1x2x256xf32>
    tpu.vector_store %arg6[%c2_22, %c0_23, %c0_24], %48 {strides = array<i32>} : memref<36x2x256xf32, #tpu.memory_space<vmem>>, vector<1x2x256xf32>,
    %c17_i32_25 = arith.constant 17 : i32
    %49 = tpu.dynamic_rotate %16 by %c17_i32_25 dim 1 : vector<2x256xf32>, i32 -> vector<2x256xf32>
    %c239_i32_26 = arith.constant 239 : i32
    %50 = tpu.dynamic_rotate %16 by %c239_i32_26 dim 1 : vector<2x256xf32>, i32 -> vector<2x256xf32>
    %51 = vector.shape_cast %8 : vector<1x256xi1> to vector<1x256xi1>
    %52 = vector.broadcast %51 : vector<1x256xi1> to vector<2x256xi1>
    %53 = arith.select %52, %49, %50 : vector<2x256xi1>, vector<2x256xf32>
    %54 = vector.broadcast %18 : vector<1x256xf32> to vector<2x256xf32>
    %55 = arith.mulf %53, %54 : vector<2x256xf32>
    %c3_27 = arith.constant 3 : index
    %c0_28 = arith.constant 0 : index
    %c0_29 = arith.constant 0 : index
    %56 = vector.load %arg6[%c3_27, %c0_28, %c0_29] : memref<36x2x256xf32, #tpu.memory_space<vmem>>, vector<1x2x256xf32>
    %57 = vector.shape_cast %56 : vector<1x2x256xf32> to vector<2x256xf32>
    %58 = vector.shape_cast %55 : vector<2x256xf32> to vector<1x2x256xf32>
    tpu.vector_store %arg6[%c3_27, %c0_28, %c0_29], %58 {strides = array<i32>} : memref<36x2x256xf32, #tpu.memory_space<vmem>>, vector<1x2x256xf32>,
    %c1_30 = arith.constant 1 : index
    %c0_31 = arith.constant 0 : index
    %c0_32 = arith.constant 0 : index
    %59 = vector.load %arg4[%c1_30, %c0_31, %c0_32] : memref<9x1x256xf32, #tpu.memory_space<vmem>>, vector<1x1x256xf32>
    %60 = vector.shape_cast %59 : vector<1x1x256xf32> to vector<1x256xf32>
    %c16_i32 = arith.constant 16 : i32
    %61 = tpu.dynamic_rotate %10 by %c16_i32 dim 1 : vector<2x256xf32>, i32 -> vector<2x256xf32>
    %c240_i32 = arith.constant 240 : i32
    %62 = tpu.dynamic_rotate %10 by %c240_i32 dim 1 : vector<2x256xf32>, i32 -> vector<2x256xf32>
    %63 = vector.shape_cast %8 : vector<1x256xi1> to vector<1x256xi1>
    %64 = vector.broadcast %63 : vector<1x256xi1> to vector<2x256xi1>
    %65 = arith.select %64, %61, %62 : vector<2x256xi1>, vector<2x256xf32>
    %66 = vector.broadcast %60 : vector<1x256xf32> to vector<2x256xf32>
    %67 = arith.mulf %65, %66 : vector<2x256xf32>
    %c4 = arith.constant 4 : index
    %c0_33 = arith.constant 0 : index
    %c0_34 = arith.constant 0 : index
    %68 = vector.load %arg6[%c4, %c0_33, %c0_34] : memref<36x2x256xf32, #tpu.memory_space<vmem>>, vector<1x2x256xf32>
    %69 = vector.shape_cast %68 : vector<1x2x256xf32> to vector<2x256xf32>
    %70 = vector.shape_cast %67 : vector<2x256xf32> to vector<1x2x256xf32>
    tpu.vector_store %arg6[%c4, %c0_33, %c0_34], %70 {strides = array<i32>} : memref<36x2x256xf32, #tpu.memory_space<vmem>>, vector<1x2x256xf32>,
    %c16_i32_35 = arith.constant 16 : i32
    %71 = tpu.dynamic_rotate %12 by %c16_i32_35 dim 1 : vector<2x256xf32>, i32 -> vector<2x256xf32>
    %c240_i32_36 = arith.constant 240 : i32
    %72 = tpu.dynamic_rotate %12 by %c240_i32_36 dim 1 : vector<2x256xf32>, i32 -> vector<2x256xf32>
    %73 = vector.shape_cast %8 : vector<1x256xi1> to vector<1x256xi1>
    %74 = vector.broadcast %73 : vector<1x256xi1> to vector<2x256xi1>
    %75 = arith.select %74, %71, %72 : vector<2x256xi1>, vector<2x256xf32>
    %76 = vector.broadcast %60 : vector<1x256xf32> to vector<2x256xf32>
    %77 = arith.mulf %75, %76 : vector<2x256xf32>
    %c5 = arith.constant 5 : index
    %c0_37 = arith.constant 0 : index
    %c0_38 = arith.constant 0 : index
    %78 = vector.load %arg6[%c5, %c0_37, %c0_38] : memref<36x2x256xf32, #tpu.memory_space<vmem>>, vector<1x2x256xf32>
    %79 = vector.shape_cast %78 : vector<1x2x256xf32> to vector<2x256xf32>
    %80 = vector.shape_cast %77 : vector<2x256xf32> to vector<1x2x256xf32>
    tpu.vector_store %arg6[%c5, %c0_37, %c0_38], %80 {strides = array<i32>} : memref<36x2x256xf32, #tpu.memory_space<vmem>>, vector<1x2x256xf32>,
    %c16_i32_39 = arith.constant 16 : i32
    %81 = tpu.dynamic_rotate %14 by %c16_i32_39 dim 1 : vector<2x256xf32>, i32 -> vector<2x256xf32>
    %c240_i32_40 = arith.constant 240 : i32
    %82 = tpu.dynamic_rotate %14 by %c240_i32_40 dim 1 : vector<2x256xf32>, i32 -> vector<2x256xf32>
    %83 = vector.shape_cast %8 : vector<1x256xi1> to vector<1x256xi1>
    %84 = vector.broadcast %83 : vector<1x256xi1> to vector<2x256xi1>
    %85 = arith.select %84, %81, %82 : vector<2x256xi1>, vector<2x256xf32>
    %86 = vector.broadcast %60 : vector<1x256xf32> to vector<2x256xf32>
    %87 = arith.mulf %85, %86 : vector<2x256xf32>
    %c6 = arith.constant 6 : index
    %c0_41 = arith.constant 0 : index
    %c0_42 = arith.constant 0 : index
    %88 = vector.load %arg6[%c6, %c0_41, %c0_42] : memref<36x2x256xf32, #tpu.memory_space<vmem>>, vector<1x2x256xf32>
    %89 = vector.shape_cast %88 : vector<1x2x256xf32> to vector<2x256xf32>
    %90 = vector.shape_cast %87 : vector<2x256xf32> to vector<1x2x256xf32>
    tpu.vector_store %arg6[%c6, %c0_41, %c0_42], %90 {strides = array<i32>} : memref<36x2x256xf32, #tpu.memory_space<vmem>>, vector<1x2x256xf32>,
    %c16_i32_43 = arith.constant 16 : i32
    %91 = tpu.dynamic_rotate %16 by %c16_i32_43 dim 1 : vector<2x256xf32>, i32 -> vector<2x256xf32>
    %c240_i32_44 = arith.constant 240 : i32
    %92 = tpu.dynamic_rotate %16 by %c240_i32_44 dim 1 : vector<2x256xf32>, i32 -> vector<2x256xf32>
    %93 = vector.shape_cast %8 : vector<1x256xi1> to vector<1x256xi1>
    %94 = vector.broadcast %93 : vector<1x256xi1> to vector<2x256xi1>
    %95 = arith.select %94, %91, %92 : vector<2x256xi1>, vector<2x256xf32>
    %96 = vector.broadcast %60 : vector<1x256xf32> to vector<2x256xf32>
    %97 = arith.mulf %95, %96 : vector<2x256xf32>
    %c7 = arith.constant 7 : index
    %c0_45 = arith.constant 0 : index
    %c0_46 = arith.constant 0 : index
    %98 = vector.load %arg6[%c7, %c0_45, %c0_46] : memref<36x2x256xf32, #tpu.memory_space<vmem>>, vector<1x2x256xf32>
    %99 = vector.shape_cast %98 : vector<1x2x256xf32> to vector<2x256xf32>
    %100 = vector.shape_cast %97 : vector<2x256xf32> to vector<1x2x256xf32>
    tpu.vector_store %arg6[%c7, %c0_45, %c0_46], %100 {strides = array<i32>} : memref<36x2x256xf32, #tpu.memory_space<vmem>>, vector<1x2x256xf32>,
    %c2_47 = arith.constant 2 : index
    %c0_48 = arith.constant 0 : index
    %c0_49 = arith.constant 0 : index
    %101 = vector.load %arg4[%c2_47, %c0_48, %c0_49] : memref<9x1x256xf32, #tpu.memory_space<vmem>>, vector<1x1x256xf32>
    %102 = vector.shape_cast %101 : vector<1x1x256xf32> to vector<1x256xf32>
    %c15_i32 = arith.constant 15 : i32
    %103 = tpu.dynamic_rotate %10 by %c15_i32 dim 1 : vector<2x256xf32>, i32 -> vector<2x256xf32>
    %c241_i32 = arith.constant 241 : i32
    %104 = tpu.dynamic_rotate %10 by %c241_i32 dim 1 : vector<2x256xf32>, i32 -> vector<2x256xf32>
    %105 = vector.shape_cast %8 : vector<1x256xi1> to vector<1x256xi1>
    %106 = vector.broadcast %105 : vector<1x256xi1> to vector<2x256xi1>
    %107 = arith.select %106, %103, %104 : vector<2x256xi1>, vector<2x256xf32>
    %108 = vector.broadcast %102 : vector<1x256xf32> to vector<2x256xf32>
    %109 = arith.mulf %107, %108 : vector<2x256xf32>
    %c8 = arith.constant 8 : index
    %c0_50 = arith.constant 0 : index
    %c0_51 = arith.constant 0 : index
    %110 = vector.load %arg6[%c8, %c0_50, %c0_51] : memref<36x2x256xf32, #tpu.memory_space<vmem>>, vector<1x2x256xf32>
    %111 = vector.shape_cast %110 : vector<1x2x256xf32> to vector<2x256xf32>
    %112 = vector.shape_cast %109 : vector<2x256xf32> to vector<1x2x256xf32>
    tpu.vector_store %arg6[%c8, %c0_50, %c0_51], %112 {strides = array<i32>} : memref<36x2x256xf32, #tpu.memory_space<vmem>>, vector<1x2x256xf32>,
    %c15_i32_52 = arith.constant 15 : i32
    %113 = tpu.dynamic_rotate %12 by %c15_i32_52 dim 1 : vector<2x256xf32>, i32 -> vector<2x256xf32>
    %c241_i32_53 = arith.constant 241 : i32
    %114 = tpu.dynamic_rotate %12 by %c241_i32_53 dim 1 : vector<2x256xf32>, i32 -> vector<2x256xf32>
    %115 = vector.shape_cast %8 : vector<1x256xi1> to vector<1x256xi1>
    %116 = vector.broadcast %115 : vector<1x256xi1> to vector<2x256xi1>
    %117 = arith.select %116, %113, %114 : vector<2x256xi1>, vector<2x256xf32>
    %118 = vector.broadcast %102 : vector<1x256xf32> to vector<2x256xf32>
    %119 = arith.mulf %117, %118 : vector<2x256xf32>
    %c9 = arith.constant 9 : index
    %c0_54 = arith.constant 0 : index
    %c0_55 = arith.constant 0 : index
    %120 = vector.load %arg6[%c9, %c0_54, %c0_55] : memref<36x2x256xf32, #tpu.memory_space<vmem>>, vector<1x2x256xf32>
    %121 = vector.shape_cast %120 : vector<1x2x256xf32> to vector<2x256xf32>
    %122 = vector.shape_cast %119 : vector<2x256xf32> to vector<1x2x256xf32>
    tpu.vector_store %arg6[%c9, %c0_54, %c0_55], %122 {strides = array<i32>} : memref<36x2x256xf32, #tpu.memory_space<vmem>>, vector<1x2x256xf32>,
    %c15_i32_56 = arith.constant 15 : i32
    %123 = tpu.dynamic_rotate %14 by %c15_i32_56 dim 1 : vector<2x256xf32>, i32 -> vector<2x256xf32>
    %c241_i32_57 = arith.constant 241 : i32
    %124 = tpu.dynamic_rotate %14 by %c241_i32_57 dim 1 : vector<2x256xf32>, i32 -> vector<2x256xf32>
    %125 = vector.shape_cast %8 : vector<1x256xi1> to vector<1x256xi1>
    %126 = vector.broadcast %125 : vector<1x256xi1> to vector<2x256xi1>
    %127 = arith.select %126, %123, %124 : vector<2x256xi1>, vector<2x256xf32>
    %128 = vector.broadcast %102 : vector<1x256xf32> to vector<2x256xf32>
    %129 = arith.mulf %127, %128 : vector<2x256xf32>
    %c10 = arith.constant 10 : index
    %c0_58 = arith.constant 0 : index
    %c0_59 = arith.constant 0 : index
    %130 = vector.load %arg6[%c10, %c0_58, %c0_59] : memref<36x2x256xf32, #tpu.memory_space<vmem>>, vector<1x2x256xf32>
    %131 = vector.shape_cast %130 : vector<1x2x256xf32> to vector<2x256xf32>
    %132 = vector.shape_cast %129 : vector<2x256xf32> to vector<1x2x256xf32>
    tpu.vector_store %arg6[%c10, %c0_58, %c0_59], %132 {strides = array<i32>} : memref<36x2x256xf32, #tpu.memory_space<vmem>>, vector<1x2x256xf32>,
    %c15_i32_60 = arith.constant 15 : i32
    %133 = tpu.dynamic_rotate %16 by %c15_i32_60 dim 1 : vector<2x256xf32>, i32 -> vector<2x256xf32>
    %c241_i32_61 = arith.constant 241 : i32
    %134 = tpu.dynamic_rotate %16 by %c241_i32_61 dim 1 : vector<2x256xf32>, i32 -> vector<2x256xf32>
    %135 = vector.shape_cast %8 : vector<1x256xi1> to vector<1x256xi1>
    %136 = vector.broadcast %135 : vector<1x256xi1> to vector<2x256xi1>
    %137 = arith.select %136, %133, %134 : vector<2x256xi1>, vector<2x256xf32>
    %138 = vector.broadcast %102 : vector<1x256xf32> to vector<2x256xf32>
    %139 = arith.mulf %137, %138 : vector<2x256xf32>
    %c11 = arith.constant 11 : index
    %c0_62 = arith.constant 0 : index
    %c0_63 = arith.constant 0 : index
    %140 = vector.load %arg6[%c11, %c0_62, %c0_63] : memref<36x2x256xf32, #tpu.memory_space<vmem>>, vector<1x2x256xf32>
    %141 = vector.shape_cast %140 : vector<1x2x256xf32> to vector<2x256xf32>
    %142 = vector.shape_cast %139 : vector<2x256xf32> to vector<1x2x256xf32>
    tpu.vector_store %arg6[%c11, %c0_62, %c0_63], %142 {strides = array<i32>} : memref<36x2x256xf32, #tpu.memory_space<vmem>>, vector<1x2x256xf32>,
    %c3_64 = arith.constant 3 : index
    %c0_65 = arith.constant 0 : index
    %c0_66 = arith.constant 0 : index
    %143 = vector.load %arg4[%c3_64, %c0_65, %c0_66] : memref<9x1x256xf32, #tpu.memory_space<vmem>>, vector<1x1x256xf32>
    %144 = vector.shape_cast %143 : vector<1x1x256xf32> to vector<1x256xf32>
    %c1_i32_67 = arith.constant 1 : i32
    %145 = tpu.dynamic_rotate %10 by %c1_i32_67 dim 1 : vector<2x256xf32>, i32 -> vector<2x256xf32>
    %c255_i32_68 = arith.constant 255 : i32
    %146 = tpu.dynamic_rotate %10 by %c255_i32_68 dim 1 : vector<2x256xf32>, i32 -> vector<2x256xf32>
    %147 = vector.shape_cast %8 : vector<1x256xi1> to vector<1x256xi1>
    %148 = vector.broadcast %147 : vector<1x256xi1> to vector<2x256xi1>
    %149 = arith.select %148, %145, %146 : vector<2x256xi1>, vector<2x256xf32>
    %150 = vector.broadcast %144 : vector<1x256xf32> to vector<2x256xf32>
    %151 = arith.mulf %149, %150 : vector<2x256xf32>
    %c12 = arith.constant 12 : index
    %c0_69 = arith.constant 0 : index
    %c0_70 = arith.constant 0 : index
    %152 = vector.load %arg6[%c12, %c0_69, %c0_70] : memref<36x2x256xf32, #tpu.memory_space<vmem>>, vector<1x2x256xf32>
    %153 = vector.shape_cast %152 : vector<1x2x256xf32> to vector<2x256xf32>
    %154 = vector.shape_cast %151 : vector<2x256xf32> to vector<1x2x256xf32>
    tpu.vector_store %arg6[%c12, %c0_69, %c0_70], %154 {strides = array<i32>} : memref<36x2x256xf32, #tpu.memory_space<vmem>>, vector<1x2x256xf32>,
    %c1_i32_71 = arith.constant 1 : i32
    %155 = tpu.dynamic_rotate %12 by %c1_i32_71 dim 1 : vector<2x256xf32>, i32 -> vector<2x256xf32>
    %c255_i32_72 = arith.constant 255 : i32
    %156 = tpu.dynamic_rotate %12 by %c255_i32_72 dim 1 : vector<2x256xf32>, i32 -> vector<2x256xf32>
    %157 = vector.shape_cast %8 : vector<1x256xi1> to vector<1x256xi1>
    %158 = vector.broadcast %157 : vector<1x256xi1> to vector<2x256xi1>
    %159 = arith.select %158, %155, %156 : vector<2x256xi1>, vector<2x256xf32>
    %160 = vector.broadcast %144 : vector<1x256xf32> to vector<2x256xf32>
    %161 = arith.mulf %159, %160 : vector<2x256xf32>
    %c13 = arith.constant 13 : index
    %c0_73 = arith.constant 0 : index
    %c0_74 = arith.constant 0 : index
    %162 = vector.load %arg6[%c13, %c0_73, %c0_74] : memref<36x2x256xf32, #tpu.memory_space<vmem>>, vector<1x2x256xf32>
    %163 = vector.shape_cast %162 : vector<1x2x256xf32> to vector<2x256xf32>
    %164 = vector.shape_cast %161 : vector<2x256xf32> to vector<1x2x256xf32>
    tpu.vector_store %arg6[%c13, %c0_73, %c0_74], %164 {strides = array<i32>} : memref<36x2x256xf32, #tpu.memory_space<vmem>>, vector<1x2x256xf32>,
    %c1_i32_75 = arith.constant 1 : i32
    %165 = tpu.dynamic_rotate %14 by %c1_i32_75 dim 1 : vector<2x256xf32>, i32 -> vector<2x256xf32>
    %c255_i32_76 = arith.constant 255 : i32
    %166 = tpu.dynamic_rotate %14 by %c255_i32_76 dim 1 : vector<2x256xf32>, i32 -> vector<2x256xf32>
    %167 = vector.shape_cast %8 : vector<1x256xi1> to vector<1x256xi1>
    %168 = vector.broadcast %167 : vector<1x256xi1> to vector<2x256xi1>
    %169 = arith.select %168, %165, %166 : vector<2x256xi1>, vector<2x256xf32>
    %170 = vector.broadcast %144 : vector<1x256xf32> to vector<2x256xf32>
    %171 = arith.mulf %169, %170 : vector<2x256xf32>
    %c14 = arith.constant 14 : index
    %c0_77 = arith.constant 0 : index
    %c0_78 = arith.constant 0 : index
    %172 = vector.load %arg6[%c14, %c0_77, %c0_78] : memref<36x2x256xf32, #tpu.memory_space<vmem>>, vector<1x2x256xf32>
    %173 = vector.shape_cast %172 : vector<1x2x256xf32> to vector<2x256xf32>
    %174 = vector.shape_cast %171 : vector<2x256xf32> to vector<1x2x256xf32>
    tpu.vector_store %arg6[%c14, %c0_77, %c0_78], %174 {strides = array<i32>} : memref<36x2x256xf32, #tpu.memory_space<vmem>>, vector<1x2x256xf32>,
    %c1_i32_79 = arith.constant 1 : i32
    %175 = tpu.dynamic_rotate %16 by %c1_i32_79 dim 1 : vector<2x256xf32>, i32 -> vector<2x256xf32>
    %c255_i32_80 = arith.constant 255 : i32
    %176 = tpu.dynamic_rotate %16 by %c255_i32_80 dim 1 : vector<2x256xf32>, i32 -> vector<2x256xf32>
    %177 = vector.shape_cast %8 : vector<1x256xi1> to vector<1x256xi1>
    %178 = vector.broadcast %177 : vector<1x256xi1> to vector<2x256xi1>
    %179 = arith.select %178, %175, %176 : vector<2x256xi1>, vector<2x256xf32>
    %180 = vector.broadcast %144 : vector<1x256xf32> to vector<2x256xf32>
    %181 = arith.mulf %179, %180 : vector<2x256xf32>
    %c15 = arith.constant 15 : index
    %c0_81 = arith.constant 0 : index
    %c0_82 = arith.constant 0 : index
    %182 = vector.load %arg6[%c15, %c0_81, %c0_82] : memref<36x2x256xf32, #tpu.memory_space<vmem>>, vector<1x2x256xf32>
    %183 = vector.shape_cast %182 : vector<1x2x256xf32> to vector<2x256xf32>
    %184 = vector.shape_cast %181 : vector<2x256xf32> to vector<1x2x256xf32>
    tpu.vector_store %arg6[%c15, %c0_81, %c0_82], %184 {strides = array<i32>} : memref<36x2x256xf32, #tpu.memory_space<vmem>>, vector<1x2x256xf32>,
    %c16 = arith.constant 16 : index
    %c0_83 = arith.constant 0 : index
    %c0_84 = arith.constant 0 : index
    %185 = vector.load %arg6[%c16, %c0_83, %c0_84] : memref<36x2x256xf32, #tpu.memory_space<vmem>>, vector<1x2x256xf32>
    %186 = vector.shape_cast %185 : vector<1x2x256xf32> to vector<2x256xf32>
    %187 = vector.shape_cast %10 : vector<2x256xf32> to vector<1x2x256xf32>
    tpu.vector_store %arg6[%c16, %c0_83, %c0_84], %187 {strides = array<i32>} : memref<36x2x256xf32, #tpu.memory_space<vmem>>, vector<1x2x256xf32>,
    %c17 = arith.constant 17 : index
    %c0_85 = arith.constant 0 : index
    %c0_86 = arith.constant 0 : index
    %188 = vector.load %arg6[%c17, %c0_85, %c0_86] : memref<36x2x256xf32, #tpu.memory_space<vmem>>, vector<1x2x256xf32>
    %189 = vector.shape_cast %188 : vector<1x2x256xf32> to vector<2x256xf32>
    %190 = vector.shape_cast %12 : vector<2x256xf32> to vector<1x2x256xf32>
    tpu.vector_store %arg6[%c17, %c0_85, %c0_86], %190 {strides = array<i32>} : memref<36x2x256xf32, #tpu.memory_space<vmem>>, vector<1x2x256xf32>,
    %c18 = arith.constant 18 : index
    %c0_87 = arith.constant 0 : index
    %c0_88 = arith.constant 0 : index
    %191 = vector.load %arg6[%c18, %c0_87, %c0_88] : memref<36x2x256xf32, #tpu.memory_space<vmem>>, vector<1x2x256xf32>
    %192 = vector.shape_cast %191 : vector<1x2x256xf32> to vector<2x256xf32>
    %193 = vector.shape_cast %14 : vector<2x256xf32> to vector<1x2x256xf32>
    tpu.vector_store %arg6[%c18, %c0_87, %c0_88], %193 {strides = array<i32>} : memref<36x2x256xf32, #tpu.memory_space<vmem>>, vector<1x2x256xf32>,
    %c19 = arith.constant 19 : index
    %c0_89 = arith.constant 0 : index
    %c0_90 = arith.constant 0 : index
    %194 = vector.load %arg6[%c19, %c0_89, %c0_90] : memref<36x2x256xf32, #tpu.memory_space<vmem>>, vector<1x2x256xf32>
    %195 = vector.shape_cast %194 : vector<1x2x256xf32> to vector<2x256xf32>
    %196 = vector.shape_cast %16 : vector<2x256xf32> to vector<1x2x256xf32>
    tpu.vector_store %arg6[%c19, %c0_89, %c0_90], %196 {strides = array<i32>} : memref<36x2x256xf32, #tpu.memory_space<vmem>>, vector<1x2x256xf32>,
    %c5_91 = arith.constant 5 : index
    %c0_92 = arith.constant 0 : index
    %c0_93 = arith.constant 0 : index
    %197 = vector.load %arg4[%c5_91, %c0_92, %c0_93] : memref<9x1x256xf32, #tpu.memory_space<vmem>>, vector<1x1x256xf32>
    %198 = vector.shape_cast %197 : vector<1x1x256xf32> to vector<1x256xf32>
    %c255_i32_94 = arith.constant 255 : i32
    %199 = tpu.dynamic_rotate %10 by %c255_i32_94 dim 1 : vector<2x256xf32>, i32 -> vector<2x256xf32>
    %c1_i32_95 = arith.constant 1 : i32
    %200 = tpu.dynamic_rotate %10 by %c1_i32_95 dim 1 : vector<2x256xf32>, i32 -> vector<2x256xf32>
    %201 = vector.shape_cast %8 : vector<1x256xi1> to vector<1x256xi1>
    %202 = vector.broadcast %201 : vector<1x256xi1> to vector<2x256xi1>
    %203 = arith.select %202, %199, %200 : vector<2x256xi1>, vector<2x256xf32>
    %204 = vector.broadcast %198 : vector<1x256xf32> to vector<2x256xf32>
    %205 = arith.mulf %203, %204 : vector<2x256xf32>
    %c20 = arith.constant 20 : index
    %c0_96 = arith.constant 0 : index
    %c0_97 = arith.constant 0 : index
    %206 = vector.load %arg6[%c20, %c0_96, %c0_97] : memref<36x2x256xf32, #tpu.memory_space<vmem>>, vector<1x2x256xf32>
    %207 = vector.shape_cast %206 : vector<1x2x256xf32> to vector<2x256xf32>
    %208 = vector.shape_cast %205 : vector<2x256xf32> to vector<1x2x256xf32>
    tpu.vector_store %arg6[%c20, %c0_96, %c0_97], %208 {strides = array<i32>} : memref<36x2x256xf32, #tpu.memory_space<vmem>>, vector<1x2x256xf32>,
    %c255_i32_98 = arith.constant 255 : i32
    %209 = tpu.dynamic_rotate %12 by %c255_i32_98 dim 1 : vector<2x256xf32>, i32 -> vector<2x256xf32>
    %c1_i32_99 = arith.constant 1 : i32
    %210 = tpu.dynamic_rotate %12 by %c1_i32_99 dim 1 : vector<2x256xf32>, i32 -> vector<2x256xf32>
    %211 = vector.shape_cast %8 : vector<1x256xi1> to vector<1x256xi1>
    %212 = vector.broadcast %211 : vector<1x256xi1> to vector<2x256xi1>
    %213 = arith.select %212, %209, %210 : vector<2x256xi1>, vector<2x256xf32>
    %214 = vector.broadcast %198 : vector<1x256xf32> to vector<2x256xf32>
    %215 = arith.mulf %213, %214 : vector<2x256xf32>
    %c21 = arith.constant 21 : index
    %c0_100 = arith.constant 0 : index
    %c0_101 = arith.constant 0 : index
    %216 = vector.load %arg6[%c21, %c0_100, %c0_101] : memref<36x2x256xf32, #tpu.memory_space<vmem>>, vector<1x2x256xf32>
    %217 = vector.shape_cast %216 : vector<1x2x256xf32> to vector<2x256xf32>
    %218 = vector.shape_cast %215 : vector<2x256xf32> to vector<1x2x256xf32>
    tpu.vector_store %arg6[%c21, %c0_100, %c0_101], %218 {strides = array<i32>} : memref<36x2x256xf32, #tpu.memory_space<vmem>>, vector<1x2x256xf32>,
    %c255_i32_102 = arith.constant 255 : i32
    %219 = tpu.dynamic_rotate %14 by %c255_i32_102 dim 1 : vector<2x256xf32>, i32 -> vector<2x256xf32>
    %c1_i32_103 = arith.constant 1 : i32
    %220 = tpu.dynamic_rotate %14 by %c1_i32_103 dim 1 : vector<2x256xf32>, i32 -> vector<2x256xf32>
    %221 = vector.shape_cast %8 : vector<1x256xi1> to vector<1x256xi1>
    %222 = vector.broadcast %221 : vector<1x256xi1> to vector<2x256xi1>
    %223 = arith.select %222, %219, %220 : vector<2x256xi1>, vector<2x256xf32>
    %224 = vector.broadcast %198 : vector<1x256xf32> to vector<2x256xf32>
    %225 = arith.mulf %223, %224 : vector<2x256xf32>
    %c22 = arith.constant 22 : index
    %c0_104 = arith.constant 0 : index
    %c0_105 = arith.constant 0 : index
    %226 = vector.load %arg6[%c22, %c0_104, %c0_105] : memref<36x2x256xf32, #tpu.memory_space<vmem>>, vector<1x2x256xf32>
    %227 = vector.shape_cast %226 : vector<1x2x256xf32> to vector<2x256xf32>
    %228 = vector.shape_cast %225 : vector<2x256xf32> to vector<1x2x256xf32>
    tpu.vector_store %arg6[%c22, %c0_104, %c0_105], %228 {strides = array<i32>} : memref<36x2x256xf32, #tpu.memory_space<vmem>>, vector<1x2x256xf32>,
    %c255_i32_106 = arith.constant 255 : i32
    %229 = tpu.dynamic_rotate %16 by %c255_i32_106 dim 1 : vector<2x256xf32>, i32 -> vector<2x256xf32>
    %c1_i32_107 = arith.constant 1 : i32
    %230 = tpu.dynamic_rotate %16 by %c1_i32_107 dim 1 : vector<2x256xf32>, i32 -> vector<2x256xf32>
    %231 = vector.shape_cast %8 : vector<1x256xi1> to vector<1x256xi1>
    %232 = vector.broadcast %231 : vector<1x256xi1> to vector<2x256xi1>
    %233 = arith.select %232, %229, %230 : vector<2x256xi1>, vector<2x256xf32>
    %234 = vector.broadcast %198 : vector<1x256xf32> to vector<2x256xf32>
    %235 = arith.mulf %233, %234 : vector<2x256xf32>
    %c23 = arith.constant 23 : index
    %c0_108 = arith.constant 0 : index
    %c0_109 = arith.constant 0 : index
    %236 = vector.load %arg6[%c23, %c0_108, %c0_109] : memref<36x2x256xf32, #tpu.memory_space<vmem>>, vector<1x2x256xf32>
    %237 = vector.shape_cast %236 : vector<1x2x256xf32> to vector<2x256xf32>
    %238 = vector.shape_cast %235 : vector<2x256xf32> to vector<1x2x256xf32>
    tpu.vector_store %arg6[%c23, %c0_108, %c0_109], %238 {strides = array<i32>} : memref<36x2x256xf32, #tpu.memory_space<vmem>>, vector<1x2x256xf32>,
    %c6_110 = arith.constant 6 : index
    %c0_111 = arith.constant 0 : index
    %c0_112 = arith.constant 0 : index
    %239 = vector.load %arg4[%c6_110, %c0_111, %c0_112] : memref<9x1x256xf32, #tpu.memory_space<vmem>>, vector<1x1x256xf32>
    %240 = vector.shape_cast %239 : vector<1x1x256xf32> to vector<1x256xf32>
    %c241_i32_113 = arith.constant 241 : i32
    %241 = tpu.dynamic_rotate %10 by %c241_i32_113 dim 1 : vector<2x256xf32>, i32 -> vector<2x256xf32>
    %c15_i32_114 = arith.constant 15 : i32
    %242 = tpu.dynamic_rotate %10 by %c15_i32_114 dim 1 : vector<2x256xf32>, i32 -> vector<2x256xf32>
    %243 = vector.shape_cast %8 : vector<1x256xi1> to vector<1x256xi1>
    %244 = vector.broadcast %243 : vector<1x256xi1> to vector<2x256xi1>
    %245 = arith.select %244, %241, %242 : vector<2x256xi1>, vector<2x256xf32>
    %246 = vector.broadcast %240 : vector<1x256xf32> to vector<2x256xf32>
    %247 = arith.mulf %245, %246 : vector<2x256xf32>
    %c24 = arith.constant 24 : index
    %c0_115 = arith.constant 0 : index
    %c0_116 = arith.constant 0 : index
    %248 = vector.load %arg6[%c24, %c0_115, %c0_116] : memref<36x2x256xf32, #tpu.memory_space<vmem>>, vector<1x2x256xf32>
    %249 = vector.shape_cast %248 : vector<1x2x256xf32> to vector<2x256xf32>
    %250 = vector.shape_cast %247 : vector<2x256xf32> to vector<1x2x256xf32>
    tpu.vector_store %arg6[%c24, %c0_115, %c0_116], %250 {strides = array<i32>} : memref<36x2x256xf32, #tpu.memory_space<vmem>>, vector<1x2x256xf32>,
    %c241_i32_117 = arith.constant 241 : i32
    %251 = tpu.dynamic_rotate %12 by %c241_i32_117 dim 1 : vector<2x256xf32>, i32 -> vector<2x256xf32>
    %c15_i32_118 = arith.constant 15 : i32
    %252 = tpu.dynamic_rotate %12 by %c15_i32_118 dim 1 : vector<2x256xf32>, i32 -> vector<2x256xf32>
    %253 = vector.shape_cast %8 : vector<1x256xi1> to vector<1x256xi1>
    %254 = vector.broadcast %253 : vector<1x256xi1> to vector<2x256xi1>
    %255 = arith.select %254, %251, %252 : vector<2x256xi1>, vector<2x256xf32>
    %256 = vector.broadcast %240 : vector<1x256xf32> to vector<2x256xf32>
    %257 = arith.mulf %255, %256 : vector<2x256xf32>
    %c25 = arith.constant 25 : index
    %c0_119 = arith.constant 0 : index
    %c0_120 = arith.constant 0 : index
    %258 = vector.load %arg6[%c25, %c0_119, %c0_120] : memref<36x2x256xf32, #tpu.memory_space<vmem>>, vector<1x2x256xf32>
    %259 = vector.shape_cast %258 : vector<1x2x256xf32> to vector<2x256xf32>
    %260 = vector.shape_cast %257 : vector<2x256xf32> to vector<1x2x256xf32>
    tpu.vector_store %arg6[%c25, %c0_119, %c0_120], %260 {strides = array<i32>} : memref<36x2x256xf32, #tpu.memory_space<vmem>>, vector<1x2x256xf32>,
    %c241_i32_121 = arith.constant 241 : i32
    %261 = tpu.dynamic_rotate %14 by %c241_i32_121 dim 1 : vector<2x256xf32>, i32 -> vector<2x256xf32>
    %c15_i32_122 = arith.constant 15 : i32
    %262 = tpu.dynamic_rotate %14 by %c15_i32_122 dim 1 : vector<2x256xf32>, i32 -> vector<2x256xf32>
    %263 = vector.shape_cast %8 : vector<1x256xi1> to vector<1x256xi1>
    %264 = vector.broadcast %263 : vector<1x256xi1> to vector<2x256xi1>
    %265 = arith.select %264, %261, %262 : vector<2x256xi1>, vector<2x256xf32>
    %266 = vector.broadcast %240 : vector<1x256xf32> to vector<2x256xf32>
    %267 = arith.mulf %265, %266 : vector<2x256xf32>
    %c26 = arith.constant 26 : index
    %c0_123 = arith.constant 0 : index
    %c0_124 = arith.constant 0 : index
    %268 = vector.load %arg6[%c26, %c0_123, %c0_124] : memref<36x2x256xf32, #tpu.memory_space<vmem>>, vector<1x2x256xf32>
    %269 = vector.shape_cast %268 : vector<1x2x256xf32> to vector<2x256xf32>
    %270 = vector.shape_cast %267 : vector<2x256xf32> to vector<1x2x256xf32>
    tpu.vector_store %arg6[%c26, %c0_123, %c0_124], %270 {strides = array<i32>} : memref<36x2x256xf32, #tpu.memory_space<vmem>>, vector<1x2x256xf32>,
    %c241_i32_125 = arith.constant 241 : i32
    %271 = tpu.dynamic_rotate %16 by %c241_i32_125 dim 1 : vector<2x256xf32>, i32 -> vector<2x256xf32>
    %c15_i32_126 = arith.constant 15 : i32
    %272 = tpu.dynamic_rotate %16 by %c15_i32_126 dim 1 : vector<2x256xf32>, i32 -> vector<2x256xf32>
    %273 = vector.shape_cast %8 : vector<1x256xi1> to vector<1x256xi1>
    %274 = vector.broadcast %273 : vector<1x256xi1> to vector<2x256xi1>
    %275 = arith.select %274, %271, %272 : vector<2x256xi1>, vector<2x256xf32>
    %276 = vector.broadcast %240 : vector<1x256xf32> to vector<2x256xf32>
    %277 = arith.mulf %275, %276 : vector<2x256xf32>
    %c27 = arith.constant 27 : index
    %c0_127 = arith.constant 0 : index
    %c0_128 = arith.constant 0 : index
    %278 = vector.load %arg6[%c27, %c0_127, %c0_128] : memref<36x2x256xf32, #tpu.memory_space<vmem>>, vector<1x2x256xf32>
    %279 = vector.shape_cast %278 : vector<1x2x256xf32> to vector<2x256xf32>
    %280 = vector.shape_cast %277 : vector<2x256xf32> to vector<1x2x256xf32>
    tpu.vector_store %arg6[%c27, %c0_127, %c0_128], %280 {strides = array<i32>} : memref<36x2x256xf32, #tpu.memory_space<vmem>>, vector<1x2x256xf32>,
    %c7_129 = arith.constant 7 : index
    %c0_130 = arith.constant 0 : index
    %c0_131 = arith.constant 0 : index
    %281 = vector.load %arg4[%c7_129, %c0_130, %c0_131] : memref<9x1x256xf32, #tpu.memory_space<vmem>>, vector<1x1x256xf32>
    %282 = vector.shape_cast %281 : vector<1x1x256xf32> to vector<1x256xf32>
    %c240_i32_132 = arith.constant 240 : i32
    %283 = tpu.dynamic_rotate %10 by %c240_i32_132 dim 1 : vector<2x256xf32>, i32 -> vector<2x256xf32>
    %c16_i32_133 = arith.constant 16 : i32
    %284 = tpu.dynamic_rotate %10 by %c16_i32_133 dim 1 : vector<2x256xf32>, i32 -> vector<2x256xf32>
    %285 = vector.shape_cast %8 : vector<1x256xi1> to vector<1x256xi1>
    %286 = vector.broadcast %285 : vector<1x256xi1> to vector<2x256xi1>
    %287 = arith.select %286, %283, %284 : vector<2x256xi1>, vector<2x256xf32>
    %288 = vector.broadcast %282 : vector<1x256xf32> to vector<2x256xf32>
    %289 = arith.mulf %287, %288 : vector<2x256xf32>
    %c28 = arith.constant 28 : index
    %c0_134 = arith.constant 0 : index
    %c0_135 = arith.constant 0 : index
    %290 = vector.load %arg6[%c28, %c0_134, %c0_135] : memref<36x2x256xf32, #tpu.memory_space<vmem>>, vector<1x2x256xf32>
    %291 = vector.shape_cast %290 : vector<1x2x256xf32> to vector<2x256xf32>
    %292 = vector.shape_cast %289 : vector<2x256xf32> to vector<1x2x256xf32>
    tpu.vector_store %arg6[%c28, %c0_134, %c0_135], %292 {strides = array<i32>} : memref<36x2x256xf32, #tpu.memory_space<vmem>>, vector<1x2x256xf32>,
    %c240_i32_136 = arith.constant 240 : i32
    %293 = tpu.dynamic_rotate %12 by %c240_i32_136 dim 1 : vector<2x256xf32>, i32 -> vector<2x256xf32>
    %c16_i32_137 = arith.constant 16 : i32
    %294 = tpu.dynamic_rotate %12 by %c16_i32_137 dim 1 : vector<2x256xf32>, i32 -> vector<2x256xf32>
    %295 = vector.shape_cast %8 : vector<1x256xi1> to vector<1x256xi1>
    %296 = vector.broadcast %295 : vector<1x256xi1> to vector<2x256xi1>
    %297 = arith.select %296, %293, %294 : vector<2x256xi1>, vector<2x256xf32>
    %298 = vector.broadcast %282 : vector<1x256xf32> to vector<2x256xf32>
    %299 = arith.mulf %297, %298 : vector<2x256xf32>
    %c29 = arith.constant 29 : index
    %c0_138 = arith.constant 0 : index
    %c0_139 = arith.constant 0 : index
    %300 = vector.load %arg6[%c29, %c0_138, %c0_139] : memref<36x2x256xf32, #tpu.memory_space<vmem>>, vector<1x2x256xf32>
    %301 = vector.shape_cast %300 : vector<1x2x256xf32> to vector<2x256xf32>
    %302 = vector.shape_cast %299 : vector<2x256xf32> to vector<1x2x256xf32>
    tpu.vector_store %arg6[%c29, %c0_138, %c0_139], %302 {strides = array<i32>} : memref<36x2x256xf32, #tpu.memory_space<vmem>>, vector<1x2x256xf32>,
    %c240_i32_140 = arith.constant 240 : i32
    %303 = tpu.dynamic_rotate %14 by %c240_i32_140 dim 1 : vector<2x256xf32>, i32 -> vector<2x256xf32>
    %c16_i32_141 = arith.constant 16 : i32
    %304 = tpu.dynamic_rotate %14 by %c16_i32_141 dim 1 : vector<2x256xf32>, i32 -> vector<2x256xf32>
    %305 = vector.shape_cast %8 : vector<1x256xi1> to vector<1x256xi1>
    %306 = vector.broadcast %305 : vector<1x256xi1> to vector<2x256xi1>
    %307 = arith.select %306, %303, %304 : vector<2x256xi1>, vector<2x256xf32>
    %308 = vector.broadcast %282 : vector<1x256xf32> to vector<2x256xf32>
    %309 = arith.mulf %307, %308 : vector<2x256xf32>
    %c30 = arith.constant 30 : index
    %c0_142 = arith.constant 0 : index
    %c0_143 = arith.constant 0 : index
    %310 = vector.load %arg6[%c30, %c0_142, %c0_143] : memref<36x2x256xf32, #tpu.memory_space<vmem>>, vector<1x2x256xf32>
    %311 = vector.shape_cast %310 : vector<1x2x256xf32> to vector<2x256xf32>
    %312 = vector.shape_cast %309 : vector<2x256xf32> to vector<1x2x256xf32>
    tpu.vector_store %arg6[%c30, %c0_142, %c0_143], %312 {strides = array<i32>} : memref<36x2x256xf32, #tpu.memory_space<vmem>>, vector<1x2x256xf32>,
    %c240_i32_144 = arith.constant 240 : i32
    %313 = tpu.dynamic_rotate %16 by %c240_i32_144 dim 1 : vector<2x256xf32>, i32 -> vector<2x256xf32>
    %c16_i32_145 = arith.constant 16 : i32
    %314 = tpu.dynamic_rotate %16 by %c16_i32_145 dim 1 : vector<2x256xf32>, i32 -> vector<2x256xf32>
    %315 = vector.shape_cast %8 : vector<1x256xi1> to vector<1x256xi1>
    %316 = vector.broadcast %315 : vector<1x256xi1> to vector<2x256xi1>
    %317 = arith.select %316, %313, %314 : vector<2x256xi1>, vector<2x256xf32>
    %318 = vector.broadcast %282 : vector<1x256xf32> to vector<2x256xf32>
    %319 = arith.mulf %317, %318 : vector<2x256xf32>
    %c31 = arith.constant 31 : index
    %c0_146 = arith.constant 0 : index
    %c0_147 = arith.constant 0 : index
    %320 = vector.load %arg6[%c31, %c0_146, %c0_147] : memref<36x2x256xf32, #tpu.memory_space<vmem>>, vector<1x2x256xf32>
    %321 = vector.shape_cast %320 : vector<1x2x256xf32> to vector<2x256xf32>
    %322 = vector.shape_cast %319 : vector<2x256xf32> to vector<1x2x256xf32>
    tpu.vector_store %arg6[%c31, %c0_146, %c0_147], %322 {strides = array<i32>} : memref<36x2x256xf32, #tpu.memory_space<vmem>>, vector<1x2x256xf32>,
    %c8_148 = arith.constant 8 : index
    %c0_149 = arith.constant 0 : index
    %c0_150 = arith.constant 0 : index
    %323 = vector.load %arg4[%c8_148, %c0_149, %c0_150] : memref<9x1x256xf32, #tpu.memory_space<vmem>>, vector<1x1x256xf32>
    %324 = vector.shape_cast %323 : vector<1x1x256xf32> to vector<1x256xf32>
    %c239_i32_151 = arith.constant 239 : i32
    %325 = tpu.dynamic_rotate %10 by %c239_i32_151 dim 1 : vector<2x256xf32>, i32 -> vector<2x256xf32>
    %c17_i32_152 = arith.constant 17 : i32
    %326 = tpu.dynamic_rotate %10 by %c17_i32_152 dim 1 : vector<2x256xf32>, i32 -> vector<2x256xf32>
    %327 = vector.shape_cast %8 : vector<1x256xi1> to vector<1x256xi1>
    %328 = vector.broadcast %327 : vector<1x256xi1> to vector<2x256xi1>
    %329 = arith.select %328, %325, %326 : vector<2x256xi1>, vector<2x256xf32>
    %330 = vector.broadcast %324 : vector<1x256xf32> to vector<2x256xf32>
    %331 = arith.mulf %329, %330 : vector<2x256xf32>
    %c32 = arith.constant 32 : index
    %c0_153 = arith.constant 0 : index
    %c0_154 = arith.constant 0 : index
    %332 = vector.load %arg6[%c32, %c0_153, %c0_154] : memref<36x2x256xf32, #tpu.memory_space<vmem>>, vector<1x2x256xf32>
    %333 = vector.shape_cast %332 : vector<1x2x256xf32> to vector<2x256xf32>
    %334 = vector.shape_cast %331 : vector<2x256xf32> to vector<1x2x256xf32>
    tpu.vector_store %arg6[%c32, %c0_153, %c0_154], %334 {strides = array<i32>} : memref<36x2x256xf32, #tpu.memory_space<vmem>>, vector<1x2x256xf32>,
    %c239_i32_155 = arith.constant 239 : i32
    %335 = tpu.dynamic_rotate %12 by %c239_i32_155 dim 1 : vector<2x256xf32>, i32 -> vector<2x256xf32>
    %c17_i32_156 = arith.constant 17 : i32
    %336 = tpu.dynamic_rotate %12 by %c17_i32_156 dim 1 : vector<2x256xf32>, i32 -> vector<2x256xf32>
    %337 = vector.shape_cast %8 : vector<1x256xi1> to vector<1x256xi1>
    %338 = vector.broadcast %337 : vector<1x256xi1> to vector<2x256xi1>
    %339 = arith.select %338, %335, %336 : vector<2x256xi1>, vector<2x256xf32>
    %340 = vector.broadcast %324 : vector<1x256xf32> to vector<2x256xf32>
    %341 = arith.mulf %339, %340 : vector<2x256xf32>
    %c33 = arith.constant 33 : index
    %c0_157 = arith.constant 0 : index
    %c0_158 = arith.constant 0 : index
    %342 = vector.load %arg6[%c33, %c0_157, %c0_158] : memref<36x2x256xf32, #tpu.memory_space<vmem>>, vector<1x2x256xf32>
    %343 = vector.shape_cast %342 : vector<1x2x256xf32> to vector<2x256xf32>
    %344 = vector.shape_cast %341 : vector<2x256xf32> to vector<1x2x256xf32>
    tpu.vector_store %arg6[%c33, %c0_157, %c0_158], %344 {strides = array<i32>} : memref<36x2x256xf32, #tpu.memory_space<vmem>>, vector<1x2x256xf32>,
    %c239_i32_159 = arith.constant 239 : i32
    %345 = tpu.dynamic_rotate %14 by %c239_i32_159 dim 1 : vector<2x256xf32>, i32 -> vector<2x256xf32>
    %c17_i32_160 = arith.constant 17 : i32
    %346 = tpu.dynamic_rotate %14 by %c17_i32_160 dim 1 : vector<2x256xf32>, i32 -> vector<2x256xf32>
    %347 = vector.shape_cast %8 : vector<1x256xi1> to vector<1x256xi1>
    %348 = vector.broadcast %347 : vector<1x256xi1> to vector<2x256xi1>
    %349 = arith.select %348, %345, %346 : vector<2x256xi1>, vector<2x256xf32>
    %350 = vector.broadcast %324 : vector<1x256xf32> to vector<2x256xf32>
    %351 = arith.mulf %349, %350 : vector<2x256xf32>
    %c34 = arith.constant 34 : index
    %c0_161 = arith.constant 0 : index
    %c0_162 = arith.constant 0 : index
    %352 = vector.load %arg6[%c34, %c0_161, %c0_162] : memref<36x2x256xf32, #tpu.memory_space<vmem>>, vector<1x2x256xf32>
    %353 = vector.shape_cast %352 : vector<1x2x256xf32> to vector<2x256xf32>
    %354 = vector.shape_cast %351 : vector<2x256xf32> to vector<1x2x256xf32>
    tpu.vector_store %arg6[%c34, %c0_161, %c0_162], %354 {strides = array<i32>} : memref<36x2x256xf32, #tpu.memory_space<vmem>>, vector<1x2x256xf32>,
    %c239_i32_163 = arith.constant 239 : i32
    %355 = tpu.dynamic_rotate %16 by %c239_i32_163 dim 1 : vector<2x256xf32>, i32 -> vector<2x256xf32>
    %c17_i32_164 = arith.constant 17 : i32
    %356 = tpu.dynamic_rotate %16 by %c17_i32_164 dim 1 : vector<2x256xf32>, i32 -> vector<2x256xf32>
    %357 = vector.shape_cast %8 : vector<1x256xi1> to vector<1x256xi1>
    %358 = vector.broadcast %357 : vector<1x256xi1> to vector<2x256xi1>
    %359 = arith.select %358, %355, %356 : vector<2x256xi1>, vector<2x256xf32>
    %360 = vector.broadcast %324 : vector<1x256xf32> to vector<2x256xf32>
    %361 = arith.mulf %359, %360 : vector<2x256xf32>
    %c35 = arith.constant 35 : index
    %c0_165 = arith.constant 0 : index
    %c0_166 = arith.constant 0 : index
    %362 = vector.load %arg6[%c35, %c0_165, %c0_166] : memref<36x2x256xf32, #tpu.memory_space<vmem>>, vector<1x2x256xf32>
    %363 = vector.shape_cast %362 : vector<1x2x256xf32> to vector<2x256xf32>
    %364 = vector.shape_cast %361 : vector<2x256xf32> to vector<1x2x256xf32>
    tpu.vector_store %arg6[%c35, %c0_165, %c0_166], %364 {strides = array<i32>} : memref<36x2x256xf32, #tpu.memory_space<vmem>>, vector<1x2x256xf32>,
    %cst = arith.constant 0.000000e+00 : f32
    %365 = vector.broadcast %cst : f32 to vector<2x256xf32>
    %c0_167 = arith.constant 0 : index
    %366 = memref.load %arg1[%c0_167] : memref<64xi32, #tpu.memory_space<smem>>
    %c0_i32_168 = arith.constant 0 : i32
    %c2_i32 = arith.constant 2 : i32
    %367 = arith.maxsi %c0_i32_168, %366 : i32
    %368 = arith.minsi %c2_i32, %367 : i32
    %c1_169 = arith.constant 1 : index
    %369 = memref.load %arg1[%c1_169] : memref<64xi32, #tpu.memory_space<smem>>
    %c0_i32_170 = arith.constant 0 : i32
    %c2_i32_171 = arith.constant 2 : i32
    %370 = arith.maxsi %c0_i32_170, %369 : i32
    %371 = arith.minsi %c2_i32_171, %370 : i32
    %c0_172 = arith.constant 0 : index
    %372 = memref.load %arg2[%c0_172] : memref<32xi32, #tpu.memory_space<smem>>
    %c0_i32_173 = arith.constant 0 : i32
    %c3_i32 = arith.constant 3 : i32
    %373 = arith.maxsi %c0_i32_173, %372 : i32
    %374 = arith.minsi %c3_i32, %373 : i32
    %c3_i32_174 = arith.constant 3 : i32
    %375 = arith.muli %368, %c3_i32_174 : i32
    %376 = arith.addi %375, %371 : i32
    %c4_i32 = arith.constant 4 : i32
    %377 = arith.muli %376, %c4_i32 : i32
    %378 = arith.addi %377, %374 : i32
    %379 = arith.index_cast %378 : i32 to index
    %c0_175 = arith.constant 0 : index
    %c0_176 = arith.constant 0 : index
    %380 = vector.load %arg6[%379, %c0_175, %c0_176] : memref<36x2x256xf32, #tpu.memory_space<vmem>>, vector<1x2x256xf32>
    %381 = vector.shape_cast %380 : vector<1x2x256xf32> to vector<2x256xf32>
    %382 = arith.index_cast %374 : i32 to index
    %c0_177 = arith.constant 0 : index
    %c0_178 = arith.constant 0 : index
    %383 = vector.load %arg3[%382, %c0_177, %c0_178] : memref<4x2x256xf32, #tpu.memory_space<vmem>>, vector<1x2x256xf32>
    %384 = vector.shape_cast %383 : vector<1x2x256xf32> to vector<2x256xf32>
    %385 = arith.cmpf oge, %381, %384 : vector<2x256xf32>
    %cst_179 = arith.constant 1.000000e+00 : f32
    %cst_180 = arith.constant 0.000000e+00 : f32
    %386 = vector.broadcast %cst_179 : f32 to vector<2x256xf32>
    %387 = vector.broadcast %cst_180 : f32 to vector<2x256xf32>
    %388 = arith.select %385, %386, %387 : vector<2x256xi1>, vector<2x256xf32>
    %389 = arith.addf %365, %388 : vector<2x256xf32>
    %c2_181 = arith.constant 2 : index
    %390 = memref.load %arg1[%c2_181] : memref<64xi32, #tpu.memory_space<smem>>
    %c0_i32_182 = arith.constant 0 : i32
    %c2_i32_183 = arith.constant 2 : i32
    %391 = arith.maxsi %c0_i32_182, %390 : i32
    %392 = arith.minsi %c2_i32_183, %391 : i32
    %c3_184 = arith.constant 3 : index
    %393 = memref.load %arg1[%c3_184] : memref<64xi32, #tpu.memory_space<smem>>
    %c0_i32_185 = arith.constant 0 : i32
    %c2_i32_186 = arith.constant 2 : i32
    %394 = arith.maxsi %c0_i32_185, %393 : i32
    %395 = arith.minsi %c2_i32_186, %394 : i32
    %c1_187 = arith.constant 1 : index
    %396 = memref.load %arg2[%c1_187] : memref<32xi32, #tpu.memory_space<smem>>
    %c0_i32_188 = arith.constant 0 : i32
    %c3_i32_189 = arith.constant 3 : i32
    %397 = arith.maxsi %c0_i32_188, %396 : i32
    %398 = arith.minsi %c3_i32_189, %397 : i32
    %c3_i32_190 = arith.constant 3 : i32
    %399 = arith.muli %392, %c3_i32_190 : i32
    %400 = arith.addi %399, %395 : i32
    %c4_i32_191 = arith.constant 4 : i32
    %401 = arith.muli %400, %c4_i32_191 : i32
    %402 = arith.addi %401, %398 : i32
    %403 = arith.index_cast %402 : i32 to index
    %c0_192 = arith.constant 0 : index
    %c0_193 = arith.constant 0 : index
    %404 = vector.load %arg6[%403, %c0_192, %c0_193] : memref<36x2x256xf32, #tpu.memory_space<vmem>>, vector<1x2x256xf32>
    %405 = vector.shape_cast %404 : vector<1x2x256xf32> to vector<2x256xf32>
    %406 = arith.index_cast %398 : i32 to index
    %c0_194 = arith.constant 0 : index
    %c0_195 = arith.constant 0 : index
    %407 = vector.load %arg3[%406, %c0_194, %c0_195] : memref<4x2x256xf32, #tpu.memory_space<vmem>>, vector<1x2x256xf32>
    %408 = vector.shape_cast %407 : vector<1x2x256xf32> to vector<2x256xf32>
    %409 = arith.cmpf oge, %405, %408 : vector<2x256xf32>
    %cst_196 = arith.constant 2.000000e+00 : f32
    %cst_197 = arith.constant 0.000000e+00 : f32
    %410 = vector.broadcast %cst_196 : f32 to vector<2x256xf32>
    %411 = vector.broadcast %cst_197 : f32 to vector<2x256xf32>
    %412 = arith.select %409, %410, %411 : vector<2x256xi1>, vector<2x256xf32>
    %413 = arith.addf %389, %412 : vector<2x256xf32>
    %c4_198 = arith.constant 4 : index
    %414 = memref.load %arg1[%c4_198] : memref<64xi32, #tpu.memory_space<smem>>
    %c0_i32_199 = arith.constant 0 : i32
    %c2_i32_200 = arith.constant 2 : i32
    %415 = arith.maxsi %c0_i32_199, %414 : i32
    %416 = arith.minsi %c2_i32_200, %415 : i32
    %c5_201 = arith.constant 5 : index
    %417 = memref.load %arg1[%c5_201] : memref<64xi32, #tpu.memory_space<smem>>
    %c0_i32_202 = arith.constant 0 : i32
    %c2_i32_203 = arith.constant 2 : i32
    %418 = arith.maxsi %c0_i32_202, %417 : i32
    %419 = arith.minsi %c2_i32_203, %418 : i32
    %c2_204 = arith.constant 2 : index
    %420 = memref.load %arg2[%c2_204] : memref<32xi32, #tpu.memory_space<smem>>
    %c0_i32_205 = arith.constant 0 : i32
    %c3_i32_206 = arith.constant 3 : i32
    %421 = arith.maxsi %c0_i32_205, %420 : i32
    %422 = arith.minsi %c3_i32_206, %421 : i32
    %c3_i32_207 = arith.constant 3 : i32
    %423 = arith.muli %416, %c3_i32_207 : i32
    %424 = arith.addi %423, %419 : i32
    %c4_i32_208 = arith.constant 4 : i32
    %425 = arith.muli %424, %c4_i32_208 : i32
    %426 = arith.addi %425, %422 : i32
    %427 = arith.index_cast %426 : i32 to index
    %c0_209 = arith.constant 0 : index
    %c0_210 = arith.constant 0 : index
    %428 = vector.load %arg6[%427, %c0_209, %c0_210] : memref<36x2x256xf32, #tpu.memory_space<vmem>>, vector<1x2x256xf32>
    %429 = vector.shape_cast %428 : vector<1x2x256xf32> to vector<2x256xf32>
    %430 = arith.index_cast %422 : i32 to index
    %c0_211 = arith.constant 0 : index
    %c0_212 = arith.constant 0 : index
    %431 = vector.load %arg3[%430, %c0_211, %c0_212] : memref<4x2x256xf32, #tpu.memory_space<vmem>>, vector<1x2x256xf32>
    %432 = vector.shape_cast %431 : vector<1x2x256xf32> to vector<2x256xf32>
    %433 = arith.cmpf oge, %429, %432 : vector<2x256xf32>
    %cst_213 = arith.constant 4.000000e+00 : f32
    %cst_214 = arith.constant 0.000000e+00 : f32
    %434 = vector.broadcast %cst_213 : f32 to vector<2x256xf32>
    %435 = vector.broadcast %cst_214 : f32 to vector<2x256xf32>
    %436 = arith.select %433, %434, %435 : vector<2x256xi1>, vector<2x256xf32>
    %437 = arith.addf %413, %436 : vector<2x256xf32>
    %c6_215 = arith.constant 6 : index
    %438 = memref.load %arg1[%c6_215] : memref<64xi32, #tpu.memory_space<smem>>
    %c0_i32_216 = arith.constant 0 : i32
    %c2_i32_217 = arith.constant 2 : i32
    %439 = arith.maxsi %c0_i32_216, %438 : i32
    %440 = arith.minsi %c2_i32_217, %439 : i32
    %c7_218 = arith.constant 7 : index
    %441 = memref.load %arg1[%c7_218] : memref<64xi32, #tpu.memory_space<smem>>
    %c0_i32_219 = arith.constant 0 : i32
    %c2_i32_220 = arith.constant 2 : i32
    %442 = arith.maxsi %c0_i32_219, %441 : i32
    %443 = arith.minsi %c2_i32_220, %442 : i32
    %c3_221 = arith.constant 3 : index
    %444 = memref.load %arg2[%c3_221] : memref<32xi32, #tpu.memory_space<smem>>
    %c0_i32_222 = arith.constant 0 : i32
    %c3_i32_223 = arith.constant 3 : i32
    %445 = arith.maxsi %c0_i32_222, %444 : i32
    %446 = arith.minsi %c3_i32_223, %445 : i32
    %c3_i32_224 = arith.constant 3 : i32
    %447 = arith.muli %440, %c3_i32_224 : i32
    %448 = arith.addi %447, %443 : i32
    %c4_i32_225 = arith.constant 4 : i32
    %449 = arith.muli %448, %c4_i32_225 : i32
    %450 = arith.addi %449, %446 : i32
    %451 = arith.index_cast %450 : i32 to index
    %c0_226 = arith.constant 0 : index
    %c0_227 = arith.constant 0 : index
    %452 = vector.load %arg6[%451, %c0_226, %c0_227] : memref<36x2x256xf32, #tpu.memory_space<vmem>>, vector<1x2x256xf32>
    %453 = vector.shape_cast %452 : vector<1x2x256xf32> to vector<2x256xf32>
    %454 = arith.index_cast %446 : i32 to index
    %c0_228 = arith.constant 0 : index
    %c0_229 = arith.constant 0 : index
    %455 = vector.load %arg3[%454, %c0_228, %c0_229] : memref<4x2x256xf32, #tpu.memory_space<vmem>>, vector<1x2x256xf32>
    %456 = vector.shape_cast %455 : vector<1x2x256xf32> to vector<2x256xf32>
    %457 = arith.cmpf oge, %453, %456 : vector<2x256xf32>
    %cst_230 = arith.constant 8.000000e+00 : f32
    %cst_231 = arith.constant 0.000000e+00 : f32
    %458 = vector.broadcast %cst_230 : f32 to vector<2x256xf32>
    %459 = vector.broadcast %cst_231 : f32 to vector<2x256xf32>
    %460 = arith.select %457, %458, %459 : vector<2x256xi1>, vector<2x256xf32>
    %461 = arith.addf %437, %460 : vector<2x256xf32>
    %c0_232 = arith.constant 0 : index
    %c0_233 = arith.constant 0 : index
    %462 = vector.load %arg5[%c0_232, %c0_233] : memref<2x2048xf32, #tpu.memory_space<vmem>>, vector<2x256xf32>
    tpu.vector_store %arg5[%c0_232, %c0_233], %461 {strides = array<i32>} : memref<2x2048xf32, #tpu.memory_space<vmem>>, vector<2x256xf32>,
    %cst_234 = arith.constant 0.000000e+00 : f32
    %463 = vector.broadcast %cst_234 : f32 to vector<2x256xf32>
    %c8_235 = arith.constant 8 : index
    %464 = memref.load %arg1[%c8_235] : memref<64xi32, #tpu.memory_space<smem>>
    %c0_i32_236 = arith.constant 0 : i32
    %c2_i32_237 = arith.constant 2 : i32
    %465 = arith.maxsi %c0_i32_236, %464 : i32
    %466 = arith.minsi %c2_i32_237, %465 : i32
    %c9_238 = arith.constant 9 : index
    %467 = memref.load %arg1[%c9_238] : memref<64xi32, #tpu.memory_space<smem>>
    %c0_i32_239 = arith.constant 0 : i32
    %c2_i32_240 = arith.constant 2 : i32
    %468 = arith.maxsi %c0_i32_239, %467 : i32
    %469 = arith.minsi %c2_i32_240, %468 : i32
    %c4_241 = arith.constant 4 : index
    %470 = memref.load %arg2[%c4_241] : memref<32xi32, #tpu.memory_space<smem>>
    %c0_i32_242 = arith.constant 0 : i32
    %c3_i32_243 = arith.constant 3 : i32
    %471 = arith.maxsi %c0_i32_242, %470 : i32
    %472 = arith.minsi %c3_i32_243, %471 : i32
    %c3_i32_244 = arith.constant 3 : i32
    %473 = arith.muli %466, %c3_i32_244 : i32
    %474 = arith.addi %473, %469 : i32
    %c4_i32_245 = arith.constant 4 : i32
    %475 = arith.muli %474, %c4_i32_245 : i32
    %476 = arith.addi %475, %472 : i32
    %477 = arith.index_cast %476 : i32 to index
    %c0_246 = arith.constant 0 : index
    %c0_247 = arith.constant 0 : index
    %478 = vector.load %arg6[%477, %c0_246, %c0_247] : memref<36x2x256xf32, #tpu.memory_space<vmem>>, vector<1x2x256xf32>
    %479 = vector.shape_cast %478 : vector<1x2x256xf32> to vector<2x256xf32>
    %480 = arith.index_cast %472 : i32 to index
    %c0_248 = arith.constant 0 : index
    %c0_249 = arith.constant 0 : index
    %481 = vector.load %arg3[%480, %c0_248, %c0_249] : memref<4x2x256xf32, #tpu.memory_space<vmem>>, vector<1x2x256xf32>
    %482 = vector.shape_cast %481 : vector<1x2x256xf32> to vector<2x256xf32>
    %483 = arith.cmpf oge, %479, %482 : vector<2x256xf32>
    %cst_250 = arith.constant 1.000000e+00 : f32
    %cst_251 = arith.constant 0.000000e+00 : f32
    %484 = vector.broadcast %cst_250 : f32 to vector<2x256xf32>
    %485 = vector.broadcast %cst_251 : f32 to vector<2x256xf32>
    %486 = arith.select %483, %484, %485 : vector<2x256xi1>, vector<2x256xf32>
    %487 = arith.addf %463, %486 : vector<2x256xf32>
    %c10_252 = arith.constant 10 : index
    %488 = memref.load %arg1[%c10_252] : memref<64xi32, #tpu.memory_space<smem>>
    %c0_i32_253 = arith.constant 0 : i32
    %c2_i32_254 = arith.constant 2 : i32
    %489 = arith.maxsi %c0_i32_253, %488 : i32
    %490 = arith.minsi %c2_i32_254, %489 : i32
    %c11_255 = arith.constant 11 : index
    %491 = memref.load %arg1[%c11_255] : memref<64xi32, #tpu.memory_space<smem>>
    %c0_i32_256 = arith.constant 0 : i32
    %c2_i32_257 = arith.constant 2 : i32
    %492 = arith.maxsi %c0_i32_256, %491 : i32
    %493 = arith.minsi %c2_i32_257, %492 : i32
    %c5_258 = arith.constant 5 : index
    %494 = memref.load %arg2[%c5_258] : memref<32xi32, #tpu.memory_space<smem>>
    %c0_i32_259 = arith.constant 0 : i32
    %c3_i32_260 = arith.constant 3 : i32
    %495 = arith.maxsi %c0_i32_259, %494 : i32
    %496 = arith.minsi %c3_i32_260, %495 : i32
    %c3_i32_261 = arith.constant 3 : i32
    %497 = arith.muli %490, %c3_i32_261 : i32
    %498 = arith.addi %497, %493 : i32
    %c4_i32_262 = arith.constant 4 : i32
    %499 = arith.muli %498, %c4_i32_262 : i32
    %500 = arith.addi %499, %496 : i32
    %501 = arith.index_cast %500 : i32 to index
    %c0_263 = arith.constant 0 : index
    %c0_264 = arith.constant 0 : index
    %502 = vector.load %arg6[%501, %c0_263, %c0_264] : memref<36x2x256xf32, #tpu.memory_space<vmem>>, vector<1x2x256xf32>
    %503 = vector.shape_cast %502 : vector<1x2x256xf32> to vector<2x256xf32>
    %504 = arith.index_cast %496 : i32 to index
    %c0_265 = arith.constant 0 : index
    %c0_266 = arith.constant 0 : index
    %505 = vector.load %arg3[%504, %c0_265, %c0_266] : memref<4x2x256xf32, #tpu.memory_space<vmem>>, vector<1x2x256xf32>
    %506 = vector.shape_cast %505 : vector<1x2x256xf32> to vector<2x256xf32>
    %507 = arith.cmpf oge, %503, %506 : vector<2x256xf32>
    %cst_267 = arith.constant 2.000000e+00 : f32
    %cst_268 = arith.constant 0.000000e+00 : f32
    %508 = vector.broadcast %cst_267 : f32 to vector<2x256xf32>
    %509 = vector.broadcast %cst_268 : f32 to vector<2x256xf32>
    %510 = arith.select %507, %508, %509 : vector<2x256xi1>, vector<2x256xf32>
    %511 = arith.addf %487, %510 : vector<2x256xf32>
    %c12_269 = arith.constant 12 : index
    %512 = memref.load %arg1[%c12_269] : memref<64xi32, #tpu.memory_space<smem>>
    %c0_i32_270 = arith.constant 0 : i32
    %c2_i32_271 = arith.constant 2 : i32
    %513 = arith.maxsi %c0_i32_270, %512 : i32
    %514 = arith.minsi %c2_i32_271, %513 : i32
    %c13_272 = arith.constant 13 : index
    %515 = memref.load %arg1[%c13_272] : memref<64xi32, #tpu.memory_space<smem>>
    %c0_i32_273 = arith.constant 0 : i32
    %c2_i32_274 = arith.constant 2 : i32
    %516 = arith.maxsi %c0_i32_273, %515 : i32
    %517 = arith.minsi %c2_i32_274, %516 : i32
    %c6_275 = arith.constant 6 : index
    %518 = memref.load %arg2[%c6_275] : memref<32xi32, #tpu.memory_space<smem>>
    %c0_i32_276 = arith.constant 0 : i32
    %c3_i32_277 = arith.constant 3 : i32
    %519 = arith.maxsi %c0_i32_276, %518 : i32
    %520 = arith.minsi %c3_i32_277, %519 : i32
    %c3_i32_278 = arith.constant 3 : i32
    %521 = arith.muli %514, %c3_i32_278 : i32
    %522 = arith.addi %521, %517 : i32
    %c4_i32_279 = arith.constant 4 : i32
    %523 = arith.muli %522, %c4_i32_279 : i32
    %524 = arith.addi %523, %520 : i32
    %525 = arith.index_cast %524 : i32 to index
    %c0_280 = arith.constant 0 : index
    %c0_281 = arith.constant 0 : index
    %526 = vector.load %arg6[%525, %c0_280, %c0_281] : memref<36x2x256xf32, #tpu.memory_space<vmem>>, vector<1x2x256xf32>
    %527 = vector.shape_cast %526 : vector<1x2x256xf32> to vector<2x256xf32>
    %528 = arith.index_cast %520 : i32 to index
    %c0_282 = arith.constant 0 : index
    %c0_283 = arith.constant 0 : index
    %529 = vector.load %arg3[%528, %c0_282, %c0_283] : memref<4x2x256xf32, #tpu.memory_space<vmem>>, vector<1x2x256xf32>
    %530 = vector.shape_cast %529 : vector<1x2x256xf32> to vector<2x256xf32>
    %531 = arith.cmpf oge, %527, %530 : vector<2x256xf32>
    %cst_284 = arith.constant 4.000000e+00 : f32
    %cst_285 = arith.constant 0.000000e+00 : f32
    %532 = vector.broadcast %cst_284 : f32 to vector<2x256xf32>
    %533 = vector.broadcast %cst_285 : f32 to vector<2x256xf32>
    %534 = arith.select %531, %532, %533 : vector<2x256xi1>, vector<2x256xf32>
    %535 = arith.addf %511, %534 : vector<2x256xf32>
    %c14_286 = arith.constant 14 : index
    %536 = memref.load %arg1[%c14_286] : memref<64xi32, #tpu.memory_space<smem>>
    %c0_i32_287 = arith.constant 0 : i32
    %c2_i32_288 = arith.constant 2 : i32
    %537 = arith.maxsi %c0_i32_287, %536 : i32
    %538 = arith.minsi %c2_i32_288, %537 : i32
    %c15_289 = arith.constant 15 : index
    %539 = memref.load %arg1[%c15_289] : memref<64xi32, #tpu.memory_space<smem>>
    %c0_i32_290 = arith.constant 0 : i32
    %c2_i32_291 = arith.constant 2 : i32
    %540 = arith.maxsi %c0_i32_290, %539 : i32
    %541 = arith.minsi %c2_i32_291, %540 : i32
    %c7_292 = arith.constant 7 : index
    %542 = memref.load %arg2[%c7_292] : memref<32xi32, #tpu.memory_space<smem>>
    %c0_i32_293 = arith.constant 0 : i32
    %c3_i32_294 = arith.constant 3 : i32
    %543 = arith.maxsi %c0_i32_293, %542 : i32
    %544 = arith.minsi %c3_i32_294, %543 : i32
    %c3_i32_295 = arith.constant 3 : i32
    %545 = arith.muli %538, %c3_i32_295 : i32
    %546 = arith.addi %545, %541 : i32
    %c4_i32_296 = arith.constant 4 : i32
    %547 = arith.muli %546, %c4_i32_296 : i32
    %548 = arith.addi %547, %544 : i32
    %549 = arith.index_cast %548 : i32 to index
    %c0_297 = arith.constant 0 : index
    %c0_298 = arith.constant 0 : index
    %550 = vector.load %arg6[%549, %c0_297, %c0_298] : memref<36x2x256xf32, #tpu.memory_space<vmem>>, vector<1x2x256xf32>
    %551 = vector.shape_cast %550 : vector<1x2x256xf32> to vector<2x256xf32>
    %552 = arith.index_cast %544 : i32 to index
    %c0_299 = arith.constant 0 : index
    %c0_300 = arith.constant 0 : index
    %553 = vector.load %arg3[%552, %c0_299, %c0_300] : memref<4x2x256xf32, #tpu.memory_space<vmem>>, vector<1x2x256xf32>
    %554 = vector.shape_cast %553 : vector<1x2x256xf32> to vector<2x256xf32>
    %555 = arith.cmpf oge, %551, %554 : vector<2x256xf32>
    %cst_301 = arith.constant 8.000000e+00 : f32
    %cst_302 = arith.constant 0.000000e+00 : f32
    %556 = vector.broadcast %cst_301 : f32 to vector<2x256xf32>
    %557 = vector.broadcast %cst_302 : f32 to vector<2x256xf32>
    %558 = arith.select %555, %556, %557 : vector<2x256xi1>, vector<2x256xf32>
    %559 = arith.addf %535, %558 : vector<2x256xf32>
    %c0_303 = arith.constant 0 : index
    %c256 = arith.constant 256 : index
    %560 = vector.load %arg5[%c0_303, %c256] : memref<2x2048xf32, #tpu.memory_space<vmem>>, vector<2x256xf32>
    tpu.vector_store %arg5[%c0_303, %c256], %559 {strides = array<i32>} : memref<2x2048xf32, #tpu.memory_space<vmem>>, vector<2x256xf32>,
    %cst_304 = arith.constant 0.000000e+00 : f32
    %561 = vector.broadcast %cst_304 : f32 to vector<2x256xf32>
    %c16_305 = arith.constant 16 : index
    %562 = memref.load %arg1[%c16_305] : memref<64xi32, #tpu.memory_space<smem>>
    %c0_i32_306 = arith.constant 0 : i32
    %c2_i32_307 = arith.constant 2 : i32
    %563 = arith.maxsi %c0_i32_306, %562 : i32
    %564 = arith.minsi %c2_i32_307, %563 : i32
    %c17_308 = arith.constant 17 : index
    %565 = memref.load %arg1[%c17_308] : memref<64xi32, #tpu.memory_space<smem>>
    %c0_i32_309 = arith.constant 0 : i32
    %c2_i32_310 = arith.constant 2 : i32
    %566 = arith.maxsi %c0_i32_309, %565 : i32
    %567 = arith.minsi %c2_i32_310, %566 : i32
    %c8_311 = arith.constant 8 : index
    %568 = memref.load %arg2[%c8_311] : memref<32xi32, #tpu.memory_space<smem>>
    %c0_i32_312 = arith.constant 0 : i32
    %c3_i32_313 = arith.constant 3 : i32
    %569 = arith.maxsi %c0_i32_312, %568 : i32
    %570 = arith.minsi %c3_i32_313, %569 : i32
    %c3_i32_314 = arith.constant 3 : i32
    %571 = arith.muli %564, %c3_i32_314 : i32
    %572 = arith.addi %571, %567 : i32
    %c4_i32_315 = arith.constant 4 : i32
    %573 = arith.muli %572, %c4_i32_315 : i32
    %574 = arith.addi %573, %570 : i32
    %575 = arith.index_cast %574 : i32 to index
    %c0_316 = arith.constant 0 : index
    %c0_317 = arith.constant 0 : index
    %576 = vector.load %arg6[%575, %c0_316, %c0_317] : memref<36x2x256xf32, #tpu.memory_space<vmem>>, vector<1x2x256xf32>
    %577 = vector.shape_cast %576 : vector<1x2x256xf32> to vector<2x256xf32>
    %578 = arith.index_cast %570 : i32 to index
    %c0_318 = arith.constant 0 : index
    %c0_319 = arith.constant 0 : index
    %579 = vector.load %arg3[%578, %c0_318, %c0_319] : memref<4x2x256xf32, #tpu.memory_space<vmem>>, vector<1x2x256xf32>
    %580 = vector.shape_cast %579 : vector<1x2x256xf32> to vector<2x256xf32>
    %581 = arith.cmpf oge, %577, %580 : vector<2x256xf32>
    %cst_320 = arith.constant 1.000000e+00 : f32
    %cst_321 = arith.constant 0.000000e+00 : f32
    %582 = vector.broadcast %cst_320 : f32 to vector<2x256xf32>
    %583 = vector.broadcast %cst_321 : f32 to vector<2x256xf32>
    %584 = arith.select %581, %582, %583 : vector<2x256xi1>, vector<2x256xf32>
    %585 = arith.addf %561, %584 : vector<2x256xf32>
    %c18_322 = arith.constant 18 : index
    %586 = memref.load %arg1[%c18_322] : memref<64xi32, #tpu.memory_space<smem>>
    %c0_i32_323 = arith.constant 0 : i32
    %c2_i32_324 = arith.constant 2 : i32
    %587 = arith.maxsi %c0_i32_323, %586 : i32
    %588 = arith.minsi %c2_i32_324, %587 : i32
    %c19_325 = arith.constant 19 : index
    %589 = memref.load %arg1[%c19_325] : memref<64xi32, #tpu.memory_space<smem>>
    %c0_i32_326 = arith.constant 0 : i32
    %c2_i32_327 = arith.constant 2 : i32
    %590 = arith.maxsi %c0_i32_326, %589 : i32
    %591 = arith.minsi %c2_i32_327, %590 : i32
    %c9_328 = arith.constant 9 : index
    %592 = memref.load %arg2[%c9_328] : memref<32xi32, #tpu.memory_space<smem>>
    %c0_i32_329 = arith.constant 0 : i32
    %c3_i32_330 = arith.constant 3 : i32
    %593 = arith.maxsi %c0_i32_329, %592 : i32
    %594 = arith.minsi %c3_i32_330, %593 : i32
    %c3_i32_331 = arith.constant 3 : i32
    %595 = arith.muli %588, %c3_i32_331 : i32
    %596 = arith.addi %595, %591 : i32
    %c4_i32_332 = arith.constant 4 : i32
    %597 = arith.muli %596, %c4_i32_332 : i32
    %598 = arith.addi %597, %594 : i32
    %599 = arith.index_cast %598 : i32 to index
    %c0_333 = arith.constant 0 : index
    %c0_334 = arith.constant 0 : index
    %600 = vector.load %arg6[%599, %c0_333, %c0_334] : memref<36x2x256xf32, #tpu.memory_space<vmem>>, vector<1x2x256xf32>
    %601 = vector.shape_cast %600 : vector<1x2x256xf32> to vector<2x256xf32>
    %602 = arith.index_cast %594 : i32 to index
    %c0_335 = arith.constant 0 : index
    %c0_336 = arith.constant 0 : index
    %603 = vector.load %arg3[%602, %c0_335, %c0_336] : memref<4x2x256xf32, #tpu.memory_space<vmem>>, vector<1x2x256xf32>
    %604 = vector.shape_cast %603 : vector<1x2x256xf32> to vector<2x256xf32>
    %605 = arith.cmpf oge, %601, %604 : vector<2x256xf32>
    %cst_337 = arith.constant 2.000000e+00 : f32
    %cst_338 = arith.constant 0.000000e+00 : f32
    %606 = vector.broadcast %cst_337 : f32 to vector<2x256xf32>
    %607 = vector.broadcast %cst_338 : f32 to vector<2x256xf32>
    %608 = arith.select %605, %606, %607 : vector<2x256xi1>, vector<2x256xf32>
    %609 = arith.addf %585, %608 : vector<2x256xf32>
    %c20_339 = arith.constant 20 : index
    %610 = memref.load %arg1[%c20_339] : memref<64xi32, #tpu.memory_space<smem>>
    %c0_i32_340 = arith.constant 0 : i32
    %c2_i32_341 = arith.constant 2 : i32
    %611 = arith.maxsi %c0_i32_340, %610 : i32
    %612 = arith.minsi %c2_i32_341, %611 : i32
    %c21_342 = arith.constant 21 : index
    %613 = memref.load %arg1[%c21_342] : memref<64xi32, #tpu.memory_space<smem>>
    %c0_i32_343 = arith.constant 0 : i32
    %c2_i32_344 = arith.constant 2 : i32
    %614 = arith.maxsi %c0_i32_343, %613 : i32
    %615 = arith.minsi %c2_i32_344, %614 : i32
    %c10_345 = arith.constant 10 : index
    %616 = memref.load %arg2[%c10_345] : memref<32xi32, #tpu.memory_space<smem>>
    %c0_i32_346 = arith.constant 0 : i32
    %c3_i32_347 = arith.constant 3 : i32
    %617 = arith.maxsi %c0_i32_346, %616 : i32
    %618 = arith.minsi %c3_i32_347, %617 : i32
    %c3_i32_348 = arith.constant 3 : i32
    %619 = arith.muli %612, %c3_i32_348 : i32
    %620 = arith.addi %619, %615 : i32
    %c4_i32_349 = arith.constant 4 : i32
    %621 = arith.muli %620, %c4_i32_349 : i32
    %622 = arith.addi %621, %618 : i32
    %623 = arith.index_cast %622 : i32 to index
    %c0_350 = arith.constant 0 : index
    %c0_351 = arith.constant 0 : index
    %624 = vector.load %arg6[%623, %c0_350, %c0_351] : memref<36x2x256xf32, #tpu.memory_space<vmem>>, vector<1x2x256xf32>
    %625 = vector.shape_cast %624 : vector<1x2x256xf32> to vector<2x256xf32>
    %626 = arith.index_cast %618 : i32 to index
    %c0_352 = arith.constant 0 : index
    %c0_353 = arith.constant 0 : index
    %627 = vector.load %arg3[%626, %c0_352, %c0_353] : memref<4x2x256xf32, #tpu.memory_space<vmem>>, vector<1x2x256xf32>
    %628 = vector.shape_cast %627 : vector<1x2x256xf32> to vector<2x256xf32>
    %629 = arith.cmpf oge, %625, %628 : vector<2x256xf32>
    %cst_354 = arith.constant 4.000000e+00 : f32
    %cst_355 = arith.constant 0.000000e+00 : f32
    %630 = vector.broadcast %cst_354 : f32 to vector<2x256xf32>
    %631 = vector.broadcast %cst_355 : f32 to vector<2x256xf32>
    %632 = arith.select %629, %630, %631 : vector<2x256xi1>, vector<2x256xf32>
    %633 = arith.addf %609, %632 : vector<2x256xf32>
    %c22_356 = arith.constant 22 : index
    %634 = memref.load %arg1[%c22_356] : memref<64xi32, #tpu.memory_space<smem>>
    %c0_i32_357 = arith.constant 0 : i32
    %c2_i32_358 = arith.constant 2 : i32
    %635 = arith.maxsi %c0_i32_357, %634 : i32
    %636 = arith.minsi %c2_i32_358, %635 : i32
    %c23_359 = arith.constant 23 : index
    %637 = memref.load %arg1[%c23_359] : memref<64xi32, #tpu.memory_space<smem>>
    %c0_i32_360 = arith.constant 0 : i32
    %c2_i32_361 = arith.constant 2 : i32
    %638 = arith.maxsi %c0_i32_360, %637 : i32
    %639 = arith.minsi %c2_i32_361, %638 : i32
    %c11_362 = arith.constant 11 : index
    %640 = memref.load %arg2[%c11_362] : memref<32xi32, #tpu.memory_space<smem>>
    %c0_i32_363 = arith.constant 0 : i32
    %c3_i32_364 = arith.constant 3 : i32
    %641 = arith.maxsi %c0_i32_363, %640 : i32
    %642 = arith.minsi %c3_i32_364, %641 : i32
    %c3_i32_365 = arith.constant 3 : i32
    %643 = arith.muli %636, %c3_i32_365 : i32
    %644 = arith.addi %643, %639 : i32
    %c4_i32_366 = arith.constant 4 : i32
    %645 = arith.muli %644, %c4_i32_366 : i32
    %646 = arith.addi %645, %642 : i32
    %647 = arith.index_cast %646 : i32 to index
    %c0_367 = arith.constant 0 : index
    %c0_368 = arith.constant 0 : index
    %648 = vector.load %arg6[%647, %c0_367, %c0_368] : memref<36x2x256xf32, #tpu.memory_space<vmem>>, vector<1x2x256xf32>
    %649 = vector.shape_cast %648 : vector<1x2x256xf32> to vector<2x256xf32>
    %650 = arith.index_cast %642 : i32 to index
    %c0_369 = arith.constant 0 : index
    %c0_370 = arith.constant 0 : index
    %651 = vector.load %arg3[%650, %c0_369, %c0_370] : memref<4x2x256xf32, #tpu.memory_space<vmem>>, vector<1x2x256xf32>
    %652 = vector.shape_cast %651 : vector<1x2x256xf32> to vector<2x256xf32>
    %653 = arith.cmpf oge, %649, %652 : vector<2x256xf32>
    %cst_371 = arith.constant 8.000000e+00 : f32
    %cst_372 = arith.constant 0.000000e+00 : f32
    %654 = vector.broadcast %cst_371 : f32 to vector<2x256xf32>
    %655 = vector.broadcast %cst_372 : f32 to vector<2x256xf32>
    %656 = arith.select %653, %654, %655 : vector<2x256xi1>, vector<2x256xf32>
    %657 = arith.addf %633, %656 : vector<2x256xf32>
    %c0_373 = arith.constant 0 : index
    %c512 = arith.constant 512 : index
    %658 = vector.load %arg5[%c0_373, %c512] : memref<2x2048xf32, #tpu.memory_space<vmem>>, vector<2x256xf32>
    tpu.vector_store %arg5[%c0_373, %c512], %657 {strides = array<i32>} : memref<2x2048xf32, #tpu.memory_space<vmem>>, vector<2x256xf32>,
    %cst_374 = arith.constant 0.000000e+00 : f32
    %659 = vector.broadcast %cst_374 : f32 to vector<2x256xf32>
    %c24_375 = arith.constant 24 : index
    %660 = memref.load %arg1[%c24_375] : memref<64xi32, #tpu.memory_space<smem>>
    %c0_i32_376 = arith.constant 0 : i32
    %c2_i32_377 = arith.constant 2 : i32
    %661 = arith.maxsi %c0_i32_376, %660 : i32
    %662 = arith.minsi %c2_i32_377, %661 : i32
    %c25_378 = arith.constant 25 : index
    %663 = memref.load %arg1[%c25_378] : memref<64xi32, #tpu.memory_space<smem>>
    %c0_i32_379 = arith.constant 0 : i32
    %c2_i32_380 = arith.constant 2 : i32
    %664 = arith.maxsi %c0_i32_379, %663 : i32
    %665 = arith.minsi %c2_i32_380, %664 : i32
    %c12_381 = arith.constant 12 : index
    %666 = memref.load %arg2[%c12_381] : memref<32xi32, #tpu.memory_space<smem>>
    %c0_i32_382 = arith.constant 0 : i32
    %c3_i32_383 = arith.constant 3 : i32
    %667 = arith.maxsi %c0_i32_382, %666 : i32
    %668 = arith.minsi %c3_i32_383, %667 : i32
    %c3_i32_384 = arith.constant 3 : i32
    %669 = arith.muli %662, %c3_i32_384 : i32
    %670 = arith.addi %669, %665 : i32
    %c4_i32_385 = arith.constant 4 : i32
    %671 = arith.muli %670, %c4_i32_385 : i32
    %672 = arith.addi %671, %668 : i32
    %673 = arith.index_cast %672 : i32 to index
    %c0_386 = arith.constant 0 : index
    %c0_387 = arith.constant 0 : index
    %674 = vector.load %arg6[%673, %c0_386, %c0_387] : memref<36x2x256xf32, #tpu.memory_space<vmem>>, vector<1x2x256xf32>
    %675 = vector.shape_cast %674 : vector<1x2x256xf32> to vector<2x256xf32>
    %676 = arith.index_cast %668 : i32 to index
    %c0_388 = arith.constant 0 : index
    %c0_389 = arith.constant 0 : index
    %677 = vector.load %arg3[%676, %c0_388, %c0_389] : memref<4x2x256xf32, #tpu.memory_space<vmem>>, vector<1x2x256xf32>
    %678 = vector.shape_cast %677 : vector<1x2x256xf32> to vector<2x256xf32>
    %679 = arith.cmpf oge, %675, %678 : vector<2x256xf32>
    %cst_390 = arith.constant 1.000000e+00 : f32
    %cst_391 = arith.constant 0.000000e+00 : f32
    %680 = vector.broadcast %cst_390 : f32 to vector<2x256xf32>
    %681 = vector.broadcast %cst_391 : f32 to vector<2x256xf32>
    %682 = arith.select %679, %680, %681 : vector<2x256xi1>, vector<2x256xf32>
    %683 = arith.addf %659, %682 : vector<2x256xf32>
    %c26_392 = arith.constant 26 : index
    %684 = memref.load %arg1[%c26_392] : memref<64xi32, #tpu.memory_space<smem>>
    %c0_i32_393 = arith.constant 0 : i32
    %c2_i32_394 = arith.constant 2 : i32
    %685 = arith.maxsi %c0_i32_393, %684 : i32
    %686 = arith.minsi %c2_i32_394, %685 : i32
    %c27_395 = arith.constant 27 : index
    %687 = memref.load %arg1[%c27_395] : memref<64xi32, #tpu.memory_space<smem>>
    %c0_i32_396 = arith.constant 0 : i32
    %c2_i32_397 = arith.constant 2 : i32
    %688 = arith.maxsi %c0_i32_396, %687 : i32
    %689 = arith.minsi %c2_i32_397, %688 : i32
    %c13_398 = arith.constant 13 : index
    %690 = memref.load %arg2[%c13_398] : memref<32xi32, #tpu.memory_space<smem>>
    %c0_i32_399 = arith.constant 0 : i32
    %c3_i32_400 = arith.constant 3 : i32
    %691 = arith.maxsi %c0_i32_399, %690 : i32
    %692 = arith.minsi %c3_i32_400, %691 : i32
    %c3_i32_401 = arith.constant 3 : i32
    %693 = arith.muli %686, %c3_i32_401 : i32
    %694 = arith.addi %693, %689 : i32
    %c4_i32_402 = arith.constant 4 : i32
    %695 = arith.muli %694, %c4_i32_402 : i32
    %696 = arith.addi %695, %692 : i32
    %697 = arith.index_cast %696 : i32 to index
    %c0_403 = arith.constant 0 : index
    %c0_404 = arith.constant 0 : index
    %698 = vector.load %arg6[%697, %c0_403, %c0_404] : memref<36x2x256xf32, #tpu.memory_space<vmem>>, vector<1x2x256xf32>
    %699 = vector.shape_cast %698 : vector<1x2x256xf32> to vector<2x256xf32>
    %700 = arith.index_cast %692 : i32 to index
    %c0_405 = arith.constant 0 : index
    %c0_406 = arith.constant 0 : index
    %701 = vector.load %arg3[%700, %c0_405, %c0_406] : memref<4x2x256xf32, #tpu.memory_space<vmem>>, vector<1x2x256xf32>
    %702 = vector.shape_cast %701 : vector<1x2x256xf32> to vector<2x256xf32>
    %703 = arith.cmpf oge, %699, %702 : vector<2x256xf32>
    %cst_407 = arith.constant 2.000000e+00 : f32
    %cst_408 = arith.constant 0.000000e+00 : f32
    %704 = vector.broadcast %cst_407 : f32 to vector<2x256xf32>
    %705 = vector.broadcast %cst_408 : f32 to vector<2x256xf32>
    %706 = arith.select %703, %704, %705 : vector<2x256xi1>, vector<2x256xf32>
    %707 = arith.addf %683, %706 : vector<2x256xf32>
    %c28_409 = arith.constant 28 : index
    %708 = memref.load %arg1[%c28_409] : memref<64xi32, #tpu.memory_space<smem>>
    %c0_i32_410 = arith.constant 0 : i32
    %c2_i32_411 = arith.constant 2 : i32
    %709 = arith.maxsi %c0_i32_410, %708 : i32
    %710 = arith.minsi %c2_i32_411, %709 : i32
    %c29_412 = arith.constant 29 : index
    %711 = memref.load %arg1[%c29_412] : memref<64xi32, #tpu.memory_space<smem>>
    %c0_i32_413 = arith.constant 0 : i32
    %c2_i32_414 = arith.constant 2 : i32
    %712 = arith.maxsi %c0_i32_413, %711 : i32
    %713 = arith.minsi %c2_i32_414, %712 : i32
    %c14_415 = arith.constant 14 : index
    %714 = memref.load %arg2[%c14_415] : memref<32xi32, #tpu.memory_space<smem>>
    %c0_i32_416 = arith.constant 0 : i32
    %c3_i32_417 = arith.constant 3 : i32
    %715 = arith.maxsi %c0_i32_416, %714 : i32
    %716 = arith.minsi %c3_i32_417, %715 : i32
    %c3_i32_418 = arith.constant 3 : i32
    %717 = arith.muli %710, %c3_i32_418 : i32
    %718 = arith.addi %717, %713 : i32
    %c4_i32_419 = arith.constant 4 : i32
    %719 = arith.muli %718, %c4_i32_419 : i32
    %720 = arith.addi %719, %716 : i32
    %721 = arith.index_cast %720 : i32 to index
    %c0_420 = arith.constant 0 : index
    %c0_421 = arith.constant 0 : index
    %722 = vector.load %arg6[%721, %c0_420, %c0_421] : memref<36x2x256xf32, #tpu.memory_space<vmem>>, vector<1x2x256xf32>
    %723 = vector.shape_cast %722 : vector<1x2x256xf32> to vector<2x256xf32>
    %724 = arith.index_cast %716 : i32 to index
    %c0_422 = arith.constant 0 : index
    %c0_423 = arith.constant 0 : index
    %725 = vector.load %arg3[%724, %c0_422, %c0_423] : memref<4x2x256xf32, #tpu.memory_space<vmem>>, vector<1x2x256xf32>
    %726 = vector.shape_cast %725 : vector<1x2x256xf32> to vector<2x256xf32>
    %727 = arith.cmpf oge, %723, %726 : vector<2x256xf32>
    %cst_424 = arith.constant 4.000000e+00 : f32
    %cst_425 = arith.constant 0.000000e+00 : f32
    %728 = vector.broadcast %cst_424 : f32 to vector<2x256xf32>
    %729 = vector.broadcast %cst_425 : f32 to vector<2x256xf32>
    %730 = arith.select %727, %728, %729 : vector<2x256xi1>, vector<2x256xf32>
    %731 = arith.addf %707, %730 : vector<2x256xf32>
    %c30_426 = arith.constant 30 : index
    %732 = memref.load %arg1[%c30_426] : memref<64xi32, #tpu.memory_space<smem>>
    %c0_i32_427 = arith.constant 0 : i32
    %c2_i32_428 = arith.constant 2 : i32
    %733 = arith.maxsi %c0_i32_427, %732 : i32
    %734 = arith.minsi %c2_i32_428, %733 : i32
    %c31_429 = arith.constant 31 : index
    %735 = memref.load %arg1[%c31_429] : memref<64xi32, #tpu.memory_space<smem>>
    %c0_i32_430 = arith.constant 0 : i32
    %c2_i32_431 = arith.constant 2 : i32
    %736 = arith.maxsi %c0_i32_430, %735 : i32
    %737 = arith.minsi %c2_i32_431, %736 : i32
    %c15_432 = arith.constant 15 : index
    %738 = memref.load %arg2[%c15_432] : memref<32xi32, #tpu.memory_space<smem>>
    %c0_i32_433 = arith.constant 0 : i32
    %c3_i32_434 = arith.constant 3 : i32
    %739 = arith.maxsi %c0_i32_433, %738 : i32
    %740 = arith.minsi %c3_i32_434, %739 : i32
    %c3_i32_435 = arith.constant 3 : i32
    %741 = arith.muli %734, %c3_i32_435 : i32
    %742 = arith.addi %741, %737 : i32
    %c4_i32_436 = arith.constant 4 : i32
    %743 = arith.muli %742, %c4_i32_436 : i32
    %744 = arith.addi %743, %740 : i32
    %745 = arith.index_cast %744 : i32 to index
    %c0_437 = arith.constant 0 : index
    %c0_438 = arith.constant 0 : index
    %746 = vector.load %arg6[%745, %c0_437, %c0_438] : memref<36x2x256xf32, #tpu.memory_space<vmem>>, vector<1x2x256xf32>
    %747 = vector.shape_cast %746 : vector<1x2x256xf32> to vector<2x256xf32>
    %748 = arith.index_cast %740 : i32 to index
    %c0_439 = arith.constant 0 : index
    %c0_440 = arith.constant 0 : index
    %749 = vector.load %arg3[%748, %c0_439, %c0_440] : memref<4x2x256xf32, #tpu.memory_space<vmem>>, vector<1x2x256xf32>
    %750 = vector.shape_cast %749 : vector<1x2x256xf32> to vector<2x256xf32>
    %751 = arith.cmpf oge, %747, %750 : vector<2x256xf32>
    %cst_441 = arith.constant 8.000000e+00 : f32
    %cst_442 = arith.constant 0.000000e+00 : f32
    %752 = vector.broadcast %cst_441 : f32 to vector<2x256xf32>
    %753 = vector.broadcast %cst_442 : f32 to vector<2x256xf32>
    %754 = arith.select %751, %752, %753 : vector<2x256xi1>, vector<2x256xf32>
    %755 = arith.addf %731, %754 : vector<2x256xf32>
    %c0_443 = arith.constant 0 : index
    %c768 = arith.constant 768 : index
    %756 = vector.load %arg5[%c0_443, %c768] : memref<2x2048xf32, #tpu.memory_space<vmem>>, vector<2x256xf32>
    tpu.vector_store %arg5[%c0_443, %c768], %755 {strides = array<i32>} : memref<2x2048xf32, #tpu.memory_space<vmem>>, vector<2x256xf32>,
    %cst_444 = arith.constant 0.000000e+00 : f32
    %757 = vector.broadcast %cst_444 : f32 to vector<2x256xf32>
    %c32_445 = arith.constant 32 : index
    %758 = memref.load %arg1[%c32_445] : memref<64xi32, #tpu.memory_space<smem>>
    %c0_i32_446 = arith.constant 0 : i32
    %c2_i32_447 = arith.constant 2 : i32
    %759 = arith.maxsi %c0_i32_446, %758 : i32
    %760 = arith.minsi %c2_i32_447, %759 : i32
    %c33_448 = arith.constant 33 : index
    %761 = memref.load %arg1[%c33_448] : memref<64xi32, #tpu.memory_space<smem>>
    %c0_i32_449 = arith.constant 0 : i32
    %c2_i32_450 = arith.constant 2 : i32
    %762 = arith.maxsi %c0_i32_449, %761 : i32
    %763 = arith.minsi %c2_i32_450, %762 : i32
    %c16_451 = arith.constant 16 : index
    %764 = memref.load %arg2[%c16_451] : memref<32xi32, #tpu.memory_space<smem>>
    %c0_i32_452 = arith.constant 0 : i32
    %c3_i32_453 = arith.constant 3 : i32
    %765 = arith.maxsi %c0_i32_452, %764 : i32
    %766 = arith.minsi %c3_i32_453, %765 : i32
    %c3_i32_454 = arith.constant 3 : i32
    %767 = arith.muli %760, %c3_i32_454 : i32
    %768 = arith.addi %767, %763 : i32
    %c4_i32_455 = arith.constant 4 : i32
    %769 = arith.muli %768, %c4_i32_455 : i32
    %770 = arith.addi %769, %766 : i32
    %771 = arith.index_cast %770 : i32 to index
    %c0_456 = arith.constant 0 : index
    %c0_457 = arith.constant 0 : index
    %772 = vector.load %arg6[%771, %c0_456, %c0_457] : memref<36x2x256xf32, #tpu.memory_space<vmem>>, vector<1x2x256xf32>
    %773 = vector.shape_cast %772 : vector<1x2x256xf32> to vector<2x256xf32>
    %774 = arith.index_cast %766 : i32 to index
    %c0_458 = arith.constant 0 : index
    %c0_459 = arith.constant 0 : index
    %775 = vector.load %arg3[%774, %c0_458, %c0_459] : memref<4x2x256xf32, #tpu.memory_space<vmem>>, vector<1x2x256xf32>
    %776 = vector.shape_cast %775 : vector<1x2x256xf32> to vector<2x256xf32>
    %777 = arith.cmpf oge, %773, %776 : vector<2x256xf32>
    %cst_460 = arith.constant 1.000000e+00 : f32
    %cst_461 = arith.constant 0.000000e+00 : f32
    %778 = vector.broadcast %cst_460 : f32 to vector<2x256xf32>
    %779 = vector.broadcast %cst_461 : f32 to vector<2x256xf32>
    %780 = arith.select %777, %778, %779 : vector<2x256xi1>, vector<2x256xf32>
    %781 = arith.addf %757, %780 : vector<2x256xf32>
    %c34_462 = arith.constant 34 : index
    %782 = memref.load %arg1[%c34_462] : memref<64xi32, #tpu.memory_space<smem>>
    %c0_i32_463 = arith.constant 0 : i32
    %c2_i32_464 = arith.constant 2 : i32
    %783 = arith.maxsi %c0_i32_463, %782 : i32
    %784 = arith.minsi %c2_i32_464, %783 : i32
    %c35_465 = arith.constant 35 : index
    %785 = memref.load %arg1[%c35_465] : memref<64xi32, #tpu.memory_space<smem>>
    %c0_i32_466 = arith.constant 0 : i32
    %c2_i32_467 = arith.constant 2 : i32
    %786 = arith.maxsi %c0_i32_466, %785 : i32
    %787 = arith.minsi %c2_i32_467, %786 : i32
    %c17_468 = arith.constant 17 : index
    %788 = memref.load %arg2[%c17_468] : memref<32xi32, #tpu.memory_space<smem>>
    %c0_i32_469 = arith.constant 0 : i32
    %c3_i32_470 = arith.constant 3 : i32
    %789 = arith.maxsi %c0_i32_469, %788 : i32
    %790 = arith.minsi %c3_i32_470, %789 : i32
    %c3_i32_471 = arith.constant 3 : i32
    %791 = arith.muli %784, %c3_i32_471 : i32
    %792 = arith.addi %791, %787 : i32
    %c4_i32_472 = arith.constant 4 : i32
    %793 = arith.muli %792, %c4_i32_472 : i32
    %794 = arith.addi %793, %790 : i32
    %795 = arith.index_cast %794 : i32 to index
    %c0_473 = arith.constant 0 : index
    %c0_474 = arith.constant 0 : index
    %796 = vector.load %arg6[%795, %c0_473, %c0_474] : memref<36x2x256xf32, #tpu.memory_space<vmem>>, vector<1x2x256xf32>
    %797 = vector.shape_cast %796 : vector<1x2x256xf32> to vector<2x256xf32>
    %798 = arith.index_cast %790 : i32 to index
    %c0_475 = arith.constant 0 : index
    %c0_476 = arith.constant 0 : index
    %799 = vector.load %arg3[%798, %c0_475, %c0_476] : memref<4x2x256xf32, #tpu.memory_space<vmem>>, vector<1x2x256xf32>
    %800 = vector.shape_cast %799 : vector<1x2x256xf32> to vector<2x256xf32>
    %801 = arith.cmpf oge, %797, %800 : vector<2x256xf32>
    %cst_477 = arith.constant 2.000000e+00 : f32
    %cst_478 = arith.constant 0.000000e+00 : f32
    %802 = vector.broadcast %cst_477 : f32 to vector<2x256xf32>
    %803 = vector.broadcast %cst_478 : f32 to vector<2x256xf32>
    %804 = arith.select %801, %802, %803 : vector<2x256xi1>, vector<2x256xf32>
    %805 = arith.addf %781, %804 : vector<2x256xf32>
    %c36 = arith.constant 36 : index
    %806 = memref.load %arg1[%c36] : memref<64xi32, #tpu.memory_space<smem>>
    %c0_i32_479 = arith.constant 0 : i32
    %c2_i32_480 = arith.constant 2 : i32
    %807 = arith.maxsi %c0_i32_479, %806 : i32
    %808 = arith.minsi %c2_i32_480, %807 : i32
    %c37 = arith.constant 37 : index
    %809 = memref.load %arg1[%c37] : memref<64xi32, #tpu.memory_space<smem>>
    %c0_i32_481 = arith.constant 0 : i32
    %c2_i32_482 = arith.constant 2 : i32
    %810 = arith.maxsi %c0_i32_481, %809 : i32
    %811 = arith.minsi %c2_i32_482, %810 : i32
    %c18_483 = arith.constant 18 : index
    %812 = memref.load %arg2[%c18_483] : memref<32xi32, #tpu.memory_space<smem>>
    %c0_i32_484 = arith.constant 0 : i32
    %c3_i32_485 = arith.constant 3 : i32
    %813 = arith.maxsi %c0_i32_484, %812 : i32
    %814 = arith.minsi %c3_i32_485, %813 : i32
    %c3_i32_486 = arith.constant 3 : i32
    %815 = arith.muli %808, %c3_i32_486 : i32
    %816 = arith.addi %815, %811 : i32
    %c4_i32_487 = arith.constant 4 : i32
    %817 = arith.muli %816, %c4_i32_487 : i32
    %818 = arith.addi %817, %814 : i32
    %819 = arith.index_cast %818 : i32 to index
    %c0_488 = arith.constant 0 : index
    %c0_489 = arith.constant 0 : index
    %820 = vector.load %arg6[%819, %c0_488, %c0_489] : memref<36x2x256xf32, #tpu.memory_space<vmem>>, vector<1x2x256xf32>
    %821 = vector.shape_cast %820 : vector<1x2x256xf32> to vector<2x256xf32>
    %822 = arith.index_cast %814 : i32 to index
    %c0_490 = arith.constant 0 : index
    %c0_491 = arith.constant 0 : index
    %823 = vector.load %arg3[%822, %c0_490, %c0_491] : memref<4x2x256xf32, #tpu.memory_space<vmem>>, vector<1x2x256xf32>
    %824 = vector.shape_cast %823 : vector<1x2x256xf32> to vector<2x256xf32>
    %825 = arith.cmpf oge, %821, %824 : vector<2x256xf32>
    %cst_492 = arith.constant 4.000000e+00 : f32
    %cst_493 = arith.constant 0.000000e+00 : f32
    %826 = vector.broadcast %cst_492 : f32 to vector<2x256xf32>
    %827 = vector.broadcast %cst_493 : f32 to vector<2x256xf32>
    %828 = arith.select %825, %826, %827 : vector<2x256xi1>, vector<2x256xf32>
    %829 = arith.addf %805, %828 : vector<2x256xf32>
    %c38 = arith.constant 38 : index
    %830 = memref.load %arg1[%c38] : memref<64xi32, #tpu.memory_space<smem>>
    %c0_i32_494 = arith.constant 0 : i32
    %c2_i32_495 = arith.constant 2 : i32
    %831 = arith.maxsi %c0_i32_494, %830 : i32
    %832 = arith.minsi %c2_i32_495, %831 : i32
    %c39 = arith.constant 39 : index
    %833 = memref.load %arg1[%c39] : memref<64xi32, #tpu.memory_space<smem>>
    %c0_i32_496 = arith.constant 0 : i32
    %c2_i32_497 = arith.constant 2 : i32
    %834 = arith.maxsi %c0_i32_496, %833 : i32
    %835 = arith.minsi %c2_i32_497, %834 : i32
    %c19_498 = arith.constant 19 : index
    %836 = memref.load %arg2[%c19_498] : memref<32xi32, #tpu.memory_space<smem>>
    %c0_i32_499 = arith.constant 0 : i32
    %c3_i32_500 = arith.constant 3 : i32
    %837 = arith.maxsi %c0_i32_499, %836 : i32
    %838 = arith.minsi %c3_i32_500, %837 : i32
    %c3_i32_501 = arith.constant 3 : i32
    %839 = arith.muli %832, %c3_i32_501 : i32
    %840 = arith.addi %839, %835 : i32
    %c4_i32_502 = arith.constant 4 : i32
    %841 = arith.muli %840, %c4_i32_502 : i32
    %842 = arith.addi %841, %838 : i32
    %843 = arith.index_cast %842 : i32 to index
    %c0_503 = arith.constant 0 : index
    %c0_504 = arith.constant 0 : index
    %844 = vector.load %arg6[%843, %c0_503, %c0_504] : memref<36x2x256xf32, #tpu.memory_space<vmem>>, vector<1x2x256xf32>
    %845 = vector.shape_cast %844 : vector<1x2x256xf32> to vector<2x256xf32>
    %846 = arith.index_cast %838 : i32 to index
    %c0_505 = arith.constant 0 : index
    %c0_506 = arith.constant 0 : index
    %847 = vector.load %arg3[%846, %c0_505, %c0_506] : memref<4x2x256xf32, #tpu.memory_space<vmem>>, vector<1x2x256xf32>
    %848 = vector.shape_cast %847 : vector<1x2x256xf32> to vector<2x256xf32>
    %849 = arith.cmpf oge, %845, %848 : vector<2x256xf32>
    %cst_507 = arith.constant 8.000000e+00 : f32
    %cst_508 = arith.constant 0.000000e+00 : f32
    %850 = vector.broadcast %cst_507 : f32 to vector<2x256xf32>
    %851 = vector.broadcast %cst_508 : f32 to vector<2x256xf32>
    %852 = arith.select %849, %850, %851 : vector<2x256xi1>, vector<2x256xf32>
    %853 = arith.addf %829, %852 : vector<2x256xf32>
    %c0_509 = arith.constant 0 : index
    %c1024 = arith.constant 1024 : index
    %854 = vector.load %arg5[%c0_509, %c1024] : memref<2x2048xf32, #tpu.memory_space<vmem>>, vector<2x256xf32>
    tpu.vector_store %arg5[%c0_509, %c1024], %853 {strides = array<i32>} : memref<2x2048xf32, #tpu.memory_space<vmem>>, vector<2x256xf32>,
    %cst_510 = arith.constant 0.000000e+00 : f32
    %855 = vector.broadcast %cst_510 : f32 to vector<2x256xf32>
    %c40 = arith.constant 40 : index
    %856 = memref.load %arg1[%c40] : memref<64xi32, #tpu.memory_space<smem>>
    %c0_i32_511 = arith.constant 0 : i32
    %c2_i32_512 = arith.constant 2 : i32
    %857 = arith.maxsi %c0_i32_511, %856 : i32
    %858 = arith.minsi %c2_i32_512, %857 : i32
    %c41 = arith.constant 41 : index
    %859 = memref.load %arg1[%c41] : memref<64xi32, #tpu.memory_space<smem>>
    %c0_i32_513 = arith.constant 0 : i32
    %c2_i32_514 = arith.constant 2 : i32
    %860 = arith.maxsi %c0_i32_513, %859 : i32
    %861 = arith.minsi %c2_i32_514, %860 : i32
    %c20_515 = arith.constant 20 : index
    %862 = memref.load %arg2[%c20_515] : memref<32xi32, #tpu.memory_space<smem>>
    %c0_i32_516 = arith.constant 0 : i32
    %c3_i32_517 = arith.constant 3 : i32
    %863 = arith.maxsi %c0_i32_516, %862 : i32
    %864 = arith.minsi %c3_i32_517, %863 : i32
    %c3_i32_518 = arith.constant 3 : i32
    %865 = arith.muli %858, %c3_i32_518 : i32
    %866 = arith.addi %865, %861 : i32
    %c4_i32_519 = arith.constant 4 : i32
    %867 = arith.muli %866, %c4_i32_519 : i32
    %868 = arith.addi %867, %864 : i32
    %869 = arith.index_cast %868 : i32 to index
    %c0_520 = arith.constant 0 : index
    %c0_521 = arith.constant 0 : index
    %870 = vector.load %arg6[%869, %c0_520, %c0_521] : memref<36x2x256xf32, #tpu.memory_space<vmem>>, vector<1x2x256xf32>
    %871 = vector.shape_cast %870 : vector<1x2x256xf32> to vector<2x256xf32>
    %872 = arith.index_cast %864 : i32 to index
    %c0_522 = arith.constant 0 : index
    %c0_523 = arith.constant 0 : index
    %873 = vector.load %arg3[%872, %c0_522, %c0_523] : memref<4x2x256xf32, #tpu.memory_space<vmem>>, vector<1x2x256xf32>
    %874 = vector.shape_cast %873 : vector<1x2x256xf32> to vector<2x256xf32>
    %875 = arith.cmpf oge, %871, %874 : vector<2x256xf32>
    %cst_524 = arith.constant 1.000000e+00 : f32
    %cst_525 = arith.constant 0.000000e+00 : f32
    %876 = vector.broadcast %cst_524 : f32 to vector<2x256xf32>
    %877 = vector.broadcast %cst_525 : f32 to vector<2x256xf32>
    %878 = arith.select %875, %876, %877 : vector<2x256xi1>, vector<2x256xf32>
    %879 = arith.addf %855, %878 : vector<2x256xf32>
    %c42 = arith.constant 42 : index
    %880 = memref.load %arg1[%c42] : memref<64xi32, #tpu.memory_space<smem>>
    %c0_i32_526 = arith.constant 0 : i32
    %c2_i32_527 = arith.constant 2 : i32
    %881 = arith.maxsi %c0_i32_526, %880 : i32
    %882 = arith.minsi %c2_i32_527, %881 : i32
    %c43 = arith.constant 43 : index
    %883 = memref.load %arg1[%c43] : memref<64xi32, #tpu.memory_space<smem>>
    %c0_i32_528 = arith.constant 0 : i32
    %c2_i32_529 = arith.constant 2 : i32
    %884 = arith.maxsi %c0_i32_528, %883 : i32
    %885 = arith.minsi %c2_i32_529, %884 : i32
    %c21_530 = arith.constant 21 : index
    %886 = memref.load %arg2[%c21_530] : memref<32xi32, #tpu.memory_space<smem>>
    %c0_i32_531 = arith.constant 0 : i32
    %c3_i32_532 = arith.constant 3 : i32
    %887 = arith.maxsi %c0_i32_531, %886 : i32
    %888 = arith.minsi %c3_i32_532, %887 : i32
    %c3_i32_533 = arith.constant 3 : i32
    %889 = arith.muli %882, %c3_i32_533 : i32
    %890 = arith.addi %889, %885 : i32
    %c4_i32_534 = arith.constant 4 : i32
    %891 = arith.muli %890, %c4_i32_534 : i32
    %892 = arith.addi %891, %888 : i32
    %893 = arith.index_cast %892 : i32 to index
    %c0_535 = arith.constant 0 : index
    %c0_536 = arith.constant 0 : index
    %894 = vector.load %arg6[%893, %c0_535, %c0_536] : memref<36x2x256xf32, #tpu.memory_space<vmem>>, vector<1x2x256xf32>
    %895 = vector.shape_cast %894 : vector<1x2x256xf32> to vector<2x256xf32>
    %896 = arith.index_cast %888 : i32 to index
    %c0_537 = arith.constant 0 : index
    %c0_538 = arith.constant 0 : index
    %897 = vector.load %arg3[%896, %c0_537, %c0_538] : memref<4x2x256xf32, #tpu.memory_space<vmem>>, vector<1x2x256xf32>
    %898 = vector.shape_cast %897 : vector<1x2x256xf32> to vector<2x256xf32>
    %899 = arith.cmpf oge, %895, %898 : vector<2x256xf32>
    %cst_539 = arith.constant 2.000000e+00 : f32
    %cst_540 = arith.constant 0.000000e+00 : f32
    %900 = vector.broadcast %cst_539 : f32 to vector<2x256xf32>
    %901 = vector.broadcast %cst_540 : f32 to vector<2x256xf32>
    %902 = arith.select %899, %900, %901 : vector<2x256xi1>, vector<2x256xf32>
    %903 = arith.addf %879, %902 : vector<2x256xf32>
    %c44 = arith.constant 44 : index
    %904 = memref.load %arg1[%c44] : memref<64xi32, #tpu.memory_space<smem>>
    %c0_i32_541 = arith.constant 0 : i32
    %c2_i32_542 = arith.constant 2 : i32
    %905 = arith.maxsi %c0_i32_541, %904 : i32
    %906 = arith.minsi %c2_i32_542, %905 : i32
    %c45 = arith.constant 45 : index
    %907 = memref.load %arg1[%c45] : memref<64xi32, #tpu.memory_space<smem>>
    %c0_i32_543 = arith.constant 0 : i32
    %c2_i32_544 = arith.constant 2 : i32
    %908 = arith.maxsi %c0_i32_543, %907 : i32
    %909 = arith.minsi %c2_i32_544, %908 : i32
    %c22_545 = arith.constant 22 : index
    %910 = memref.load %arg2[%c22_545] : memref<32xi32, #tpu.memory_space<smem>>
    %c0_i32_546 = arith.constant 0 : i32
    %c3_i32_547 = arith.constant 3 : i32
    %911 = arith.maxsi %c0_i32_546, %910 : i32
    %912 = arith.minsi %c3_i32_547, %911 : i32
    %c3_i32_548 = arith.constant 3 : i32
    %913 = arith.muli %906, %c3_i32_548 : i32
    %914 = arith.addi %913, %909 : i32
    %c4_i32_549 = arith.constant 4 : i32
    %915 = arith.muli %914, %c4_i32_549 : i32
    %916 = arith.addi %915, %912 : i32
    %917 = arith.index_cast %916 : i32 to index
    %c0_550 = arith.constant 0 : index
    %c0_551 = arith.constant 0 : index
    %918 = vector.load %arg6[%917, %c0_550, %c0_551] : memref<36x2x256xf32, #tpu.memory_space<vmem>>, vector<1x2x256xf32>
    %919 = vector.shape_cast %918 : vector<1x2x256xf32> to vector<2x256xf32>
    %920 = arith.index_cast %912 : i32 to index
    %c0_552 = arith.constant 0 : index
    %c0_553 = arith.constant 0 : index
    %921 = vector.load %arg3[%920, %c0_552, %c0_553] : memref<4x2x256xf32, #tpu.memory_space<vmem>>, vector<1x2x256xf32>
    %922 = vector.shape_cast %921 : vector<1x2x256xf32> to vector<2x256xf32>
    %923 = arith.cmpf oge, %919, %922 : vector<2x256xf32>
    %cst_554 = arith.constant 4.000000e+00 : f32
    %cst_555 = arith.constant 0.000000e+00 : f32
    %924 = vector.broadcast %cst_554 : f32 to vector<2x256xf32>
    %925 = vector.broadcast %cst_555 : f32 to vector<2x256xf32>
    %926 = arith.select %923, %924, %925 : vector<2x256xi1>, vector<2x256xf32>
    %927 = arith.addf %903, %926 : vector<2x256xf32>
    %c46 = arith.constant 46 : index
    %928 = memref.load %arg1[%c46] : memref<64xi32, #tpu.memory_space<smem>>
    %c0_i32_556 = arith.constant 0 : i32
    %c2_i32_557 = arith.constant 2 : i32
    %929 = arith.maxsi %c0_i32_556, %928 : i32
    %930 = arith.minsi %c2_i32_557, %929 : i32
    %c47 = arith.constant 47 : index
    %931 = memref.load %arg1[%c47] : memref<64xi32, #tpu.memory_space<smem>>
    %c0_i32_558 = arith.constant 0 : i32
    %c2_i32_559 = arith.constant 2 : i32
    %932 = arith.maxsi %c0_i32_558, %931 : i32
    %933 = arith.minsi %c2_i32_559, %932 : i32
    %c23_560 = arith.constant 23 : index
    %934 = memref.load %arg2[%c23_560] : memref<32xi32, #tpu.memory_space<smem>>
    %c0_i32_561 = arith.constant 0 : i32
    %c3_i32_562 = arith.constant 3 : i32
    %935 = arith.maxsi %c0_i32_561, %934 : i32
    %936 = arith.minsi %c3_i32_562, %935 : i32
    %c3_i32_563 = arith.constant 3 : i32
    %937 = arith.muli %930, %c3_i32_563 : i32
    %938 = arith.addi %937, %933 : i32
    %c4_i32_564 = arith.constant 4 : i32
    %939 = arith.muli %938, %c4_i32_564 : i32
    %940 = arith.addi %939, %936 : i32
    %941 = arith.index_cast %940 : i32 to index
    %c0_565 = arith.constant 0 : index
    %c0_566 = arith.constant 0 : index
    %942 = vector.load %arg6[%941, %c0_565, %c0_566] : memref<36x2x256xf32, #tpu.memory_space<vmem>>, vector<1x2x256xf32>
    %943 = vector.shape_cast %942 : vector<1x2x256xf32> to vector<2x256xf32>
    %944 = arith.index_cast %936 : i32 to index
    %c0_567 = arith.constant 0 : index
    %c0_568 = arith.constant 0 : index
    %945 = vector.load %arg3[%944, %c0_567, %c0_568] : memref<4x2x256xf32, #tpu.memory_space<vmem>>, vector<1x2x256xf32>
    %946 = vector.shape_cast %945 : vector<1x2x256xf32> to vector<2x256xf32>
    %947 = arith.cmpf oge, %943, %946 : vector<2x256xf32>
    %cst_569 = arith.constant 8.000000e+00 : f32
    %cst_570 = arith.constant 0.000000e+00 : f32
    %948 = vector.broadcast %cst_569 : f32 to vector<2x256xf32>
    %949 = vector.broadcast %cst_570 : f32 to vector<2x256xf32>
    %950 = arith.select %947, %948, %949 : vector<2x256xi1>, vector<2x256xf32>
    %951 = arith.addf %927, %950 : vector<2x256xf32>
    %c0_571 = arith.constant 0 : index
    %c1280 = arith.constant 1280 : index
    %952 = vector.load %arg5[%c0_571, %c1280] : memref<2x2048xf32, #tpu.memory_space<vmem>>, vector<2x256xf32>
    tpu.vector_store %arg5[%c0_571, %c1280], %951 {strides = array<i32>} : memref<2x2048xf32, #tpu.memory_space<vmem>>, vector<2x256xf32>,
    %cst_572 = arith.constant 0.000000e+00 : f32
    %953 = vector.broadcast %cst_572 : f32 to vector<2x256xf32>
    %c48 = arith.constant 48 : index
    %954 = memref.load %arg1[%c48] : memref<64xi32, #tpu.memory_space<smem>>
    %c0_i32_573 = arith.constant 0 : i32
    %c2_i32_574 = arith.constant 2 : i32
    %955 = arith.maxsi %c0_i32_573, %954 : i32
    %956 = arith.minsi %c2_i32_574, %955 : i32
    %c49 = arith.constant 49 : index
    %957 = memref.load %arg1[%c49] : memref<64xi32, #tpu.memory_space<smem>>
    %c0_i32_575 = arith.constant 0 : i32
    %c2_i32_576 = arith.constant 2 : i32
    %958 = arith.maxsi %c0_i32_575, %957 : i32
    %959 = arith.minsi %c2_i32_576, %958 : i32
    %c24_577 = arith.constant 24 : index
    %960 = memref.load %arg2[%c24_577] : memref<32xi32, #tpu.memory_space<smem>>
    %c0_i32_578 = arith.constant 0 : i32
    %c3_i32_579 = arith.constant 3 : i32
    %961 = arith.maxsi %c0_i32_578, %960 : i32
    %962 = arith.minsi %c3_i32_579, %961 : i32
    %c3_i32_580 = arith.constant 3 : i32
    %963 = arith.muli %956, %c3_i32_580 : i32
    %964 = arith.addi %963, %959 : i32
    %c4_i32_581 = arith.constant 4 : i32
    %965 = arith.muli %964, %c4_i32_581 : i32
    %966 = arith.addi %965, %962 : i32
    %967 = arith.index_cast %966 : i32 to index
    %c0_582 = arith.constant 0 : index
    %c0_583 = arith.constant 0 : index
    %968 = vector.load %arg6[%967, %c0_582, %c0_583] : memref<36x2x256xf32, #tpu.memory_space<vmem>>, vector<1x2x256xf32>
    %969 = vector.shape_cast %968 : vector<1x2x256xf32> to vector<2x256xf32>
    %970 = arith.index_cast %962 : i32 to index
    %c0_584 = arith.constant 0 : index
    %c0_585 = arith.constant 0 : index
    %971 = vector.load %arg3[%970, %c0_584, %c0_585] : memref<4x2x256xf32, #tpu.memory_space<vmem>>, vector<1x2x256xf32>
    %972 = vector.shape_cast %971 : vector<1x2x256xf32> to vector<2x256xf32>
    %973 = arith.cmpf oge, %969, %972 : vector<2x256xf32>
    %cst_586 = arith.constant 1.000000e+00 : f32
    %cst_587 = arith.constant 0.000000e+00 : f32
    %974 = vector.broadcast %cst_586 : f32 to vector<2x256xf32>
    %975 = vector.broadcast %cst_587 : f32 to vector<2x256xf32>
    %976 = arith.select %973, %974, %975 : vector<2x256xi1>, vector<2x256xf32>
    %977 = arith.addf %953, %976 : vector<2x256xf32>
    %c50 = arith.constant 50 : index
    %978 = memref.load %arg1[%c50] : memref<64xi32, #tpu.memory_space<smem>>
    %c0_i32_588 = arith.constant 0 : i32
    %c2_i32_589 = arith.constant 2 : i32
    %979 = arith.maxsi %c0_i32_588, %978 : i32
    %980 = arith.minsi %c2_i32_589, %979 : i32
    %c51 = arith.constant 51 : index
    %981 = memref.load %arg1[%c51] : memref<64xi32, #tpu.memory_space<smem>>
    %c0_i32_590 = arith.constant 0 : i32
    %c2_i32_591 = arith.constant 2 : i32
    %982 = arith.maxsi %c0_i32_590, %981 : i32
    %983 = arith.minsi %c2_i32_591, %982 : i32
    %c25_592 = arith.constant 25 : index
    %984 = memref.load %arg2[%c25_592] : memref<32xi32, #tpu.memory_space<smem>>
    %c0_i32_593 = arith.constant 0 : i32
    %c3_i32_594 = arith.constant 3 : i32
    %985 = arith.maxsi %c0_i32_593, %984 : i32
    %986 = arith.minsi %c3_i32_594, %985 : i32
    %c3_i32_595 = arith.constant 3 : i32
    %987 = arith.muli %980, %c3_i32_595 : i32
    %988 = arith.addi %987, %983 : i32
    %c4_i32_596 = arith.constant 4 : i32
    %989 = arith.muli %988, %c4_i32_596 : i32
    %990 = arith.addi %989, %986 : i32
    %991 = arith.index_cast %990 : i32 to index
    %c0_597 = arith.constant 0 : index
    %c0_598 = arith.constant 0 : index
    %992 = vector.load %arg6[%991, %c0_597, %c0_598] : memref<36x2x256xf32, #tpu.memory_space<vmem>>, vector<1x2x256xf32>
    %993 = vector.shape_cast %992 : vector<1x2x256xf32> to vector<2x256xf32>
    %994 = arith.index_cast %986 : i32 to index
    %c0_599 = arith.constant 0 : index
    %c0_600 = arith.constant 0 : index
    %995 = vector.load %arg3[%994, %c0_599, %c0_600] : memref<4x2x256xf32, #tpu.memory_space<vmem>>, vector<1x2x256xf32>
    %996 = vector.shape_cast %995 : vector<1x2x256xf32> to vector<2x256xf32>
    %997 = arith.cmpf oge, %993, %996 : vector<2x256xf32>
    %cst_601 = arith.constant 2.000000e+00 : f32
    %cst_602 = arith.constant 0.000000e+00 : f32
    %998 = vector.broadcast %cst_601 : f32 to vector<2x256xf32>
    %999 = vector.broadcast %cst_602 : f32 to vector<2x256xf32>
    %1000 = arith.select %997, %998, %999 : vector<2x256xi1>, vector<2x256xf32>
    %1001 = arith.addf %977, %1000 : vector<2x256xf32>
    %c52 = arith.constant 52 : index
    %1002 = memref.load %arg1[%c52] : memref<64xi32, #tpu.memory_space<smem>>
    %c0_i32_603 = arith.constant 0 : i32
    %c2_i32_604 = arith.constant 2 : i32
    %1003 = arith.maxsi %c0_i32_603, %1002 : i32
    %1004 = arith.minsi %c2_i32_604, %1003 : i32
    %c53 = arith.constant 53 : index
    %1005 = memref.load %arg1[%c53] : memref<64xi32, #tpu.memory_space<smem>>
    %c0_i32_605 = arith.constant 0 : i32
    %c2_i32_606 = arith.constant 2 : i32
    %1006 = arith.maxsi %c0_i32_605, %1005 : i32
    %1007 = arith.minsi %c2_i32_606, %1006 : i32
    %c26_607 = arith.constant 26 : index
    %1008 = memref.load %arg2[%c26_607] : memref<32xi32, #tpu.memory_space<smem>>
    %c0_i32_608 = arith.constant 0 : i32
    %c3_i32_609 = arith.constant 3 : i32
    %1009 = arith.maxsi %c0_i32_608, %1008 : i32
    %1010 = arith.minsi %c3_i32_609, %1009 : i32
    %c3_i32_610 = arith.constant 3 : i32
    %1011 = arith.muli %1004, %c3_i32_610 : i32
    %1012 = arith.addi %1011, %1007 : i32
    %c4_i32_611 = arith.constant 4 : i32
    %1013 = arith.muli %1012, %c4_i32_611 : i32
    %1014 = arith.addi %1013, %1010 : i32
    %1015 = arith.index_cast %1014 : i32 to index
    %c0_612 = arith.constant 0 : index
    %c0_613 = arith.constant 0 : index
    %1016 = vector.load %arg6[%1015, %c0_612, %c0_613] : memref<36x2x256xf32, #tpu.memory_space<vmem>>, vector<1x2x256xf32>
    %1017 = vector.shape_cast %1016 : vector<1x2x256xf32> to vector<2x256xf32>
    %1018 = arith.index_cast %1010 : i32 to index
    %c0_614 = arith.constant 0 : index
    %c0_615 = arith.constant 0 : index
    %1019 = vector.load %arg3[%1018, %c0_614, %c0_615] : memref<4x2x256xf32, #tpu.memory_space<vmem>>, vector<1x2x256xf32>
    %1020 = vector.shape_cast %1019 : vector<1x2x256xf32> to vector<2x256xf32>
    %1021 = arith.cmpf oge, %1017, %1020 : vector<2x256xf32>
    %cst_616 = arith.constant 4.000000e+00 : f32
    %cst_617 = arith.constant 0.000000e+00 : f32
    %1022 = vector.broadcast %cst_616 : f32 to vector<2x256xf32>
    %1023 = vector.broadcast %cst_617 : f32 to vector<2x256xf32>
    %1024 = arith.select %1021, %1022, %1023 : vector<2x256xi1>, vector<2x256xf32>
    %1025 = arith.addf %1001, %1024 : vector<2x256xf32>
    %c54 = arith.constant 54 : index
    %1026 = memref.load %arg1[%c54] : memref<64xi32, #tpu.memory_space<smem>>
    %c0_i32_618 = arith.constant 0 : i32
    %c2_i32_619 = arith.constant 2 : i32
    %1027 = arith.maxsi %c0_i32_618, %1026 : i32
    %1028 = arith.minsi %c2_i32_619, %1027 : i32
    %c55 = arith.constant 55 : index
    %1029 = memref.load %arg1[%c55] : memref<64xi32, #tpu.memory_space<smem>>
    %c0_i32_620 = arith.constant 0 : i32
    %c2_i32_621 = arith.constant 2 : i32
    %1030 = arith.maxsi %c0_i32_620, %1029 : i32
    %1031 = arith.minsi %c2_i32_621, %1030 : i32
    %c27_622 = arith.constant 27 : index
    %1032 = memref.load %arg2[%c27_622] : memref<32xi32, #tpu.memory_space<smem>>
    %c0_i32_623 = arith.constant 0 : i32
    %c3_i32_624 = arith.constant 3 : i32
    %1033 = arith.maxsi %c0_i32_623, %1032 : i32
    %1034 = arith.minsi %c3_i32_624, %1033 : i32
    %c3_i32_625 = arith.constant 3 : i32
    %1035 = arith.muli %1028, %c3_i32_625 : i32
    %1036 = arith.addi %1035, %1031 : i32
    %c4_i32_626 = arith.constant 4 : i32
    %1037 = arith.muli %1036, %c4_i32_626 : i32
    %1038 = arith.addi %1037, %1034 : i32
    %1039 = arith.index_cast %1038 : i32 to index
    %c0_627 = arith.constant 0 : index
    %c0_628 = arith.constant 0 : index
    %1040 = vector.load %arg6[%1039, %c0_627, %c0_628] : memref<36x2x256xf32, #tpu.memory_space<vmem>>, vector<1x2x256xf32>
    %1041 = vector.shape_cast %1040 : vector<1x2x256xf32> to vector<2x256xf32>
    %1042 = arith.index_cast %1034 : i32 to index
    %c0_629 = arith.constant 0 : index
    %c0_630 = arith.constant 0 : index
    %1043 = vector.load %arg3[%1042, %c0_629, %c0_630] : memref<4x2x256xf32, #tpu.memory_space<vmem>>, vector<1x2x256xf32>
    %1044 = vector.shape_cast %1043 : vector<1x2x256xf32> to vector<2x256xf32>
    %1045 = arith.cmpf oge, %1041, %1044 : vector<2x256xf32>
    %cst_631 = arith.constant 8.000000e+00 : f32
    %cst_632 = arith.constant 0.000000e+00 : f32
    %1046 = vector.broadcast %cst_631 : f32 to vector<2x256xf32>
    %1047 = vector.broadcast %cst_632 : f32 to vector<2x256xf32>
    %1048 = arith.select %1045, %1046, %1047 : vector<2x256xi1>, vector<2x256xf32>
    %1049 = arith.addf %1025, %1048 : vector<2x256xf32>
    %c0_633 = arith.constant 0 : index
    %c1536 = arith.constant 1536 : index
    %1050 = vector.load %arg5[%c0_633, %c1536] : memref<2x2048xf32, #tpu.memory_space<vmem>>, vector<2x256xf32>
    tpu.vector_store %arg5[%c0_633, %c1536], %1049 {strides = array<i32>} : memref<2x2048xf32, #tpu.memory_space<vmem>>, vector<2x256xf32>,
    %cst_634 = arith.constant 0.000000e+00 : f32
    %1051 = vector.broadcast %cst_634 : f32 to vector<2x256xf32>
    %c56 = arith.constant 56 : index
    %1052 = memref.load %arg1[%c56] : memref<64xi32, #tpu.memory_space<smem>>
    %c0_i32_635 = arith.constant 0 : i32
    %c2_i32_636 = arith.constant 2 : i32
    %1053 = arith.maxsi %c0_i32_635, %1052 : i32
    %1054 = arith.minsi %c2_i32_636, %1053 : i32
    %c57 = arith.constant 57 : index
    %1055 = memref.load %arg1[%c57] : memref<64xi32, #tpu.memory_space<smem>>
    %c0_i32_637 = arith.constant 0 : i32
    %c2_i32_638 = arith.constant 2 : i32
    %1056 = arith.maxsi %c0_i32_637, %1055 : i32
    %1057 = arith.minsi %c2_i32_638, %1056 : i32
    %c28_639 = arith.constant 28 : index
    %1058 = memref.load %arg2[%c28_639] : memref<32xi32, #tpu.memory_space<smem>>
    %c0_i32_640 = arith.constant 0 : i32
    %c3_i32_641 = arith.constant 3 : i32
    %1059 = arith.maxsi %c0_i32_640, %1058 : i32
    %1060 = arith.minsi %c3_i32_641, %1059 : i32
    %c3_i32_642 = arith.constant 3 : i32
    %1061 = arith.muli %1054, %c3_i32_642 : i32
    %1062 = arith.addi %1061, %1057 : i32
    %c4_i32_643 = arith.constant 4 : i32
    %1063 = arith.muli %1062, %c4_i32_643 : i32
    %1064 = arith.addi %1063, %1060 : i32
    %1065 = arith.index_cast %1064 : i32 to index
    %c0_644 = arith.constant 0 : index
    %c0_645 = arith.constant 0 : index
    %1066 = vector.load %arg6[%1065, %c0_644, %c0_645] : memref<36x2x256xf32, #tpu.memory_space<vmem>>, vector<1x2x256xf32>
    %1067 = vector.shape_cast %1066 : vector<1x2x256xf32> to vector<2x256xf32>
    %1068 = arith.index_cast %1060 : i32 to index
    %c0_646 = arith.constant 0 : index
    %c0_647 = arith.constant 0 : index
    %1069 = vector.load %arg3[%1068, %c0_646, %c0_647] : memref<4x2x256xf32, #tpu.memory_space<vmem>>, vector<1x2x256xf32>
    %1070 = vector.shape_cast %1069 : vector<1x2x256xf32> to vector<2x256xf32>
    %1071 = arith.cmpf oge, %1067, %1070 : vector<2x256xf32>
    %cst_648 = arith.constant 1.000000e+00 : f32
    %cst_649 = arith.constant 0.000000e+00 : f32
    %1072 = vector.broadcast %cst_648 : f32 to vector<2x256xf32>
    %1073 = vector.broadcast %cst_649 : f32 to vector<2x256xf32>
    %1074 = arith.select %1071, %1072, %1073 : vector<2x256xi1>, vector<2x256xf32>
    %1075 = arith.addf %1051, %1074 : vector<2x256xf32>
    %c58 = arith.constant 58 : index
    %1076 = memref.load %arg1[%c58] : memref<64xi32, #tpu.memory_space<smem>>
    %c0_i32_650 = arith.constant 0 : i32
    %c2_i32_651 = arith.constant 2 : i32
    %1077 = arith.maxsi %c0_i32_650, %1076 : i32
    %1078 = arith.minsi %c2_i32_651, %1077 : i32
    %c59 = arith.constant 59 : index
    %1079 = memref.load %arg1[%c59] : memref<64xi32, #tpu.memory_space<smem>>
    %c0_i32_652 = arith.constant 0 : i32
    %c2_i32_653 = arith.constant 2 : i32
    %1080 = arith.maxsi %c0_i32_652, %1079 : i32
    %1081 = arith.minsi %c2_i32_653, %1080 : i32
    %c29_654 = arith.constant 29 : index
    %1082 = memref.load %arg2[%c29_654] : memref<32xi32, #tpu.memory_space<smem>>
    %c0_i32_655 = arith.constant 0 : i32
    %c3_i32_656 = arith.constant 3 : i32
    %1083 = arith.maxsi %c0_i32_655, %1082 : i32
    %1084 = arith.minsi %c3_i32_656, %1083 : i32
    %c3_i32_657 = arith.constant 3 : i32
    %1085 = arith.muli %1078, %c3_i32_657 : i32
    %1086 = arith.addi %1085, %1081 : i32
    %c4_i32_658 = arith.constant 4 : i32
    %1087 = arith.muli %1086, %c4_i32_658 : i32
    %1088 = arith.addi %1087, %1084 : i32
    %1089 = arith.index_cast %1088 : i32 to index
    %c0_659 = arith.constant 0 : index
    %c0_660 = arith.constant 0 : index
    %1090 = vector.load %arg6[%1089, %c0_659, %c0_660] : memref<36x2x256xf32, #tpu.memory_space<vmem>>, vector<1x2x256xf32>
    %1091 = vector.shape_cast %1090 : vector<1x2x256xf32> to vector<2x256xf32>
    %1092 = arith.index_cast %1084 : i32 to index
    %c0_661 = arith.constant 0 : index
    %c0_662 = arith.constant 0 : index
    %1093 = vector.load %arg3[%1092, %c0_661, %c0_662] : memref<4x2x256xf32, #tpu.memory_space<vmem>>, vector<1x2x256xf32>
    %1094 = vector.shape_cast %1093 : vector<1x2x256xf32> to vector<2x256xf32>
    %1095 = arith.cmpf oge, %1091, %1094 : vector<2x256xf32>
    %cst_663 = arith.constant 2.000000e+00 : f32
    %cst_664 = arith.constant 0.000000e+00 : f32
    %1096 = vector.broadcast %cst_663 : f32 to vector<2x256xf32>
    %1097 = vector.broadcast %cst_664 : f32 to vector<2x256xf32>
    %1098 = arith.select %1095, %1096, %1097 : vector<2x256xi1>, vector<2x256xf32>
    %1099 = arith.addf %1075, %1098 : vector<2x256xf32>
    %c60 = arith.constant 60 : index
    %1100 = memref.load %arg1[%c60] : memref<64xi32, #tpu.memory_space<smem>>
    %c0_i32_665 = arith.constant 0 : i32
    %c2_i32_666 = arith.constant 2 : i32
    %1101 = arith.maxsi %c0_i32_665, %1100 : i32
    %1102 = arith.minsi %c2_i32_666, %1101 : i32
    %c61 = arith.constant 61 : index
    %1103 = memref.load %arg1[%c61] : memref<64xi32, #tpu.memory_space<smem>>
    %c0_i32_667 = arith.constant 0 : i32
    %c2_i32_668 = arith.constant 2 : i32
    %1104 = arith.maxsi %c0_i32_667, %1103 : i32
    %1105 = arith.minsi %c2_i32_668, %1104 : i32
    %c30_669 = arith.constant 30 : index
    %1106 = memref.load %arg2[%c30_669] : memref<32xi32, #tpu.memory_space<smem>>
    %c0_i32_670 = arith.constant 0 : i32
    %c3_i32_671 = arith.constant 3 : i32
    %1107 = arith.maxsi %c0_i32_670, %1106 : i32
    %1108 = arith.minsi %c3_i32_671, %1107 : i32
    %c3_i32_672 = arith.constant 3 : i32
    %1109 = arith.muli %1102, %c3_i32_672 : i32
    %1110 = arith.addi %1109, %1105 : i32
    %c4_i32_673 = arith.constant 4 : i32
    %1111 = arith.muli %1110, %c4_i32_673 : i32
    %1112 = arith.addi %1111, %1108 : i32
    %1113 = arith.index_cast %1112 : i32 to index
    %c0_674 = arith.constant 0 : index
    %c0_675 = arith.constant 0 : index
    %1114 = vector.load %arg6[%1113, %c0_674, %c0_675] : memref<36x2x256xf32, #tpu.memory_space<vmem>>, vector<1x2x256xf32>
    %1115 = vector.shape_cast %1114 : vector<1x2x256xf32> to vector<2x256xf32>
    %1116 = arith.index_cast %1108 : i32 to index
    %c0_676 = arith.constant 0 : index
    %c0_677 = arith.constant 0 : index
    %1117 = vector.load %arg3[%1116, %c0_676, %c0_677] : memref<4x2x256xf32, #tpu.memory_space<vmem>>, vector<1x2x256xf32>
    %1118 = vector.shape_cast %1117 : vector<1x2x256xf32> to vector<2x256xf32>
    %1119 = arith.cmpf oge, %1115, %1118 : vector<2x256xf32>
    %cst_678 = arith.constant 4.000000e+00 : f32
    %cst_679 = arith.constant 0.000000e+00 : f32
    %1120 = vector.broadcast %cst_678 : f32 to vector<2x256xf32>
    %1121 = vector.broadcast %cst_679 : f32 to vector<2x256xf32>
    %1122 = arith.select %1119, %1120, %1121 : vector<2x256xi1>, vector<2x256xf32>
    %1123 = arith.addf %1099, %1122 : vector<2x256xf32>
    %c62 = arith.constant 62 : index
    %1124 = memref.load %arg1[%c62] : memref<64xi32, #tpu.memory_space<smem>>
    %c0_i32_680 = arith.constant 0 : i32
    %c2_i32_681 = arith.constant 2 : i32
    %1125 = arith.maxsi %c0_i32_680, %1124 : i32
    %1126 = arith.minsi %c2_i32_681, %1125 : i32
    %c63 = arith.constant 63 : index
    %1127 = memref.load %arg1[%c63] : memref<64xi32, #tpu.memory_space<smem>>
    %c0_i32_682 = arith.constant 0 : i32
    %c2_i32_683 = arith.constant 2 : i32
    %1128 = arith.maxsi %c0_i32_682, %1127 : i32
    %1129 = arith.minsi %c2_i32_683, %1128 : i32
    %c31_684 = arith.constant 31 : index
    %1130 = memref.load %arg2[%c31_684] : memref<32xi32, #tpu.memory_space<smem>>
    %c0_i32_685 = arith.constant 0 : i32
    %c3_i32_686 = arith.constant 3 : i32
    %1131 = arith.maxsi %c0_i32_685, %1130 : i32
    %1132 = arith.minsi %c3_i32_686, %1131 : i32
    %c3_i32_687 = arith.constant 3 : i32
    %1133 = arith.muli %1126, %c3_i32_687 : i32
    %1134 = arith.addi %1133, %1129 : i32
    %c4_i32_688 = arith.constant 4 : i32
    %1135 = arith.muli %1134, %c4_i32_688 : i32
    %1136 = arith.addi %1135, %1132 : i32
    %1137 = arith.index_cast %1136 : i32 to index
    %c0_689 = arith.constant 0 : index
    %c0_690 = arith.constant 0 : index
    %1138 = vector.load %arg6[%1137, %c0_689, %c0_690] : memref<36x2x256xf32, #tpu.memory_space<vmem>>, vector<1x2x256xf32>
    %1139 = vector.shape_cast %1138 : vector<1x2x256xf32> to vector<2x256xf32>
    %1140 = arith.index_cast %1132 : i32 to index
    %c0_691 = arith.constant 0 : index
    %c0_692 = arith.constant 0 : index
    %1141 = vector.load %arg3[%1140, %c0_691, %c0_692] : memref<4x2x256xf32, #tpu.memory_space<vmem>>, vector<1x2x256xf32>
    %1142 = vector.shape_cast %1141 : vector<1x2x256xf32> to vector<2x256xf32>
    %1143 = arith.cmpf oge, %1139, %1142 : vector<2x256xf32>
    %cst_693 = arith.constant 8.000000e+00 : f32
    %cst_694 = arith.constant 0.000000e+00 : f32
    %1144 = vector.broadcast %cst_693 : f32 to vector<2x256xf32>
    %1145 = vector.broadcast %cst_694 : f32 to vector<2x256xf32>
    %1146 = arith.select %1143, %1144, %1145 : vector<2x256xi1>, vector<2x256xf32>
    %1147 = arith.addf %1123, %1146 : vector<2x256xf32>
    %c0_695 = arith.constant 0 : index
    %c1792 = arith.constant 1792 : index
    %1148 = vector.load %arg5[%c0_695, %c1792] : memref<2x2048xf32, #tpu.memory_space<vmem>>, vector<2x256xf32>
    tpu.vector_store %arg5[%c0_695, %c1792], %1147 {strides = array<i32>} : memref<2x2048xf32, #tpu.memory_space<vmem>>, vector<2x256xf32>,
    return
  }
  func.func @transform_0(%arg0: i32, %arg1: memref<64xi32, #tpu.memory_space<smem>>, %arg2: memref<32xi32, #tpu.memory_space<smem>>) -> (i32, i32, i32) {
    %c0_i32 = arith.constant 0 : i32
    %c0_i32_0 = arith.constant 0 : i32
    %c0_i32_1 = arith.constant 0 : i32
    return %c0_i32, %arg0, %c0_i32_0 : i32, i32, i32
  }
  func.func @transform_1(%arg0: i32, %arg1: memref<64xi32, #tpu.memory_space<smem>>, %arg2: memref<32xi32, #tpu.memory_space<smem>>) -> (i32, i32, i32) {
    %c0_i32 = arith.constant 0 : i32
    %c0_i32_0 = arith.constant 0 : i32
    %c0_i32_1 = arith.constant 0 : i32
    %c0_i32_2 = arith.constant 0 : i32
    return %c0_i32, %c0_i32_0, %c0_i32_1 : i32, i32, i32
  }
  func.func @transform_2(%arg0: i32, %arg1: memref<64xi32, #tpu.memory_space<smem>>, %arg2: memref<32xi32, #tpu.memory_space<smem>>) -> (i32, i32) {
    %c0_i32 = arith.constant 0 : i32
    %c0_i32_0 = arith.constant 0 : i32
    return %arg0, %c0_i32 : i32, i32
  }
}

</mosaic_0001>

<bundles_post_ra>
// kernel: tpu_custom_call.1
= control target key start
LH: loop header
LB: loop body
LE: loop exit
PB: predicated region body
PF: predicated region fallthrough
CT: control target
= control target key end

     0   :  { %s4666_s0 = inlined_call_operand.hbm [shape: s32[64], index: 0, kind: input, shape index: {}]   ;;  %s4667_s2 = inlined_call_operand.hbm [shape: f32[4,2,256], index: 2, kind: input, shape index: {}]   ;;  %s4668_s3 = inlined_call_operand.hbm [shape: f32[9,1,256], index: 3, kind: input, shape index: {}]   ;;  %s4669_s4 = inlined_call_operand.hbm [shape: f32[2,2048], index: 4, kind: output, shape index: {}]   ;;  %s4670_s1 = inlined_call_operand.vmem [shape: s32[32], index: 1, kind: input, shape index: {}]  }
   0x1   :  { %4674 = sst [smem:[#allocation18_spill]] %s4669_s4  ;;  %s3268_s17 = scalar_lea.hbm %s4666_s0, 16 }
   0x2   :  { %p3269_p0 = scmp.ne.s32.totalorder %s4666_s0, %s3268_s17  ;;  %p3272_p1 = scmp.lt.u32.totalorder %s3268_s17, %s4666_s0 }
   0x4   :  { %p3274_p2 = pnand %p3272_p1, %p3269_p0 }
   0x6   :  { %3277 = shalt.err (!%p3274_p2)  }
   0x7   :  { %s3364_s22 = smov [#allocation4]   ;;  %s11_s27 = sshll.u32 %s4670_s1, 4  ;;  %s12_s27 = int_to_ptr.vmem [resolvable:$true] %s11_s27 }
   0x8   :  { %10 = dma.hbm_to_smem %s4666_s0, 16, %s3364_s22, [#allocation3] }
   0x9   :  { %s3278_s28 = scalar_lea.vmem %s12_s27, 16  ;;  %p3283_p4 = scmp.lt.s32.totalorder %s12_s27, %s12_s27 }
   0xa   :  { %p3279_p3 = scmp.ne.s32.totalorder %s12_s27, %s3278_s28  ;;  %p3284_p5 = scmp.lt.s32.totalorder %s3278_s28, %s3278_s28 }
   0xc   :  { %p3285_p6 = por %p3284_p5, %p3283_p4 }
   0xe   :  { %p3286_p7 = pnand %p3285_p6, %p3279_p3 }
  0x10   :  { %3289 = shalt.err (!%p3286_p7)  }
  0x11   :  { %s3365_s29 = smov [#allocation5]  }
  0x12   :  { %14 = dma.vmem_to_smem %s12_s27, 16, %s3365_s29, [#allocation3] }
  0x13   :  { %3356 = dma.done.wait [#allocation3], 32 }
  0x14   :  { %3357 = vsyncadd [#allocation3], 4294967264 }
  0x15   :  { %16 = sfence }
  0x16   :  { %17 = vsyncpa [#allocation7], 0 }
  0x17   :  { %18 = vsyncpa [#allocation10], 0 }
  0x18   :  { %19 = vsyncpa [#allocation8], 0  ;;  %s3366_s0 = smov [#allocation6]   ;;  %s3290_s6 = scalar_lea.hbm %s4667_s2, 256 }
  0x19   :  { %s25_s30 = sshll.u32 %s3366_s0, 4  ;;  %p3291_p8 = scmp.ne.s32.totalorder %s4667_s2, %s3290_s6  ;;  %s26_s30 = int_to_ptr.vmem [resolvable:$true] %s25_s30 }
  0x1a   :  { %p3294_p9 = scmp.lt.u32.totalorder %s3290_s6, %s4667_s2 }
  0x1c   :  { %p3296_p10 = pnand %p3294_p9, %p3291_p8 }
  0x1e   :  { %3299 = shalt.err (!%p3296_p10)
}
  0x1f   :  { %s3300_s11 = scalar_lea.vmem %s26_s30, 256  ;;  %p3305_p12 = scmp.lt.s32.totalorder %s26_s30, %s26_s30 }
  0x20   :  { %p3301_p11 = scmp.ne.s32.totalorder %s26_s30, %s3300_s11  ;;  %p3306_p13 = scmp.lt.s32.totalorder %s3300_s11, %s3300_s11 }
  0x22   :  { %p3307_p0 = por %p3306_p13, %p3305_p12 }
  0x24   :  { %p3308_p1 = pnand %p3307_p0, %p3301_p11 }
  0x26   :  { %3311 = shalt.err (!%p3308_p1)
}
  0x27   :  { %s3367_s12 = smov 64   ;;  %s3368_s13 = smov 4  }
  0x28   :  { %31 = dma.hbm_to_vmem [thread:$0]  %s4667_s2, 256, %s26_s30, [#allocation7], %s3367_s12, %s3367_s12, %s3368_s13  }
  0x29   :  { %s3369_s16 = smov [#allocation9]   ;;  %s3312_s20 = scalar_lea.hbm %s4668_s3, 288 }
  0x2a   :  { %s37_s17 = sshll.u32 %s3369_s16, 4  ;;  %p3313_p2 = scmp.ne.s32.totalorder %s4668_s3, %s3312_s20  ;;  %s38_s17 = int_to_ptr.vmem [resolvable:$true] %s37_s17 }
  0x2b   :  { %p3316_p3 = scmp.lt.u32.totalorder %s3312_s20, %s4668_s3 }
  0x2d   :  { %p3318_p4 = pnand %p3316_p3, %p3313_p2 }
  0x2f   :  { %3321 = shalt.err (!%p3318_p4)
}
  0x30   :  { %s3322_s25 = scalar_lea.vmem %s38_s17, 288  ;;  %p3327_p6 = scmp.lt.s32.totalorder %s38_s17, %s38_s17 }
  0x31   :  { %p3323_p5 = scmp.ne.s32.totalorder %s38_s17, %s3322_s25  ;;  %p3328_p7 = scmp.lt.s32.totalorder %s3322_s25, %s3322_s25 }
  0x33   :  { %p3329_p8 = por %p3328_p7, %p3327_p6 }
  0x35   :  { %p3330_p9 = pnand %p3329_p8, %p3323_p5 }
  0x37   :  { %3333 = shalt.err (!%p3330_p9)
}
  0x38   :  { %s3370_s2 = smov 32   ;;  %s3371_s26 = smov 2  }
  0x39   :  { %43 = dma.hbm_to_vmem [thread:$0]  %s4668_s3, 288, %s38_s17, [#allocation10], %s3370_s2, %s3370_s2, %s3371_s26  }
  0x3a   :  { %3358 = dma.done.wait [#allocation7], 256  }
  0x3b   :  { %3359 = vsyncadd [#allocation7], 4294967040 }
  0x3c   :  { %3360 = dma.done.wait [#allocation10], 288  }
  0x3d   :  { %3361 = vsyncadd [#allocation10], 4294967008  ;;  %v50_v0 = vlaneseq  ;;  %v3372_v1 = vmov 1983009808   ;;  %s3373_s29 = smov 1   ;;  %s3374_s3 = smov 17  }
  0x3e   :  { %v78_v2 = vunpack.c.l.s4 %v3372_v1  ;;  %v68_v8 = vld [vmem:[#allocation6] sm:$0xf]  ;;  %v70_v9 = vld [vmem:[#allocation6 + $0x4] sm:$0xf]  ;;  %v72_v10 = vld [vmem:[#allocation6 + $0x8] sm:$0xf] }
  0x3f   :  { %v3448_v3 = vand.u32 127, %v50_v0  ;;  %v3450_v4 = vshrl.u32 %v50_v0, 7  ;;  %653 = vst [vmem:[#allocation2 + $0x40] sm:$0xf] %v68_v8  ;;  %655 = vst [vmem:[#allocation2 + $0x44] sm:$0xf] %v70_v9 }
  0x40   :  { %v79_v5 = vunpack.c.0.s8 %v78_v2  ;;  %657 = vst [vmem:[#allocation2 + $0x48] sm:$0xf] %v72_v10  ;;  %v74_v12 = vld [vmem:[#allocation6 + $0xc] sm:$0xf]  ;;  %s3375_s0 = smov 111   ;;  %s3376_s30 = smov 16  }
  0x41   :  { %59 = vrot.lane.b32.xlu0 %v3448_v3, %s3373_s29  ;;  %v3455_v6 = vadd.s32 128, %v3448_v3  ;;  %659 = vst [vmem:[#allocation2 + $0x4c] sm:$0xf] %v74_v12  ;;  %s3377_s1 = smov 112   ;;  %s3378_s5 = smov 15   ;;  %v2224_v20 = vadd.s32 4294967295, %v3448_v3 }
  0x42   :  { %v82_v7 = vsub.s32 %v79_v5, %v3450_v4  ;;  %s3379_s6 = smov 113   ;;  %s3380_s7 = smov 127   ;;  %vm53_vm0 = vcmp.eq.s32.totalorder %v3448_v3, 0  ;;  %vm63_vm1 = vcmp.lt.s32.totalorder %v3448_v3, 1  ;;  %v3563_v27 = vsub.s32 0, %v3450_v4 }
  0x43   :  { %s3536_s8 = sld [smem:[#allocation4]]  ;;  %s3538_s9 = sld [smem:[#allocation4 + $0x2]]  ;;  %v2225_v22 = vadd.s32 4294967295, %v3455_v6  ;;  %v57_v23 = vsel %vm53_vm0, 255, %v2224_v20  ;;  %v3381_v29 = vmov 0   ;;  %v3580_v33 = vsub.s32 1, %v3450_v4 }
  0x44   :  { %v3460_v11 = vrot.slane %v68_v8, %v82_v7  ;;  %v147_v14 = vrot.slane %v70_v9, %v82_v7  ;;  %v3473_v16 = vrot.slane %v72_v10, %v82_v7  ;;  %v3483_v18 = vrot.slane %v74_v12, %v82_v7  ;;  %s3544_s10 = sld [smem:[#allocation4 + $0x1]]  ;;  %s3546_s11 = sld [smem:[#allocation4 + $0x4]]  ;;  %v75_v37 = vld [vmem:[#allocation9] sm:$0x3]  ;;  %v904_v38 = vld [vmem:[#allocation9 + $0x10] sm:$0x3] }
  0x45   :  { %61 = vrot.lane.b32.xlu0 %v3455_v6, %s3373_s29  ;;  %s3550_s12 = sld [smem:[#allocation4 + $0x3]]  ;;  %s3552_s13 = sld [smem:[#allocation4 + $0x6]]  ;;  %vm91_vm4 = vcmp.lt.s32.totalorder %v3448_v3, 17  ;;  %vm98_vm5 = vcmp.lt.s32.totalorder %v3448_v3, 111  ;;  %v3598_v40 = vrot.slane %v75_v37, %v3563_v27  ;;  %v3601_v41 = vrot.slane %v75_v37, %v3580_v33 }
  0x46   :  { %87 = vrot.lane.b32.xlu1 %v3460_v11, %s3374_s3  ;;  %v3465_v13 = vcombine.high %v3460_v11, %v3460_v11  ;;  %v3470_v15 = vcombine.high %v147_v14, %v147_v14  ;;  %v3479_v17 = vcombine.high %v3473_v16, %v3473_v16  ;;  %v3489_v19 = vcombine.high %v3483_v18, %v3483_v18  ;;  %s3558_s14 = sld [smem:[#allocation5]]  ;;  %s3560_s15 = sld [smem:[#allocation4 + $0x5]] }
  0x47   :  { %s3567_s16 = sld [smem:[#allocation5 + $0x1]]  ;;  %s3569_s17 = sld [smem:[#allocation4 + $0x7]]  ;;  %v3604_v42 = vrot.slane %v904_v38, %v3563_v27  ;;  %v3607_v43 = vrot.slane %v904_v38, %v3580_v33  ;;  %vm266_vm8 = vcmp.lt.s32.totalorder %v3448_v3, 16  ;;  %vm273_vm9 = vcmp.lt.s32.totalorder %v3448_v3, 112 }
  0x48   :  { %s3572_s18 = sld [smem:[#allocation5 + $0x2]]  ;;  %s3577_s19 = sld [smem:[#allocation5 + $0x3]]  ;;  %vm397_vm10 = vcmp.lt.s32.totalorder %v3448_v3, 15  ;;  %vm404_vm11 = vcmp.lt.s32.totalorder %v3448_v3, 113  ;;  %vm534_vm12 = vcmp.lt.s32.totalorder %v3448_v3, 127 }
  0x49   :  { %94 = vrot.lane.b32.xlu0 %v3460_v11, %s3375_s0  ;;  %p985_p10 = scmp.gt.s32.totalorder %s3536_s8, 0  ;;  %p1015_p11 = scmp.gt.s32.totalorder %s3538_s9, 0 }
  0x4a   :  { %89 = vrot.lane.b32.xlu1 %v3465_v13, %s3374_s3  ;;  %p2258_p12 = scmp.lt.s32.totalorder %s3536_s8, 2  ;;  %p990_p13 = scmp.gt.s32.totalorder %s3544_s10, 0 }
  0x4b   :  { %s986_s20 = scalar_select %p985_p10, %s3536_s8, 0 }
  0x4c   :  { %p2264_p0 = scmp.lt.s32.totalorder %s3544_s10, 2  ;;  %p995_p1 = scmp.gt.s32.totalorder %s3558_s14, 0 }
  0x4d   :  { %151 = vrot.lane.b32.xlu0 %v147_v14, %s3374_s3  ;;  %s4700_s20 = smov (!%p2258_p12, %s986_s20), 2  ;;  %p2269_p2 = scmp.lt.s32.totalorder %s3558_s14, 3 }
  0x4e   :  { %96 = vrot.lane.b32.xlu1 %v3465_v13, %s3375_s0  ;;  %s991_s21 = scalar_select %p990_p13, %s3544_s10, 0 }
  0x4f   :  { %s996_s22 = scalar_select %p995_p1, %s3558_s14, 0 }
  0x50   :  { %s4702_s21 = smov (!%p2264_p0, %s991_s21), 2  ;;  %s999_s23 = smul.u32 3, %s4700_s20 }
  0x51   :  { %157 = vrot.lane.b32.xlu0 %v147_v14, %s3375_s0  ;;  %s1016_s24 = scalar_select %p1015_p11, %s3538_s9, 0 }
  0x52   :  { %153 = vrot.lane.b32.xlu1 %v3470_v15, %s3374_s3  ;;  %s4704_s22 = smov (!%p2269_p2, %s996_s22), 3  ;;  %s1000_s25 = sadd.s32 %s4702_s21, %s999_s23 }
  0x53   :  { %p1045_p3 = scmp.gt.s32.totalorder %s3546_s11, 0  ;;  %s2274_s2 = sshll.u32 %s1000_s25, 2 }
  0x54   :  { %p2280_p4 = scmp.lt.s32.totalorder %s3538_s9, 2  ;;  %s3659_s26 = sadd.s32 %s4704_s22, %s2274_s2 }
  0x55   :  { %191 = vrot.lane.b32.xlu0 %v3473_v16, %s3374_s3  ;;  %p1075_p5 = scmp.gt.s32.totalorder %s3552_s13, 0  ;;  %s2999_s27 = sshll.u32 %s4704_s22, 2 }
  0x56   :  { %159 = vrot.lane.b32.xlu1 %v3470_v15, %s3375_s0  ;;  %p1020_p6 = scmp.gt.s32.totalorder %s3550_s12, 0  ;;  %p2286_p7 = scmp.lt.s32.totalorder %s3550_s12, 2 }
  0x57   :  { %s4706_s24 = smov (!%p2280_p4, %s1016_s24), 2  ;;  %p1025_p8 = scmp.gt.s32.totalorder %s3567_s16, 0 }
  0x58   :  { %p2292_p9 = scmp.lt.s32.totalorder %s3567_s16, 3  ;;  %p2303_p10 = scmp.lt.s32.totalorder %s3546_s11, 2 }
  0x59   :  { %197 = vrot.lane.b32.xlu0 %v3473_v16, %s3375_s0  ;;  %s4710_s16 = smov (!%p1025_p8, %s3567_s16), 0  ;;  %p1050_p11 = scmp.gt.s32.totalorder %s3560_s15, 0 }
  0x5a   :  { %193 = vrot.lane.b32.xlu1 %v3479_v17, %s3374_s3  ;;  %s4712_s16 = smov (!%p2292_p9, %s4710_s16), 3  ;;  %p2309_p12 = scmp.lt.s32.totalorder %s3560_s15, 2 }
  0x5b   :  { %p1055_p13 = scmp.gt.s32.totalorder %s3572_s18, 0  ;;  %s4714_s15 = smov (!%p1050_p11, %s3560_s15), 0 }
  0x5c   :  { %s4718_s15 = smov (!%p2309_p12, %s4714_s15), 2  ;;  %p2315_p0 = scmp.lt.s32.totalorder %s3572_s18, 3 }
  0x5d   :  { %231 = vrot.lane.b32.xlu0 %v3483_v18, %s3374_s3  ;;  %s1056_s8 = scalar_select %p1055_p13, %s3572_s18, 0 }
  0x5e   :  { %199 = vrot.lane.b32.xlu1 %v3479_v17, %s3375_s0  ;;  %s3763_s10 = scalar_select %p1075_p5, %s3552_s13, 0 }
  0x5f   :  { %s4720_s8 = smov (!%p2315_p0, %s1056_s8), 3  ;;  %p2326_p1 = scmp.lt.s32.totalorder %s3552_s13, 2 }
  0x60   :  { %p1080_p2 = scmp.gt.s32.totalorder %s3569_s17, 0  ;;  %p1085_p4 = scmp.gt.s32.totalorder %s3577_s19, 0 }
  0x61   :  { %237 = vrot.lane.b32.xlu0 %v3483_v18, %s3375_s0  ;;  %s4722_s10 = smov (!%p2326_p1, %s3763_s10), 2  ;;  %p2338_p5 = scmp.lt.s32.totalorder %s3577_s19, 3 }
  0x62   :  { %233 = vrot.lane.b32.xlu1 %v3489_v19, %s3374_s3  ;;  %s1029_s3 = smul.u32 3, %s4706_s24  ;;  %s4728_s19 = smov (!%p1085_p4, %s3577_s19), 0 }
  0x63   :  { %s1089_s20 = smul.u32 3, %s4722_s10  ;;  %s3818_s21 = sld [smem:[#allocation4 + $0x8]] }
  0x64   :  { %s4730_s19 = smov (!%p2338_p5, %s4728_s19), 3  ;;  %s3838_s23 = sld [smem:[#allocation4 + $0x9]] }
  0x65   :  { %262 = vrot.lane.b32.xlu0 %v3460_v11, %s3376_s30  ;;  %s3848_s2 = sld [smem:[#allocation5 + $0x4]]  ;;  %s4134_s18 = sld [smem:[#allocation4 + $0x12]] }
  0x66   :  { %239 = vrot.lane.b32.xlu1 %v3489_v19, %s3375_s0  ;;  %s4210_s25 = sld [smem:[#allocation5 + $0x9]]  ;;  %s4681_s22 = sshll.u32 %s4730_s19, 2 }
  0x69   :  { %269 = vrot.lane.b32.xlu0 %v3460_v11, %s3377_s1 }
  0x6a   :  { %264 = vrot.lane.b32.xlu1 %v3465_v13, %s3376_s30  ;;  %p1111_p8 = scmp.gt.s32.totalorder %s3838_s23, 0  ;;  %p2355_p9 = scmp.lt.s32.totalorder %s3838_s23, 2 }
  0x6b   :  { %p2361_p11 = scmp.lt.s32.totalorder %s3848_s2, 3 }
  0x6d   :  { %304 = vrot.lane.b32.xlu0 %v147_v14, %s3376_s30 }
  0x6e   :  { %271 = vrot.lane.b32.xlu1 %v3465_v13, %s3377_s1 }
  0x71   :  { %310 = vrot.lane.b32.xlu0 %v147_v14, %s3377_s1 }
  0x72   :  { %306 = vrot.lane.b32.xlu1 %v3470_v15, %s3376_s30 }
  0x75   :  { %333 = vrot.lane.b32.xlu0 %v3473_v16, %s3376_s30 }
  0x76   :  { %312 = vrot.lane.b32.xlu1 %v3470_v15, %s3377_s1 }
  0x79   :  { %339 = vrot.lane.b32.xlu0 %v3473_v16, %s3377_s1 }
  0x7a   :  { %335 = vrot.lane.b32.xlu1 %v3479_v17, %s3376_s30 }
  0x7d   :  { %362 = vrot.lane.b32.xlu0 %v3483_v18, %s3376_s30 }
  0x7e   :  { %341 = vrot.lane.b32.xlu1 %v3479_v17, %s3377_s1 }
  0x81   :  { %368 = vrot.lane.b32.xlu0 %v3483_v18, %s3377_s1 }
  0x82   :  { %364 = vrot.lane.b32.xlu1 %v3489_v19, %s3376_s30 }
  0x85   :  { %393 = vrot.lane.b32.xlu0 %v3460_v11, %s3378_s5 }
  0x86   :  { %370 = vrot.lane.b32.xlu1 %v3489_v19, %s3377_s1 }
  0x89   :  { %400 = vrot.lane.b32.xlu0 %v3460_v11, %s3379_s6 }
  0x8a   :  { %395 = vrot.lane.b32.xlu1 %v3465_v13, %s3378_s5 }
  0x8d   :  { %435 = vrot.lane.b32.xlu0 %v147_v14, %s3378_s5 }
  0x8e   :  { %402 = vrot.lane.b32.xlu1 %v3465_v13, %s3379_s6 }
  0x91   :  { %441 = vrot.lane.b32.xlu0 %v147_v14, %s3379_s6 }
  0x92   :  { %437 = vrot.lane.b32.xlu1 %v3470_v15, %s3378_s5 }
  0x95   :  { %464 = vrot.lane.b32.xlu0 %v3473_v16, %s3378_s5 }
  0x96   :  { %443 = vrot.lane.b32.xlu1 %v3470_v15, %s3379_s6 }
  0x99   :  { %470 = vrot.lane.b32.xlu0 %v3473_v16, %s3379_s6 }
  0x9a   :  { %466 = vrot.lane.b32.xlu1 %v3479_v17, %s3378_s5 }
  0x9d   :  { %493 = vrot.lane.b32.xlu0 %v3483_v18, %s3378_s5 }
  0x9e   :  { %472 = vrot.lane.b32.xlu1 %v3479_v17, %s3379_s6 }
  0xa1   :  { %499 = vrot.lane.b32.xlu0 %v3483_v18, %s3379_s6 }
  0xa2   :  { %495 = vrot.lane.b32.xlu1 %v3489_v19, %s3378_s5  ;;  %s4086_s5 = sld [smem:[#allocation5 + $0x8]] }
  0xa5   :  { %524 = vrot.lane.b32.xlu0 %v3460_v11, %s3373_s29 }
  0xa6   :  { %501 = vrot.lane.b32.xlu1 %v3489_v19, %s3379_s6  ;;  %s3007_s6 = sshll.u32 %s4712_s16, 2 }
  0xa9   :  { %530 = vrot.lane.b32.xlu0 %v3460_v11, %s3380_s7 }
  0xaa   :  { %526 = vrot.lane.b32.xlu1 %v3465_v13, %s3373_s29 }
  0xad   :  { %565 = vrot.lane.b32.xlu0 %v147_v14, %s3373_s29 }
  0xae   :  { %532 = vrot.lane.b32.xlu1 %v3465_v13, %s3380_s7 }
  0xb1   :  { %571 = vrot.lane.b32.xlu0 %v147_v14, %s3380_s7 }
  0xb2   :  { %567 = vrot.lane.b32.xlu1 %v3470_v15, %s3373_s29 }
  0xb3   :  { %v60_v21 = vpop.permute.xlu0 %59 }
  0xb5   :  { %594 = vrot.lane.b32.xlu0 %v3473_v16, %s3373_s29 }
  0xb6   :  { %573 = vrot.lane.b32.xlu1 %v3470_v15, %s3380_s7 }
  0xb7   :  { %v62_v24 = vpop.permute.xlu0 %61 }
  0xb8   :  { %v64_v25 = vsel %vm63_vm1, %v60_v21, %v62_v24  ;;  %v65_v26 = vsel %vm63_vm1, %v62_v24, %v60_v21  ;;  %v88_v28 = vpop.permute.xlu1 %87 }
  0xb9   :  { %vm66_vm2 = vcmp.eq.s32.totalorder %v65_v26, %v57_v23  ;;  %vm67_vm3 = vcmp.eq.s32.totalorder %v64_v25, %v2225_v22  ;;  %600 = vrot.lane.b32.xlu0 %v3473_v16, %s3380_s7 }
  0xba   :  { %v101_v30 = vsel %vm66_vm2, 1, %v3381_v29  ;;  %v102_v31 = vsel %vm67_vm3, 1, %v3381_v29  ;;  %596 = vrot.lane.b32.xlu1 %v3479_v17, %s3373_s29 }
  0xbb   :  { %v95_v32 = vpop.permute.xlu0 %94  ;;  %v106_v34 = vrot.slane %v101_v30, %v3563_v27  ;;  %v110_v35 = vrot.slane %v102_v31, %v3563_v27 }
  0xbc   :  { %v90_v36 = vpop.permute.xlu1 %89 }
  0xbd   :  { %623 = vrot.lane.b32.xlu0 %v3483_v18, %s3373_s29  ;;  %vm3610_vm6 = vcmp.eq.s32.totalorder %v106_v34, 1  ;;  %vm3614_vm7 = vcmp.eq.s32.totalorder %v110_v35, 1  ;;  %v92_v47 = vsel %vm91_vm4, %v88_v28, %v90_v36  ;;  %v93_v48 = vsel %vm91_vm4, %v90_v36, %v88_v28 }
  0xbe   :  { %602 = vrot.lane.b32.xlu1 %v3479_v17, %s3380_s7 }
  0xbf   :  { %v152_v39 = vpop.permute.xlu0 %151 }
  0xc0   :  { %v97_v46 = vpop.permute.xlu1 %96 }
  0xc1   :  { %629 = vrot.lane.b32.xlu0 %v3483_v18, %s3380_s7  ;;  %v99_v49 = vsel %vm98_vm5, %v95_v32, %v97_v46  ;;  %v100_v50 = vsel %vm98_vm5, %v97_v46, %v95_v32 }
  0xc2   :  { %v113_v51 = vsel %vm3610_vm6, %v93_v48, %v99_v49  ;;  %v114_v52 = vsel %vm3614_vm7, %v92_v47, %v100_v50  ;;  %v905_v53 = vsel %vm3610_vm6, %v99_v49, %v93_v48  ;;  %v906_v54 = vsel %vm3614_vm7, %v100_v50, %v92_v47  ;;  %625 = vrot.lane.b32.xlu1 %v3489_v19, %s3373_s29  ;;  %s1021_s29 = scalar_select %p1020_p6, %s3550_s12, 0 }
  0xc3   :  { %v158_v55 = vpop.permute.xlu0 %157  ;;  %v126_v56 = vmul.f32 %v3598_v40, %v113_v51  ;;  %v127_v57 = vmul.f32 %v3601_v41, %v114_v52  ;;  %v918_v58 = vmul.f32 %v3604_v42, %v905_v53  ;;  %v919_v59 = vmul.f32 %v3607_v43, %v906_v54  ;;  %p1106_p6 = scmp.gt.s32.totalorder %s3818_s21, 0 }
  0xc4   :  { %v154_v60 = vpop.permute.xlu1 %153  ;;  %s4708_s29 = smov (!%p2286_p7, %s1021_s29), 2  ;;  %p2349_p7 = scmp.lt.s32.totalorder %s3818_s21, 2 }
  0xc5   :  { %v130_v61 = vcombine.low %v126_v56, %v127_v57  ;;  %v922_v62 = vcombine.low %v918_v58, %v919_v59  ;;  %v155_v1 = vsel %vm91_vm4, %v152_v39, %v154_v60  ;;  %v156_v2 = vsel %vm91_vm4, %v154_v60, %v152_v39  ;;  %s1030_s0 = sadd.s32 %s4708_s29, %s1029_s3  ;;  %v261_v60 = vld [vmem:[#allocation9 + $0x2] sm:$0x3]  ;;  %s3852_s29 = sld [smem:[#allocation4 + $0xa]] }
  0xc6   :  { %631 = vrot.lane.b32.xlu1 %v3489_v19, %s3380_s7  ;;  %s2297_s30 = sshll.u32 %s1030_s0, 2 }
  0xc7   :  { %v192_v63 = vpop.permute.xlu0 %191  ;;  %2226 = vst.sshfl [vmem:[#allocation2] sm:$0x33 pattern:$0x76325410] %v130_v61  ;;  %s3720_s1 = sadd.s32 %s4712_s16, %s2297_s30  ;;  %v823_v61 = vld [vmem:[#allocation9 + $0xe] sm:$0x3] }
  0xc8   :  { %2254 = vst.sshfl [vmem:[#allocation2 + $0x80] sm:$0x33 pattern:$0x76325410] %v922_v62  ;;  %v160_v0 = vpop.permute.xlu1 %159  ;;  %s1046_s7 = scalar_select %p1045_p3, %s3546_s11, 0 }
  0xc9   :  { %v161_v4 = vsel %vm98_vm5, %v158_v55, %v160_v0  ;;  %v162_v5 = vsel %vm98_vm5, %v160_v0, %v158_v55  ;;  %v3779_v0 = vrot.slane %v823_v61, %v3580_v33  ;;  %p2332_p3 = scmp.lt.s32.totalorder %s3569_s17, 2  ;;  %s4724_s17 = smov (!%p1080_p2, %s3569_s17), 0 }
  0xca   :  { %v163_v6 = vsel %vm3610_vm6, %v156_v2, %v161_v4  ;;  %v164_v7 = vsel %vm3614_vm7, %v155_v1, %v162_v5  ;;  %v933_v8 = vsel %vm3610_vm6, %v161_v4, %v156_v2  ;;  %v934_v9 = vsel %vm3614_vm7, %v162_v5, %v155_v1  ;;  %s4716_s7 = smov (!%p2303_p10, %s1046_s7), 2  ;;  %p1116_p10 = scmp.gt.s32.totalorder %s3848_s2, 0 }
  0xcb   :  { %v198_v10 = vpop.permute.xlu0 %197  ;;  %v165_v11 = vmul.f32 %v163_v6, %v3598_v40  ;;  %v166_v12 = vmul.f32 %v164_v7, %v3601_v41  ;;  %v935_v13 = vmul.f32 %v933_v8, %v3604_v42  ;;  %v936_v14 = vmul.f32 %v934_v9, %v3607_v43  ;;  %s1059_s9 = smul.u32 3, %s4716_s7  ;;  %s4726_s17 = smov (!%p2332_p3, %s4724_s17), 2 }
  0xcc   :  { %v194_v15 = vpop.permute.xlu1 %193  ;;  %s1090_s13 = sadd.s32 %s4726_s17, %s1089_s20  ;;  %s4736_s2 = smov (!%p1116_p10, %s3848_s2), 0 }
  0xcd   :  { %v169_v16 = vcombine.low %v165_v11, %v166_v12  ;;  %v939_v17 = vcombine.low %v935_v13, %v936_v14  ;;  %v195_v20 = vsel %vm91_vm4, %v192_v63, %v194_v15  ;;  %v196_v21 = vsel %vm91_vm4, %v194_v15, %v192_v63  ;;  %s1060_s11 = sadd.s32 %s4718_s15, %s1059_s9  ;;  %s3015_s15 = sshll.u32 %s4720_s8, 2 }
  0xce   :  { %s2320_s12 = sshll.u32 %s1060_s11, 2  ;;  %s2343_s24 = sshll.u32 %s1090_s13, 2 }
  0xcf   :  { %v232_v18 = vpop.permute.xlu0 %231  ;;  %2227 = vst.sshfl [vmem:[#allocation2 + $0x4] sm:$0x33 pattern:$0x76325410] %v169_v16  ;;  %s3783_s14 = sadd.s32 %s4720_s8, %s2320_s12  ;;  %s3846_s17 = sadd.s32 %s4730_s19, %s2343_s24 }
  0xd0   :  { %2255 = vst.sshfl [vmem:[#allocation2 + $0x84] sm:$0x33 pattern:$0x76325410] %v939_v17  ;;  %v200_v19 = vpop.permute.xlu1 %199  ;;  %s1107_s3 = scalar_select %p1106_p6, %s3818_s21, 0 }
  0xd1   :  { %v201_v22 = vsel %vm98_vm5, %v198_v10, %v200_v19  ;;  %v202_v23 = vsel %vm98_vm5, %v200_v19, %v198_v10  ;;  %s1112_s0 = scalar_select %p1111_p8, %s3838_s23, 0 }
  0xd2   :  { %v203_v24 = vsel %vm3610_vm6, %v196_v21, %v201_v22  ;;  %v204_v25 = vsel %vm3614_vm7, %v195_v20, %v202_v23  ;;  %v950_v26 = vsel %vm3610_vm6, %v201_v22, %v196_v21  ;;  %v951_v28 = vsel %vm3614_vm7, %v202_v23, %v195_v20  ;;  %s4732_s3 = smov (!%p2349_p7, %s1107_s3), 2  ;;  %s4738_s2 = smov (!%p2361_p11, %s4736_s2), 3 }
  0xd3   :  { %v238_v29 = vpop.permute.xlu0 %237  ;;  %v205_v30 = vmul.f32 %v203_v24, %v3598_v40  ;;  %v206_v31 = vmul.f32 %v204_v25, %v3601_v41  ;;  %v952_v32 = vmul.f32 %v950_v26, %v3604_v42  ;;  %v953_v34 = vmul.f32 %v951_v28, %v3607_v43  ;;  %s4734_s0 = smov (!%p2355_p9, %s1112_s0), 2  ;;  %s1120_s7 = smul.u32 3, %s4732_s3 }
  0xd4   :  { %v234_v35 = vpop.permute.xlu1 %233  ;;  %p1136_p12 = scmp.gt.s32.totalorder %s3852_s29, 0  ;;  %p2372_p13 = scmp.lt.s32.totalorder %s3852_s29, 2 }
  0xd5   :  { %v209_v36 = vcombine.low %v205_v30, %v206_v31  ;;  %v956_v37 = vcombine.low %v952_v32, %v953_v34  ;;  %v235_v46 = vsel %vm91_vm4, %v232_v18, %v234_v35  ;;  %v236_v47 = vsel %vm91_vm4, %v234_v35, %v232_v18  ;;  %s1121_s9 = sadd.s32 %s4734_s0, %s1120_s7  ;;  %s3914_s20 = sld [smem:[#allocation4 + $0xb]] }
  0xd6   :  { %s2366_s10 = sshll.u32 %s1121_s9, 2  ;;  %s3916_s21 = sld [smem:[#allocation5 + $0x5]] }
  0xd7   :  { %v263_v38 = vpop.permute.xlu0 %262  ;;  %2228 = vst.sshfl [vmem:[#allocation2 + $0x8] sm:$0x33 pattern:$0x76325410] %v209_v36  ;;  %s3912_s12 = sadd.s32 %s4738_s2, %s2366_s10  ;;  %s3936_s24 = sld [smem:[#allocation4 + $0xc]] }
  0xd8   :  { %2256 = vst.sshfl [vmem:[#allocation2 + $0x88] sm:$0x33 pattern:$0x76325410] %v956_v37  ;;  %v240_v39 = vpop.permute.xlu1 %239  ;;  %s1137_s13 = scalar_select %p1136_p12, %s3852_s29, 0 }
  0xd9   :  { %v241_v48 = vsel %vm98_vm5, %v238_v29, %v240_v39  ;;  %v242_v49 = vsel %vm98_vm5, %v240_v39, %v238_v29  ;;  %s3950_s3 = sld [smem:[#allocation4 + $0xd]]  ;;  %s3952_s29 = sld [smem:[#allocation5 + $0x6]] }
  0xda   :  { %v243_v50 = vsel %vm3610_vm6, %v236_v47, %v241_v48  ;;  %v244_v51 = vsel %vm3614_vm7, %v235_v46, %v242_v49  ;;  %v967_v52 = vsel %vm3610_vm6, %v241_v48, %v236_v47  ;;  %v968_v53 = vsel %vm3614_vm7, %v242_v49, %v235_v46  ;;  %s4740_s13 = smov (!%p2372_p13, %s1137_s13), 2  ;;  %s3984_s9 = sld [smem:[#allocation4 + $0xe]] }
  0xdb   :  { %v270_v54 = vpop.permute.xlu0 %269  ;;  %v245_v55 = vmul.f32 %v243_v50, %v3598_v40  ;;  %v246_v56 = vmul.f32 %v244_v51, %v3601_v41  ;;  %v969_v57 = vmul.f32 %v967_v52, %v3604_v42  ;;  %v970_v58 = vmul.f32 %v968_v53, %v3607_v43  ;;  %p1141_p0 = scmp.gt.s32.totalorder %s3914_s20, 0  ;;  %p2378_p1 = scmp.lt.s32.totalorder %s3914_s20, 2 }
  0xdc   :  { %v265_v59 = vpop.permute.xlu1 %264  ;;  %v3770_v41 = vrot.slane %v261_v60, %v3563_v27  ;;  %v3773_v42 = vrot.slane %v261_v60, %v3580_v33  ;;  %v3776_v43 = vrot.slane %v823_v61, %v3563_v27  ;;  %p1146_p2 = scmp.gt.s32.totalorder %s3916_s21, 0  ;;  %p2384_p3 = scmp.lt.s32.totalorder %s3916_s21, 3 }
  0xdd   :  { %v249_v62 = vcombine.low %v245_v55, %v246_v56  ;;  %v973_v63 = vcombine.low %v969_v57, %v970_v58  ;;  %v267_v2 = vsel %vm266_vm8, %v263_v38, %v265_v59  ;;  %v268_v4 = vsel %vm266_vm8, %v265_v59, %v263_v38  ;;  %s4742_s20 = smov (!%p1141_p0, %s3914_s20), 0  ;;  %s1150_s0 = smul.u32 3, %s4740_s13 }
  0xde   :  { %s4744_s21 = smov (!%p1146_p2, %s3916_s21), 0  ;;  %s4746_s20 = smov (!%p2378_p1, %s4742_s20), 2 }
  0xdf   :  { %v305_v40 = vpop.permute.xlu0 %304  ;;  %2229 = vst.sshfl [vmem:[#allocation2 + $0xc] sm:$0x33 pattern:$0x76325410] %v249_v62  ;;  %s4748_s21 = smov (!%p2384_p3, %s4744_s21), 3  ;;  %s1151_s10 = sadd.s32 %s4746_s20, %s1150_s0 }
  0xe0   :  { %2257 = vst.sshfl [vmem:[#allocation2 + $0x8c] sm:$0x33 pattern:$0x76325410] %v973_v63  ;;  %v272_v1 = vpop.permute.xlu1 %271  ;;  %p1166_p4 = scmp.gt.s32.totalorder %s3936_s24, 0  ;;  %s2389_s13 = sshll.u32 %s1151_s10, 2 }
  0xe1   :  { %v274_v5 = vsel %vm273_vm9, %v270_v54, %v272_v1  ;;  %v275_v6 = vsel %vm273_vm9, %v272_v1, %v270_v54  ;;  %p2395_p5 = scmp.lt.s32.totalorder %s3936_s24, 2  ;;  %p1171_p6 = scmp.gt.s32.totalorder %s3950_s3, 0 }
  0xe2   :  { %v276_v7 = vsel %vm3610_vm6, %v268_v4, %v274_v5  ;;  %v277_v8 = vsel %vm3614_vm7, %v267_v2, %v275_v6  ;;  %v824_v9 = vsel %vm3610_vm6, %v274_v5, %v268_v4  ;;  %v825_v10 = vsel %vm3614_vm7, %v275_v6, %v267_v2  ;;  %s4002_s20 = sadd.s32 %s4748_s21, %s2389_s13  ;;  %p2401_p7 = scmp.lt.s32.totalorder %s3950_s3, 2 }
  0xe3   :  { %v311_v11 = vpop.permute.xlu0 %310  ;;  %v289_v12 = vmul.f32 %v3770_v41, %v276_v7  ;;  %v290_v13 = vmul.f32 %v3773_v42, %v277_v8  ;;  %v837_v14 = vmul.f32 %v3776_v43, %v824_v9  ;;  %v838_v15 = vmul.f32 %v3779_v0, %v825_v10  ;;  %p1176_p8 = scmp.gt.s32.totalorder %s3952_s29, 0  ;;  %p2407_p9 = scmp.lt.s32.totalorder %s3952_s29, 3 }
  0xe4   :  { %v307_v16 = vpop.permute.xlu1 %306  ;;  %s1167_s0 = scalar_select %p1166_p4, %s3936_s24, 0 }
  0xe5   :  { %v293_v17 = vcombine.low %v289_v12, %v290_v13  ;;  %v841_v18 = vcombine.low %v837_v14, %v838_v15  ;;  %v308_v21 = vsel %vm266_vm8, %v305_v40, %v307_v16  ;;  %v309_v22 = vsel %vm266_vm8, %v307_v16, %v305_v40  ;;  %v392_v16 = vld [vmem:[#allocation9 + $0x4] sm:$0x3]  ;;  %s1172_s23 = scalar_select %p1171_p6, %s3950_s3, 0 }
  0xe6   :  { %s4750_s0 = smov (!%p2395_p5, %s1167_s0), 2  ;;  %p1196_p10 = scmp.gt.s32.totalorder %s3984_s9, 0 }
  0xe7   :  { %v334_v19 = vpop.permute.xlu0 %333  ;;  %2230 = vst.sshfl [vmem:[#allocation2 + $0x10] sm:$0x33 pattern:$0x76325410] %v293_v17  ;;  %v742_v17 = vld [vmem:[#allocation9 + $0xc] sm:$0x3] }
  0xe8   :  { %2250 = vst.sshfl [vmem:[#allocation2 + $0x70] sm:$0x33 pattern:$0x76325410] %v841_v18  ;;  %v313_v20 = vpop.permute.xlu1 %312  ;;  %s4752_s23 = smov (!%p2401_p7, %s1172_s23), 2  ;;  %s1180_s13 = smul.u32 3, %s4750_s0 }
  0xe9   :  { %v314_v23 = vsel %vm273_vm9, %v311_v11, %v313_v20  ;;  %v315_v24 = vsel %vm273_vm9, %v313_v20, %v311_v11  ;;  %v3933_v20 = vrot.slane %v742_v17, %v3580_v33  ;;  %s1177_s24 = scalar_select %p1176_p8, %s3952_s29, 0 }
  0xea   :  { %v316_v25 = vsel %vm3610_vm6, %v309_v22, %v314_v23  ;;  %v317_v26 = vsel %vm3614_vm7, %v308_v21, %v315_v24  ;;  %v852_v28 = vsel %vm3610_vm6, %v314_v23, %v309_v22  ;;  %v853_v29 = vsel %vm3614_vm7, %v315_v24, %v308_v21  ;;  %s1181_s3 = sadd.s32 %s4752_s23, %s1180_s13  ;;  %p2418_p11 = scmp.lt.s32.totalorder %s3984_s9, 2 }
  0xeb   :  { %v340_v30 = vpop.permute.xlu0 %339  ;;  %v318_v31 = vmul.f32 %v316_v25, %v3770_v41  ;;  %v319_v32 = vmul.f32 %v317_v26, %v3773_v42  ;;  %v854_v34 = vmul.f32 %v852_v28, %v3776_v43  ;;  %v855_v35 = vmul.f32 %v853_v29, %v3779_v0  ;;  %s4754_s24 = smov (!%p2407_p9, %s1177_s24), 3  ;;  %s2412_s30 = sshll.u32 %s1181_s3, 2 }
  0xec   :  { %v336_v36 = vpop.permute.xlu1 %335  ;;  %s4055_s23 = sadd.s32 %s4754_s24, %s2412_s30  ;;  %s4057_s29 = sld [smem:[#allocation4 + $0xf]] }
  0xed   :  { %v322_v37 = vcombine.low %v318_v31, %v319_v32  ;;  %v858_v38 = vcombine.low %v854_v34, %v855_v35  ;;  %v337_v47 = vsel %vm266_vm8, %v334_v19, %v336_v36  ;;  %v338_v48 = vsel %vm266_vm8, %v336_v36, %v334_v19  ;;  %s4067_s0 = sld [smem:[#allocation5 + $0x7]]  ;;  %s4077_s3 = sld [smem:[#allocation4 + $0x10]] }
  0xee   :  { %v3930_v19 = vrot.slane %v742_v17, %v3563_v27  ;;  %s1197_s30 = scalar_select %p1196_p10, %s3984_s9, 0 }
  0xef   :  { %v363_v39 = vpop.permute.xlu0 %362  ;;  %2231 = vst.sshfl [vmem:[#allocation2 + $0x14] sm:$0x33 pattern:$0x76325410] %v322_v37  ;;  %s4084_s10 = sld [smem:[#allocation4 + $0x11]]  ;;  %p1237_p6 = scmp.gt.s32.totalorder %s4086_s5, 0 }
  0xf0   :  { %2251 = vst.sshfl [vmem:[#allocation2 + $0x74] sm:$0x33 pattern:$0x76325410] %v858_v38  ;;  %v342_v46 = vpop.permute.xlu1 %341  ;;  %s4756_s30 = smov (!%p2418_p11, %s1197_s30), 2  ;;  %p2453_p7 = scmp.lt.s32.totalorder %s4086_s5, 3 }
  0xf1   :  { %v343_v49 = vsel %vm273_vm9, %v340_v30, %v342_v46  ;;  %v344_v50 = vsel %vm273_vm9, %v342_v46, %v340_v30  ;;  %s1210_s28 = smul.u32 3, %s4756_s30  ;;  %p1257_p8 = scmp.gt.s32.totalorder %s4134_s18, 0 }
  0xf2   :  { %v345_v51 = vsel %vm3610_vm6, %v338_v48, %v343_v49  ;;  %v346_v52 = vsel %vm3614_vm7, %v337_v47, %v344_v50  ;;  %v869_v53 = vsel %vm3610_vm6, %v343_v49, %v338_v48  ;;  %v870_v54 = vsel %vm3614_vm7, %v344_v50, %v337_v47  ;;  %p1201_p12 = scmp.gt.s32.totalorder %s4057_s29, 0  ;;  %p2424_p13 = scmp.lt.s32.totalorder %s4057_s29, 2 }
  0xf3   :  { %v369_v55 = vpop.permute.xlu0 %368  ;;  %v347_v56 = vmul.f32 %v345_v51, %v3770_v41  ;;  %v348_v57 = vmul.f32 %v346_v52, %v3773_v42  ;;  %v871_v58 = vmul.f32 %v869_v53, %v3776_v43  ;;  %v872_v59 = vmul.f32 %v870_v54, %v3779_v0  ;;  %p1206_p0 = scmp.gt.s32.totalorder %s4067_s0, 0  ;;  %p2430_p1 = scmp.lt.s32.totalorder %s4067_s0, 3 }
  0xf4   :  { %v365_v60 = vpop.permute.xlu1 %364  ;;  %s1202_s9 = scalar_select %p1201_p12, %s4057_s29, 0 }
  0xf5   :  { %v351_v61 = vcombine.low %v347_v56, %v348_v57  ;;  %v875_v62 = vcombine.low %v871_v58, %v872_v59  ;;  %v366_v1 = vsel %vm266_vm8, %v363_v39, %v365_v60  ;;  %v367_v2 = vsel %vm266_vm8, %v365_v60, %v363_v39  ;;  %s1207_s13 = scalar_select %p1206_p0, %s4067_s0, 0 }
  0xf6   :  { %s4758_s9 = smov (!%p2424_p13, %s1202_s9), 2  ;;  %p1227_p2 = scmp.gt.s32.totalorder %s4077_s3, 0 }
  0xf7   :  { %v394_v63 = vpop.permute.xlu0 %393  ;;  %2232 = vst.sshfl [vmem:[#allocation2 + $0x18] sm:$0x33 pattern:$0x76325410] %v351_v61  ;;  %s4760_s13 = smov (!%p2430_p1, %s1207_s13), 3  ;;  %s1211_s7 = sadd.s32 %s4758_s9, %s1210_s28 }
  0xf8   :  { %2252 = vst.sshfl [vmem:[#allocation2 + $0x78] sm:$0x33 pattern:$0x76325410] %v875_v62  ;;  %v371_v40 = vpop.permute.xlu1 %370  ;;  %s2435_s11 = sshll.u32 %s1211_s7, 2  ;;  %p2441_p3 = scmp.lt.s32.totalorder %s4077_s3, 2 }
  0xf9   :  { %v372_v4 = vsel %vm273_vm9, %v369_v55, %v371_v40  ;;  %v373_v5 = vsel %vm273_vm9, %v371_v40, %v369_v55  ;;  %s4147_s28 = sadd.s32 %s4760_s13, %s2435_s11  ;;  %p1232_p4 = scmp.gt.s32.totalorder %s4084_s10, 0 }
  0xfa   :  { %v374_v6 = vsel %vm3610_vm6, %v367_v2, %v372_v4  ;;  %v375_v7 = vsel %vm3614_vm7, %v366_v1, %v373_v5  ;;  %v886_v8 = vsel %vm3610_vm6, %v372_v4, %v367_v2  ;;  %v887_v9 = vsel %vm3614_vm7, %v373_v5, %v366_v1  ;;  %p2447_p5 = scmp.lt.s32.totalorder %s4084_s10, 2  ;;  %s4207_s29 = sld [smem:[#allocation4 + $0x13]] }
  0xfb   :  { %v401_v10 = vpop.permute.xlu0 %400  ;;  %v376_v11 = vmul.f32 %v374_v6, %v3770_v41  ;;  %v377_v12 = vmul.f32 %v375_v7, %v3773_v42  ;;  %v888_v13 = vmul.f32 %v886_v8, %v3776_v43  ;;  %v889_v14 = vmul.f32 %v887_v9, %v3779_v0  ;;  %s1228_s7 = scalar_select %p1227_p2, %s4077_s3, 0 }
  0xfc   :  { %v396_v15 = vpop.permute.xlu1 %395  ;;  %v3924_v43 = vrot.slane %v392_v16, %v3563_v27  ;;  %v3927_v0 = vrot.slane %v392_v16, %v3580_v33  ;;  %s1233_s0 = scalar_select %p1232_p4, %s4084_s10, 0 }
  0xfd   :  { %v380_v18 = vcombine.low %v376_v11, %v377_v12  ;;  %v892_v41 = vcombine.low %v888_v13, %v889_v14  ;;  %v398_v22 = vsel %vm397_vm10, %v394_v63, %v396_v15  ;;  %v399_v23 = vsel %vm397_vm10, %v396_v15, %v394_v63  ;;  %s4762_s7 = smov (!%p2441_p3, %s1228_s7), 2  ;;  %p2464_p9 = scmp.lt.s32.totalorder %s4134_s18, 2 }
  0xfe   :  { %s4764_s0 = smov (!%p2447_p5, %s1233_s0), 2  ;;  %s1241_s3 = smul.u32 3, %s4762_s7 }
  0xff   :  { %v436_v42 = vpop.permute.xlu0 %435  ;;  %2233 = vst.sshfl [vmem:[#allocation2 + $0x1c] sm:$0x33 pattern:$0x76325410] %v380_v18  ;;  %s1238_s30 = scalar_select %p1237_p6, %s4086_s5, 0 }
 0x100   :  { %2253 = vst.sshfl [vmem:[#allocation2 + $0x7c] sm:$0x33 pattern:$0x76325410] %v892_v41  ;;  %v403_v21 = vpop.permute.xlu1 %402  ;;  %s1242_s10 = sadd.s32 %s4764_s0, %s1241_s3  ;;  %s4229_s3 = sld [smem:[#allocation4 + $0x14]] }
 0x101   :  { %v405_v24 = vsel %vm404_vm11, %v401_v10, %v403_v21  ;;  %v406_v25 = vsel %vm404_vm11, %v403_v21, %v401_v10  ;;  %s4766_s30 = smov (!%p2453_p7, %s1238_s30), 3  ;;  %s2458_s9 = sshll.u32 %s1242_s10, 2 }
 0x102   :  { %v407_v26 = vsel %vm3610_vm6, %v399_v23, %v405_v24  ;;  %v408_v28 = vsel %vm3614_vm7, %v398_v22, %v406_v25  ;;  %v743_v29 = vsel %vm3610_vm6, %v405_v24, %v399_v23  ;;  %v744_v30 = vsel %vm3614_vm7, %v406_v25, %v398_v22  ;;  %4679 = sst [smem:[#allocation16_spill]] %s4766_s30  ;;  %s4203_s5 = sadd.s32 %s4766_s30, %s2458_s9 }
 0x103   :  { %v442_v31 = vpop.permute.xlu0 %441  ;;  %v420_v32 = vmul.f32 %v3924_v43, %v407_v26  ;;  %v421_v34 = vmul.f32 %v3927_v0, %v408_v28  ;;  %v756_v35 = vmul.f32 %v3930_v19, %v743_v29  ;;  %v757_v36 = vmul.f32 %v3933_v20, %v744_v30  ;;  %4680 = sst [smem:[#allocation17_spill]] %s4203_s5  ;;  %s4231_s10 = sld [smem:[#allocation4 + $0x15]] }
 0x104   :  { %v438_v37 = vpop.permute.xlu1 %437  ;;  %s1258_s0 = scalar_select %p1257_p8, %s4134_s18, 0 }
 0x105   :  { %v424_v38 = vcombine.low %v420_v32, %v421_v34  ;;  %v760_v39 = vcombine.low %v756_v35, %v757_v36  ;;  %v439_v48 = vsel %vm397_vm10, %v436_v42, %v438_v37  ;;  %v440_v49 = vsel %vm397_vm10, %v438_v37, %v436_v42  ;;  %v523_v36 = vld [vmem:[#allocation9 + $0x6] sm:$0x3]  ;;  %p1262_p10 = scmp.gt.s32.totalorder %s4207_s29, 0  ;;  %p2470_p11 = scmp.lt.s32.totalorder %s4207_s29, 2 }
 0x106   :  { %s4768_s0 = smov (!%p2464_p9, %s1258_s0), 2  ;;  %p1267_p12 = scmp.gt.s32.totalorder %s4210_s25, 0 }
 0x107   :  { %v465_v46 = vpop.permute.xlu0 %464  ;;  %2234 = vst.sshfl [vmem:[#allocation2 + $0x20] sm:$0x33 pattern:$0x76325410] %v424_v38  ;;  %v661_v38 = vld [vmem:[#allocation9 + $0xa] sm:$0x3] }
 0x108   :  { %2246 = vst.sshfl [vmem:[#allocation2 + $0x60] sm:$0x33 pattern:$0x76325410] %v760_v39  ;;  %v444_v47 = vpop.permute.xlu1 %443  ;;  %p2476_p13 = scmp.lt.s32.totalorder %s4210_s25, 3  ;;  %s4770_s29 = smov (!%p1262_p10, %s4207_s29), 0 }
 0x109   :  { %v445_v50 = vsel %vm404_vm11, %v442_v31, %v444_v47  ;;  %v446_v51 = vsel %vm404_vm11, %v444_v47, %v442_v31  ;;  %v4098_v47 = vrot.slane %v661_v38, %v3580_v33  ;;  %s4772_s25 = smov (!%p1267_p12, %s4210_s25), 0  ;;  %s4774_s29 = smov (!%p2470_p11, %s4770_s29), 2 }
 0x10a   :  { %v447_v52 = vsel %vm3610_vm6, %v440_v49, %v445_v50  ;;  %v448_v53 = vsel %vm3614_vm7, %v439_v48, %v446_v51  ;;  %v771_v54 = vsel %vm3610_vm6, %v445_v50, %v440_v49  ;;  %v772_v55 = vsel %vm3614_vm7, %v446_v51, %v439_v48  ;;  %s4776_s25 = smov (!%p2476_p13, %s4772_s25), 3  ;;  %s1009_s18 = scalar_lea.vmem [#allocation6], %s2999_s27 }
 0x10b   :  { %v471_v56 = vpop.permute.xlu0 %470  ;;  %v449_v57 = vmul.f32 %v447_v52, %v3924_v43  ;;  %v450_v58 = vmul.f32 %v448_v53, %v3927_v0  ;;  %v773_v59 = vmul.f32 %v771_v54, %v3930_v19  ;;  %v774_v60 = vmul.f32 %v772_v55, %v3933_v20  ;;  %s1039_s9 = scalar_lea.vmem [#allocation6], %s3007_s6  ;;  %s1271_s11 = smul.u32 3, %s4768_s0 }
 0x10c   :  { %v467_v61 = vpop.permute.xlu1 %466  ;;  %s4251_s7 = sld [smem:[#allocation5 + $0xa]]  ;;  %s1069_s4 = scalar_lea.vmem [#allocation6], %s3015_s15 }
 0x10d   :  { %v453_v62 = vcombine.low %v449_v57, %v450_v58  ;;  %v777_v63 = vcombine.low %v773_v59, %v774_v60  ;;  %v468_v2 = vsel %vm397_vm10, %v465_v46, %v467_v61  ;;  %v469_v4 = vsel %vm397_vm10, %v467_v61, %v465_v46  ;;  %p1287_p0 = scmp.gt.s32.totalorder %s4229_s3, 0  ;;  %s4256_s5 = sld [smem:[#allocation4 + $0x16]] }
 0x10e   :  { %s1099_s27 = scalar_lea.vmem [#allocation6], %s4681_s22  ;;  %s4682_s16 = sshll.u32 %s4738_s2, 2 }
 0x10f   :  { %v494_v40 = vpop.permute.xlu0 %493  ;;  %2235 = vst.sshfl [vmem:[#allocation2 + $0x24] sm:$0x33 pattern:$0x76325410] %v453_v62  ;;  %s1130_s6 = scalar_lea.vmem [#allocation6], %s4682_s16  ;;  %s1272_s0 = sadd.s32 %s4774_s29, %s1271_s11 }
 0x110   :  { %2247 = vst.sshfl [vmem:[#allocation2 + $0x64] sm:$0x33 pattern:$0x76325410] %v777_v63  ;;  %v473_v1 = vpop.permute.xlu1 %472  ;;  %s4683_s8 = sshll.u32 %s4748_s21, 2  ;;  %s4684_s15 = sshll.u32 %s4754_s24, 2 }
 0x111   :  { %v474_v5 = vsel %vm404_vm11, %v471_v56, %v473_v1  ;;  %v475_v6 = vsel %vm404_vm11, %v473_v1, %v471_v56  ;;  %s2481_s30 = sshll.u32 %s1272_s0, 2  ;;  %p1292_p1 = scmp.gt.s32.totalorder %s4231_s10, 0 }
 0x112   :  { %v476_v7 = vsel %vm3610_vm6, %v469_v4, %v474_v5  ;;  %v477_v8 = vsel %vm3614_vm7, %v468_v2, %v475_v6  ;;  %v788_v9 = vsel %vm3610_vm6, %v474_v5, %v469_v4  ;;  %v789_v10 = vsel %vm3614_vm7, %v475_v6, %v468_v2  ;;  %s4685_s19 = sshll.u32 %s3659_s26, 2  ;;  %s4686_s2 = sshll.u32 %s3720_s1, 2 }
 0x113   :  { %v500_v11 = vpop.permute.xlu0 %499  ;;  %v478_v12 = vmul.f32 %v476_v7, %v3924_v43  ;;  %v479_v13 = vmul.f32 %v477_v8, %v3927_v0  ;;  %v790_v14 = vmul.f32 %v788_v9, %v3930_v19  ;;  %v791_v15 = vmul.f32 %v789_v10, %v3933_v20  ;;  %s1005_s22 = scalar_lea.vmem [#allocation2], %s4685_s19  ;;  %s4687_s29 = sshll.u32 %s3783_s14, 2 }
 0x114   :  { %v496_v16 = vpop.permute.xlu1 %495  ;;  %s1065_s11 = scalar_lea.vmem [#allocation2], %s4687_s29  ;;  %s4688_s21 = sshll.u32 %s4760_s13, 2 }
 0x115   :  { %v482_v17 = vcombine.low %v478_v12, %v479_v13  ;;  %v794_v18 = vcombine.low %v790_v14, %v791_v15  ;;  %v497_v21 = vsel %vm397_vm10, %v494_v40, %v496_v16  ;;  %v498_v22 = vsel %vm397_vm10, %v496_v16, %v494_v40  ;;  %s1220_s16 = scalar_lea.vmem [#allocation6], %s4688_s21  ;;  %s4277_s24 = sadd.s32 %s4776_s25, %s2481_s30 }
 0x116   :  { %s4689_s26 = sshll.u32 %s3846_s17, 2  ;;  %s4690_s1 = sshll.u32 %s3912_s12, 2 }
 0x117   :  { %v525_v41 = vpop.permute.xlu0 %524  ;;  %2236 = vst.sshfl [vmem:[#allocation2 + $0x28] sm:$0x33 pattern:$0x76325410] %v482_v17  ;;  %s1126_s0 = scalar_lea.vmem [#allocation2], %s4690_s1  ;;  %s4691_s14 = sshll.u32 %s4002_s20, 2 }
 0x118   :  { %2248 = vst.sshfl [vmem:[#allocation2 + $0x68] sm:$0x33 pattern:$0x76325410] %v794_v18  ;;  %v502_v42 = vpop.permute.xlu1 %501  ;;  %s4692_s13 = sshll.u32 %s4055_s23, 2  ;;  %s3070_s17 = sshll.u32 %s4277_s24, 2 }
 0x119   :  { %v503_v23 = vsel %vm404_vm11, %v500_v11, %v502_v42  ;;  %v504_v24 = vsel %vm404_vm11, %v502_v42, %v500_v11  ;;  %s1186_s30 = scalar_lea.vmem [#allocation2], %s4692_s13  ;;  %p2487_p2 = scmp.lt.s32.totalorder %s4229_s3, 2 }
 0x11a   :  { %v505_v25 = vsel %vm3610_vm6, %v498_v22, %v503_v23  ;;  %v506_v26 = vsel %vm3614_vm7, %v497_v21, %v504_v24  ;;  %v805_v28 = vsel %vm3610_vm6, %v503_v23, %v498_v22  ;;  %v806_v29 = vsel %vm3614_vm7, %v504_v24, %v497_v21  ;;  %s4693_s12 = sshll.u32 %s4147_s28, 2  ;;  %p2493_p3 = scmp.lt.s32.totalorder %s4231_s10, 2 }
 0x11b   :  { %v531_v30 = vpop.permute.xlu0 %530  ;;  %v507_v31 = vmul.f32 %v505_v25, %v3924_v43  ;;  %v508_v32 = vmul.f32 %v506_v26, %v3927_v0  ;;  %v807_v34 = vmul.f32 %v805_v28, %v3930_v19  ;;  %v808_v35 = vmul.f32 %v806_v29, %v3933_v20  ;;  %s1216_s20 = scalar_lea.vmem [#allocation2], %s4693_s12  ;;  %p1297_p4 = scmp.gt.s32.totalorder %s4251_s7, 0 }
 0x11c   :  { %v527_v37 = vpop.permute.xlu1 %526  ;;  %v4089_v0 = vrot.slane %v523_v36, %v3563_v27  ;;  %v4092_v19 = vrot.slane %v523_v36, %v3580_v33  ;;  %v4095_v20 = vrot.slane %v661_v38, %v3563_v27  ;;  %s1288_s23 = scalar_select %p1287_p0, %s4229_s3, 0 }
 0x11d   :  { %v511_v39 = vcombine.low %v507_v31, %v508_v32  ;;  %v811_v46 = vcombine.low %v807_v34, %v808_v35  ;;  %v528_v49 = vsel %vm63_vm1, %v525_v41, %v527_v37  ;;  %v529_v50 = vsel %vm63_vm1, %v527_v37, %v525_v41  ;;  %s1293_s28 = scalar_select %p1292_p1, %s4231_s10, 0 }
 0x11e   :  { %s4778_s23 = smov (!%p2487_p2, %s1288_s23), 2  ;;  %p2499_p5 = scmp.lt.s32.totalorder %s4251_s7, 3 }
 0x11f   :  { %v566_v43 = vpop.permute.xlu0 %565  ;;  %2237 = vst.sshfl [vmem:[#allocation2 + $0x2c] sm:$0x33 pattern:$0x76325410] %v511_v39  ;;  %s4780_s28 = smov (!%p2493_p3, %s1293_s28), 2  ;;  %s4782_s7 = smov (!%p1297_p4, %s4251_s7), 0 }
 0x120   :  { %2249 = vst.sshfl [vmem:[#allocation2 + $0x6c] sm:$0x33 pattern:$0x76325410] %v811_v46  ;;  %v533_v48 = vpop.permute.xlu1 %532  ;;  %p1317_p6 = scmp.gt.s32.totalorder %s4256_s5, 0  ;;  %s4784_s7 = smov (!%p2499_p5, %s4782_s7), 3 }
 0x121   :  { %v535_v27 = vsel %vm534_vm12, %v531_v30, %v533_v48  ;;  %v536_v33 = vsel %vm534_vm12, %v533_v48, %v531_v30  ;;  %p2510_p7 = scmp.lt.s32.totalorder %s4256_s5, 2  ;;  %s4340_s13 = sld [smem:[#allocation5 + $0xc]] }
 0x122   :  { %v537_v51 = vsel %vm3610_vm6, %v529_v50, %v535_v27  ;;  %v538_v52 = vsel %vm3614_vm7, %v528_v49, %v536_v33  ;;  %v662_v53 = vsel %vm3610_vm6, %v535_v27, %v529_v50  ;;  %v663_v54 = vsel %vm3614_vm7, %v536_v33, %v528_v49  ;;  %s1318_s29 = scalar_select %p1317_p6, %s4256_s5, 0 }
 0x123   :  { %v572_v55 = vpop.permute.xlu0 %571  ;;  %v550_v56 = vmul.f32 %v4089_v0, %v537_v51  ;;  %v551_v57 = vmul.f32 %v4092_v19, %v538_v52  ;;  %v675_v58 = vmul.f32 %v4095_v20, %v662_v53  ;;  %v676_v59 = vmul.f32 %v4098_v47, %v663_v54  ;;  %v1131_v54 = vld [vmem:[%s1130_s6] sm:$0xf]  ;;  %s1095_s6 = scalar_lea.vmem [#allocation2], %s4689_s26  ;;  %s4328_s26 = sld [smem:[#allocation4 + $0x18]] }
 0x124   :  { %v568_v60 = vpop.permute.xlu1 %567  ;;  %s4786_s29 = smov (!%p2510_p7, %s1318_s29), 2  ;;  %s4342_s12 = sld [smem:[#allocation4 + $0x1a]] }
 0x125   :  { %v554_v61 = vcombine.low %v550_v56, %v551_v57  ;;  %v679_v62 = vcombine.low %v675_v58, %v676_v59  ;;  %v569_v1 = vsel %vm63_vm1, %v566_v43, %v568_v60  ;;  %v570_v2 = vsel %vm63_vm1, %v568_v60, %v566_v43  ;;  %v1221_v60 = vld [vmem:[%s1220_s16] sm:$0xf]  ;;  %s4326_s16 = sld [smem:[#allocation5 + $0xb]]  ;;  %s4348_s5 = sld [smem:[#allocation5 + $0xd]] }
 0x127   :  { %v595_v63 = vpop.permute.xlu0 %594  ;;  %2238 = vst.sshfl [vmem:[#allocation2 + $0x30] sm:$0x33 pattern:$0x76325410] %v554_v61  ;;  %p1358_p2 = scmp.gt.s32.totalorder %s4340_s13, 0  ;;  %p2545_p3 = scmp.lt.s32.totalorder %s4340_s13, 3 }
 0x128   :  { %2242 = vst.sshfl [vmem:[#allocation2 + $0x50] sm:$0x33 pattern:$0x76325410] %v679_v62  ;;  %v574_v40 = vpop.permute.xlu1 %573 }
 0x129   :  { %v575_v4 = vsel %vm534_vm12, %v572_v55, %v574_v40  ;;  %v576_v5 = vsel %vm534_vm12, %v574_v40, %v572_v55  ;;  %v3382_v40 = vmov 0.0   ;;  %p1348_p12 = scmp.gt.s32.totalorder %s4328_s26, 0  ;;  %p2533_p13 = scmp.lt.s32.totalorder %s4328_s26, 2 }
 0x12a   :  { %v577_v6 = vsel %vm3610_vm6, %v570_v2, %v575_v4  ;;  %v578_v7 = vsel %vm3614_vm7, %v569_v1, %v576_v5  ;;  %v690_v8 = vsel %vm3610_vm6, %v575_v4, %v570_v2  ;;  %v691_v9 = vsel %vm3614_vm7, %v576_v5, %v569_v1  ;;  %s4800_s13 = smov (!%p1358_p2, %s4340_s13), 0  ;;  %p1378_p4 = scmp.gt.s32.totalorder %s4342_s12, 0 }
 0x12b   :  { %v601_v10 = vpop.permute.xlu0 %600  ;;  %v579_v11 = vmul.f32 %v577_v6, %v4089_v0  ;;  %v580_v12 = vmul.f32 %v578_v7, %v4092_v19  ;;  %v692_v13 = vmul.f32 %v690_v8, %v4095_v20  ;;  %v693_v14 = vmul.f32 %v691_v9, %v4098_v47  ;;  %p1327_p10 = scmp.gt.s32.totalorder %s4326_s16, 0  ;;  %p2522_p11 = scmp.lt.s32.totalorder %s4326_s16, 3 }
 0x12c   :  { %v597_v15 = vpop.permute.xlu1 %596  ;;  %s4802_s13 = smov (!%p2545_p3, %s4800_s13), 3  ;;  %p2556_p5 = scmp.lt.s32.totalorder %s4342_s12, 2 }
 0x12d   :  { %v583_v16 = vcombine.low %v579_v11, %v580_v12  ;;  %v696_v17 = vcombine.low %v692_v13, %v693_v14  ;;  %v598_v42 = vsel %vm63_vm1, %v595_v63, %v597_v15  ;;  %v599_v21 = vsel %vm63_vm1, %v597_v15, %v595_v63  ;;  %s4792_s16 = smov (!%p1327_p10, %s4326_s16), 0  ;;  %s4804_s12 = smov (!%p1378_p4, %s4342_s12), 0 }
 0x12e   :  { %s4794_s16 = smov (!%p2522_p11, %s4792_s16), 3  ;;  %s4806_s12 = smov (!%p2556_p5, %s4804_s12), 2 }
 0x12f   :  { %2239 = vst.sshfl [vmem:[#allocation2 + $0x34] sm:$0x33 pattern:$0x76325410] %v583_v16  ;;  %v624_v41 = vpop.permute.xlu0 %623 }
 0x130   :  { %2243 = vst.sshfl [vmem:[#allocation2 + $0x54] sm:$0x33 pattern:$0x76325410] %v696_v17  ;;  %v603_v18 = vpop.permute.xlu1 %602 }
 0x131   :  { %v604_v22 = vsel %vm534_vm12, %v601_v10, %v603_v18  ;;  %v605_v23 = vsel %vm534_vm12, %v603_v18, %v601_v10 }
 0x132   :  { %v606_v24 = vsel %vm3610_vm6, %v599_v21, %v604_v22  ;;  %v607_v25 = vsel %vm3614_vm7, %v598_v42, %v605_v23  ;;  %v707_v26 = vsel %vm3610_vm6, %v604_v22, %v599_v21  ;;  %v708_v28 = vsel %vm3614_vm7, %v605_v23, %v598_v42 }
 0x133   :  { %v608_v29 = vmul.f32 %v606_v24, %v4089_v0  ;;  %v609_v30 = vmul.f32 %v607_v25, %v4092_v19  ;;  %v709_v31 = vmul.f32 %v707_v26, %v4095_v20  ;;  %v710_v32 = vmul.f32 %v708_v28, %v4098_v47  ;;  %v630_v37 = vpop.permute.xlu0 %629 }
 0x134   :  { %v626_v34 = vpop.permute.xlu1 %625 }
 0x135   :  { %v612_v35 = vcombine.low %v608_v29, %v609_v30  ;;  %v713_v36 = vcombine.low %v709_v31, %v710_v32  ;;  %v627_v39 = vsel %vm63_vm1, %v624_v41, %v626_v34  ;;  %v628_v46 = vsel %vm63_vm1, %v626_v34, %v624_v41 }
 0x137   :  { %2240 = vst.sshfl [vmem:[#allocation2 + $0x38] sm:$0x33 pattern:$0x76325410] %v612_v35 }
 0x138   :  { %2244 = vst.sshfl [vmem:[#allocation2 + $0x58] sm:$0x33 pattern:$0x76325410] %v713_v36  ;;  %v632_v38 = vpop.permute.xlu1 %631 }
 0x139   :  { %v633_v43 = vsel %vm534_vm12, %v630_v37, %v632_v38  ;;  %v634_v48 = vsel %vm534_vm12, %v632_v38, %v630_v37 }
 0x13a   :  { %v635_v49 = vsel %vm3610_vm6, %v628_v46, %v633_v43  ;;  %v636_v50 = vsel %vm3614_vm7, %v627_v39, %v634_v48  ;;  %v724_v27 = vsel %vm3610_vm6, %v633_v43, %v628_v46  ;;  %v725_v33 = vsel %vm3614_vm7, %v634_v48, %v627_v39 }
 0x13b   :  { %v637_v3 = vmul.f32 %v635_v49, %v4089_v0  ;;  %v638_v51 = vmul.f32 %v636_v50, %v4092_v19  ;;  %v726_v52 = vmul.f32 %v724_v27, %v4095_v20  ;;  %v727_v53 = vmul.f32 %v725_v33, %v4098_v47  ;;  %v1010_v0 = vld [vmem:[%s1009_s18] sm:$0xf]  ;;  %s3071_s18 = sshll.u32 %s4776_s25, 2  ;;  %s4346_s25 = sld [smem:[#allocation4 + $0x1b]] }
 0x13c   :  { %v1040_v19 = vld [vmem:[%s1039_s9] sm:$0xf]  ;;  %s1160_s9 = scalar_lea.vmem [#allocation6], %s4683_s8  ;;  %s1156_s8 = scalar_lea.vmem [#allocation2], %s4691_s14 }
 0x13d   :  { %v641_v44 = vcombine.low %v637_v3, %v638_v51  ;;  %v730_v45 = vcombine.low %v726_v52, %v727_v53  ;;  %v1070_v20 = vld [vmem:[%s1069_s4] sm:$0xf]  ;;  %s1190_s4 = scalar_lea.vmem [#allocation6], %s4684_s15  ;;  %s4694_s15 = sld [smem:[#allocation16_spill]] }
 0x13e   :  { %v1100_v47 = vld [vmem:[%s1099_s27] sm:$0xf]  ;;  %s1035_s27 = scalar_lea.vmem [#allocation2], %s4686_s2  ;;  %s1277_s14 = scalar_lea.vmem [#allocation2], %s3070_s17 }
 0x13f   :  { %2241 = vst.sshfl [vmem:[#allocation2 + $0x3c] sm:$0x33 pattern:$0x76325410] %v641_v44  ;;  %v1161_v55 = vld [vmem:[%s1160_s9] sm:$0xf] }
 0x140   :  { %2245 = vst.sshfl [vmem:[#allocation2 + $0x5c] sm:$0x33 pattern:$0x76325410] %v730_v45  ;;  %v1191_v56 = vld [vmem:[%s1190_s4] sm:$0xf] }
 0x141   :  { %s1301_s9 = smul.u32 3, %s4778_s23  ;;  %s4695_s4 = sld [smem:[#allocation17_spill]] }
 0x142   :  { %p1383_p6 = scmp.gt.s32.totalorder %s4346_s25, 0  ;;  %p2562_p7 = scmp.lt.s32.totalorder %s4346_s25, 2 }
 0x143   :  { %s1302_s19 = sadd.s32 %s4780_s28, %s1301_s9  ;;  %s3087_s28 = sshll.u32 %s4794_s16, 2 }
 0x144   :  { %s2504_s3 = sshll.u32 %s1302_s19, 2  ;;  %s1341_s9 = scalar_lea.vmem [#allocation6], %s3087_s28 }
 0x145   :  { %s4317_s10 = sadd.s32 %s4784_s7, %s2504_s3  ;;  %v1342_v30 = vld [vmem:[%s1341_s9] sm:$0xf] }
 0x146   :  { %s3078_s2 = sshll.u32 %s4317_s10, 2 }
 0x147   :  { %v1006_v57 = vld [vmem:[%s1005_s22] sm:$0xf]  ;;  %s3079_s22 = sshll.u32 %s4784_s7, 2 }
 0x148   :  { %v1036_v58 = vld [vmem:[%s1035_s27] sm:$0xf]  ;;  %vm1011_vm13 = vcmp.ge.f32.partialorder %v1006_v57, %v1010_v0  ;;  %s4321_s27 = sld [smem:[#allocation4 + $0x17]]  ;;  %s1311_s24 = scalar_lea.vmem [#allocation6], %s3079_s22 }
 0x149   :  { %v1066_v59 = vld [vmem:[%s1065_s11] sm:$0xf]  ;;  %vm1041_vm14 = vcmp.ge.f32.partialorder %v1036_v58, %v1040_v19  ;;  %v1012_v1 = vsel %vm1011_vm13, 1.0, %v3382_v40  ;;  %s4696_s11 = sshll.u32 %s4694_s15, 2 }
 0x14a   :  { %vm1071_vm15 = vcmp.ge.f32.partialorder %v1066_v59, %v1070_v20  ;;  %v1096_v61 = vld [vmem:[%s1095_s6] sm:$0xf]  ;;  %v1042_v2 = vsel %vm1041_vm14, 2.0, %v3382_v40  ;;  %s1251_s21 = scalar_lea.vmem [#allocation6], %s4696_s11  ;;  %s4697_s6 = sshll.u32 %s4695_s4, 2 }
 0x14b   :  { %v1127_v62 = vld [vmem:[%s1126_s0] sm:$0xf]  ;;  %v1043_v5 = vadd.f32 %v1042_v2, %v1012_v1  ;;  %vm1101_vm0 = vcmp.ge.f32.partialorder %v1096_v61, %v1100_v47  ;;  %v1072_v7 = vsel %vm1071_vm15, 4.0, %v3382_v40  ;;  %s1247_s1 = scalar_lea.vmem [#allocation2], %s4697_s6  ;;  %s1281_s0 = scalar_lea.vmem [#allocation6], %s3071_s18 }
 0x14c   :  { %v1157_v63 = vld [vmem:[%s1156_s8] sm:$0xf]  ;;  %vm1132_vm1 = vcmp.ge.f32.partialorder %v1127_v62, %v1131_v54  ;;  %v1102_v12 = vsel %vm1101_vm0, 8.0, %v3382_v40  ;;  %s4338_s8 = sld [smem:[#allocation4 + $0x19]]  ;;  %s1307_s18 = scalar_lea.vmem [#allocation2], %s3078_s2 }
 0x14d   :  { %v1187_v4 = vld [vmem:[%s1186_s30] sm:$0xf]  ;;  %vm1162_vm2 = vcmp.ge.f32.partialorder %v1157_v63, %v1161_v55  ;;  %v1133_v8 = vsel %vm1132_vm1, 1.0, %v3382_v40  ;;  %v1073_v10 = vadd.f32 %v1072_v7, %v1043_v5  ;;  %s1331_s30 = smul.u32 3, %s4786_s29 }
 0x14e   :  { %v1217_v6 = vld [vmem:[%s1216_s20] sm:$0xf]  ;;  %v1163_v9 = vsel %vm1162_vm2, 2.0, %v3382_v40  ;;  %vm1192_vm3 = vcmp.ge.f32.partialorder %v1187_v4, %v1191_v56  ;;  %p1322_p8 = scmp.gt.s32.totalorder %s4321_s27, 0  ;;  %p2516_p9 = scmp.lt.s32.totalorder %s4321_s27, 2 }
 0x14f   :  { %v1164_v11 = vadd.f32 %v1163_v9, %v1133_v8  ;;  %vm1222_vm4 = vcmp.ge.f32.partialorder %v1217_v6, %v1221_v60  ;;  %v1193_v13 = vsel %vm1192_vm3, 4.0, %v3382_v40  ;;  %v1103_v14 = vadd.f32 %v1102_v12, %v1073_v10  ;;  %v1252_v18 = vld [vmem:[%s1251_s21] sm:$0xf]  ;;  %s1349_s4 = scalar_select %p1348_p12, %s4328_s26, 0 }
 0x150   :  { %v1223_v16 = vsel %vm1222_vm4, 8.0, %v3382_v40  ;;  %v1248_v41 = vld [vmem:[%s1247_s1] sm:$0xf]  ;;  %s4788_s27 = smov (!%p1322_p8, %s4321_s27), 0  ;;  %p1388_p8 = scmp.gt.s32.totalorder %s4348_s5, 0 }
 0x151   :  { %v1194_v15 = vadd.f32 %v1193_v13, %v1164_v11  ;;  %1104 = vst [vmem:[#allocation11] sm:$0xf] %v1103_v14  ;;  %v1282_v42 = vld [vmem:[%s1281_s0] sm:$0xf]  ;;  %vm1253_vm5 = vcmp.ge.f32.partialorder %v1248_v41, %v1252_v18  ;;  %s4790_s27 = smov (!%p2516_p9, %s4788_s27), 2  ;;  %s4796_s4 = smov (!%p2533_p13, %s1349_s4), 2 }
 0x152   :  { %v1278_v21 = vld [vmem:[%s1277_s14] sm:$0xf]  ;;  %v1254_v22 = vsel %vm1253_vm5, 1.0, %v3382_v40  ;;  %s1332_s17 = sadd.s32 %s4790_s27, %s1331_s30  ;;  %p1353_p0 = scmp.gt.s32.totalorder %s4338_s8, 0 }
 0x153   :  { %v1224_v17 = vadd.f32 %v1223_v16, %v1194_v15  ;;  %vm1283_vm6 = vcmp.ge.f32.partialorder %v1278_v21, %v1282_v42  ;;  %v1308_v24 = vld [vmem:[%s1307_s18] sm:$0xf]  ;;  %s2527_s20 = sshll.u32 %s1332_s17, 2  ;;  %p2539_p1 = scmp.lt.s32.totalorder %s4338_s8, 2 }
 0x154   :  { %v1284_v23 = vsel %vm1283_vm6, 2.0, %v3382_v40  ;;  %v1312_v25 = vld [vmem:[%s1311_s24] sm:$0xf]  ;;  %s1334_s23 = sadd.s32 %s4794_s16, %s2527_s20  ;;  %s1362_s3 = smul.u32 3, %s4796_s4 }
 0x155   :  { %1225 = vst [vmem:[#allocation11 + $0x4] sm:$0xf] %v1224_v17  ;;  %v1285_v26 = vadd.f32 %v1284_v23, %v1254_v22  ;;  %vm1313_vm7 = vcmp.ge.f32.partialorder %v1308_v24, %v1312_v25  ;;  %s3086_s7 = sshll.u32 %s1334_s23, 2  ;;  %s3095_s27 = sshll.u32 %s4802_s13, 2 }
 0x156   :  { %v1314_v28 = vsel %vm1313_vm7, 4.0, %v3382_v40  ;;  %s1337_s15 = scalar_lea.vmem [#allocation2], %s3086_s7  ;;  %p2568_p9 = scmp.lt.s32.totalorder %s4348_s5, 3 }
 0x157   :  { %v1315_v29 = vadd.f32 %v1314_v28, %v1285_v26  ;;  %v1338_v31 = vld [vmem:[%s1337_s15] sm:$0xf]  ;;  %s1354_s19 = scalar_select %p1353_p0, %s4338_s8, 0 }
 0x158   :  { %vm1343_vm8 = vcmp.ge.f32.partialorder %v1338_v31, %v1342_v30  ;;  %s1384_s11 = scalar_select %p1383_p6, %s4346_s25, 0 }
 0x159   :  { %v1344_v32 = vsel %vm1343_vm8, 8.0, %v3382_v40  ;;  %s4798_s19 = smov (!%p2539_p1, %s1354_s19), 2  ;;  %s1392_s21 = smul.u32 3, %s4806_s12 }
 0x15a   :  { %v1345_v34 = vadd.f32 %v1344_v32, %v1315_v29  ;;  %s1363_s10 = sadd.s32 %s4798_s19, %s1362_s3  ;;  %s4808_s11 = smov (!%p2562_p7, %s1384_s11), 2 }
 0x15b   :  { %s2550_s22 = sshll.u32 %s1363_s10, 2  ;;  %s4810_s5 = smov (!%p1388_p8, %s4348_s5), 0 }
 0x15c   :  { %1346 = vst [vmem:[#allocation11 + $0x8] sm:$0xf] %v1345_v34  ;;  %s4378_s2 = sadd.s32 %s4802_s13, %s2550_s22  ;;  %s1393_s16 = sadd.s32 %s4808_s11, %s1392_s21 }
 0x15d   :  { %s3094_s29 = sshll.u32 %s4378_s2, 2  ;;  %s2578_s26 = sld [smem:[#allocation4 + $0x1c]] }
 0x15e   :  { %s4812_s5 = smov (!%p2568_p9, %s4810_s5), 3  ;;  %s2573_s6 = sshll.u32 %s1393_s16, 2 }
 0x15f   :  { %s2584_s1 = sld [smem:[#allocation4 + $0x1d]]  ;;  %s4392_s0 = sadd.s32 %s4812_s5, %s2573_s6 }
 0x160   :  { %s3103_s14 = sshll.u32 %s4812_s5, 2  ;;  %s3102_s8 = sshll.u32 %s4392_s0, 2 }
 0x161   :  { %s2590_s30 = sld [smem:[#allocation5 + $0xe]]  ;;  %s4396_s12 = sld [smem:[#allocation4 + $0x1f]] }
 0x162   :  { %s2601_s25 = sld [smem:[#allocation4 + $0x1e]]  ;;  %s1372_s7 = scalar_lea.vmem [#allocation6], %s3095_s27 }
 0x163   :  { %p1408_p10 = scmp.gt.s32.totalorder %s2578_s26, 0  ;;  %p2579_p11 = scmp.lt.s32.totalorder %s2578_s26, 2  ;;  %v1373_v35 = vld [vmem:[%s1372_s7] sm:$0xf] }
 0x164   :  { %s1368_s9 = scalar_lea.vmem [#allocation2], %s3094_s29  ;;  %s1402_s15 = scalar_lea.vmem [#allocation6], %s3103_s14 }
 0x165   :  { %s4814_s26 = smov (!%p1408_p10, %s2578_s26), 0  ;;  %p1413_p12 = scmp.gt.s32.totalorder %s2584_s1, 0  ;;  %v1369_v36 = vld [vmem:[%s1368_s9] sm:$0xf] }
 0x166   :  { %p2585_p13 = scmp.lt.s32.totalorder %s2584_s1, 2  ;;  %s4816_s26 = smov (!%p2579_p11, %s4814_s26), 2  ;;  %v1403_v37 = vld [vmem:[%s1402_s15] sm:$0xf]  ;;  %vm1374_vm9 = vcmp.ge.f32.partialorder %v1369_v36, %v1373_v35 }
 0x167   :  { %s4818_s1 = smov (!%p1413_p12, %s2584_s1), 0  ;;  %p1418_p0 = scmp.gt.s32.totalorder %s2590_s30, 0  ;;  %v1375_v39 = vsel %vm1374_vm9, 1.0, %v3382_v40 }
 0x168   :  { %p2591_p1 = scmp.lt.s32.totalorder %s2590_s30, 3  ;;  %s4820_s1 = smov (!%p2585_p13, %s4818_s1), 2 }
 0x169   :  { %s4822_s30 = smov (!%p1418_p0, %s2590_s30), 0  ;;  %s1422_s18 = smul.u32 3, %s4816_s26 }
 0x16a   :  { %p1438_p2 = scmp.gt.s32.totalorder %s2601_s25, 0  ;;  %s4824_s30 = smov (!%p2591_p1, %s4822_s30), 3 }
 0x16b   :  { %s1423_s24 = sadd.s32 %s4820_s1, %s1422_s18  ;;  %p2602_p3 = scmp.lt.s32.totalorder %s2601_s25, 2 }
 0x16c   :  { %s2596_s17 = sshll.u32 %s1423_s24, 2  ;;  %s3111_s20 = sshll.u32 %s4824_s30, 2 }
 0x16d   :  { %s4402_s23 = sadd.s32 %s4824_s30, %s2596_s17  ;;  %p1443_p4 = scmp.gt.s32.totalorder %s4396_s12, 0 }
 0x16e   :  { %s3110_s28 = sshll.u32 %s4402_s23, 2  ;;  %p2608_p5 = scmp.lt.s32.totalorder %s4396_s12, 2 }
 0x16f   :  { %s4826_s25 = smov (!%p1438_p2, %s2601_s25), 0  ;;  %s4828_s12 = smov (!%p1443_p4, %s4396_s12), 0 }
 0x170   :  { %s4830_s25 = smov (!%p2602_p3, %s4826_s25), 2  ;;  %s4832_s12 = smov (!%p2608_p5, %s4828_s12), 2 }
 0x171   :  { %s1398_s4 = scalar_lea.vmem [#allocation2], %s3102_s8  ;;  %s2613_s19 = sld [smem:[#allocation5 + $0xf]] }
 0x172   :  { %v1399_v38 = vld [vmem:[%s1398_s4] sm:$0xf]  ;;  %s1452_s3 = smul.u32 3, %s4830_s25  ;;  %s2624_s10 = sld [smem:[#allocation4 + $0x20]] }
 0x173   :  { %s4416_s22 = sld [smem:[#allocation4 + $0x21]]  ;;  %s4418_s27 = sld [smem:[#allocation5 + $0x10]]  ;;  %vm1404_vm10 = vcmp.ge.f32.partialorder %v1399_v38, %v1403_v37 }
 0x174   :  { %s1453_s13 = sadd.s32 %s4832_s12, %s1452_s3  ;;  %s4420_s5 = sld [smem:[#allocation4 + $0x22]]  ;;  %v1405_v46 = vsel %vm1404_vm10, 2.0, %v3382_v40 }
 0x175   :  { %s2619_s2 = sshll.u32 %s1453_s13, 2  ;;  %s4422_s29 = sld [smem:[#allocation4 + $0x23]]  ;;  %v1406_v49 = vadd.f32 %v1405_v46, %v1375_v39 }
 0x176   :  { %s4424_s11 = sld [smem:[#allocation5 + $0x11]]  ;;  %s4426_s21 = sld [smem:[#allocation4 + $0x24]] }
 0x177   :  { %s4428_s16 = sld [smem:[#allocation4 + $0x25]]  ;;  %p1448_p6 = scmp.gt.s32.totalorder %s2613_s19, 0 }
 0x178   :  { %p2614_p7 = scmp.lt.s32.totalorder %s2613_s19, 3  ;;  %s1428_s26 = scalar_lea.vmem [#allocation2], %s3110_s28 }
 0x179   :  { %v1429_v43 = vld [vmem:[%s1428_s26] sm:$0xf]  ;;  %s1432_s6 = scalar_lea.vmem [#allocation6], %s3111_s20  ;;  %p1469_p8 = scmp.gt.s32.totalorder %s2624_s10, 0 }
 0x17a   :  { %v1433_v48 = vld [vmem:[%s1432_s6] sm:$0xf]  ;;  %p2625_p9 = scmp.lt.s32.totalorder %s2624_s10, 2  ;;  %s4834_s19 = smov (!%p1448_p6, %s2613_s19), 0 }
 0x17b   :  { %s4836_s10 = smov (!%p1469_p8, %s2624_s10), 0  ;;  %vm1434_vm11 = vcmp.ge.f32.partialorder %v1429_v43, %v1433_v48  ;;  %s4838_s19 = smov (!%p2614_p7, %s4834_s19), 3 }
 0x17c   :  { %s4840_s10 = smov (!%p2625_p9, %s4836_s10), 2  ;;  %s1455_s1 = sadd.s32 %s4838_s19, %s2619_s2  ;;  %v1435_v50 = vsel %vm1434_vm11, 4.0, %v3382_v40 }
 0x17d   :  { %s3119_s0 = sshll.u32 %s4838_s19, 2  ;;  %s3118_s14 = sshll.u32 %s1455_s1, 2  ;;  %v1436_v27 = vadd.f32 %v1435_v50, %v1406_v49 }
 0x17e   :  { %s1462_s8 = scalar_lea.vmem [#allocation6], %s3119_s0  ;;  %p1474_p10 = scmp.gt.s32.totalorder %s4416_s22, 0 }
 0x17f   :  { %v1463_v33 = vld [vmem:[%s1462_s8] sm:$0xf]  ;;  %s1458_s30 = scalar_lea.vmem [#allocation2], %s3118_s14  ;;  %p2631_p11 = scmp.lt.s32.totalorder %s4416_s22, 2 }
 0x180   :  { %v1459_v3 = vld [vmem:[%s1458_s30] sm:$0xf]  ;;  %p1479_p12 = scmp.gt.s32.totalorder %s4418_s27, 0  ;;  %s4842_s22 = smov (!%p1474_p10, %s4416_s22), 0 }
 0x181   :  { %vm1464_vm12 = vcmp.ge.f32.partialorder %v1459_v3, %v1463_v33  ;;  %s4844_s22 = smov (!%p2631_p11, %s4842_s22), 2  ;;  %p2637_p13 = scmp.lt.s32.totalorder %s4418_s27, 3 }
 0x182   :  { %v1465_v51 = vsel %vm1464_vm12, 8.0, %v3382_v40  ;;  %s1480_s25 = scalar_select %p1479_p12, %s4418_s27, 0 }
 0x183   :  { %v1466_v52 = vadd.f32 %v1465_v51, %v1436_v27  ;;  %s1483_s12 = smul.u32 3, %s4840_s10  ;;  %p1499_p0 = scmp.gt.s32.totalorder %s4420_s5, 0 }
 0x184   :  { %p2648_p1 = scmp.lt.s32.totalorder %s4420_s5, 2  ;;  %s4846_s25 = smov (!%p2637_p13, %s1480_s25), 3 }
 0x185   :  { %1467 = vst [vmem:[#allocation11 + $0xc] sm:$0xf] %v1466_v52  ;;  %s1484_s18 = sadd.s32 %s4844_s22, %s1483_s12  ;;  %p1504_p2 = scmp.gt.s32.totalorder %s4422_s29, 0 }
 0x186   :  { %s2642_s24 = sshll.u32 %s1484_s18, 2  ;;  %s3127_s17 = sshll.u32 %s4846_s25, 2 }
 0x187   :  { %s4451_s20 = sadd.s32 %s4846_s25, %s2642_s24  ;;  %p2654_p3 = scmp.lt.s32.totalorder %s4422_s29, 2 }
 0x188   :  { %s3126_s23 = sshll.u32 %s4451_s20, 2  ;;  %p1509_p4 = scmp.gt.s32.totalorder %s4424_s11, 0 }
 0x189   :  { %s4848_s5 = smov (!%p1499_p0, %s4420_s5), 0  ;;  %s4850_s29 = smov (!%p1504_p2, %s4422_s29), 0 }
 0x18a   :  { %s4852_s5 = smov (!%p2648_p1, %s4848_s5), 2  ;;  %s4854_s29 = smov (!%p2654_p3, %s4850_s29), 2 }
 0x18b   :  { %s1510_s28 = scalar_select %p1509_p4, %s4424_s11, 0 }
 0x18c   :  { %p2660_p5 = scmp.lt.s32.totalorder %s4424_s11, 3  ;;  %s1513_s7 = smul.u32 3, %s4852_s5 }
 0x18d   :  { %p1529_p6 = scmp.gt.s32.totalorder %s4426_s21, 0  ;;  %p2671_p7 = scmp.lt.s32.totalorder %s4426_s21, 2 }
 0x18e   :  { %s4856_s28 = smov (!%p2660_p5, %s1510_s28), 3  ;;  %s1514_s9 = sadd.s32 %s4854_s29, %s1513_s7 }
 0x18f   :  { %p1534_p8 = scmp.gt.s32.totalorder %s4428_s16, 0  ;;  %s2665_s15 = sshll.u32 %s1514_s9, 2 }
 0x190   :  { %s3135_s4 = sshll.u32 %s4856_s28, 2  ;;  %s1516_s19 = sadd.s32 %s4856_s28, %s2665_s15 }
 0x191   :  { %s3134_s3 = sshll.u32 %s1516_s19, 2  ;;  %p2677_p9 = scmp.lt.s32.totalorder %s4428_s16, 2 }
 0x192   :  { %s2682_s10 = sld [smem:[#allocation5 + $0x12]]  ;;  %s4858_s21 = smov (!%p1529_p6, %s4426_s21), 0 }
 0x193   :  { %s4860_s16 = smov (!%p1534_p8, %s4428_s16), 0  ;;  %s4862_s21 = smov (!%p2671_p7, %s4858_s21), 2 }
 0x194   :  { %s4864_s16 = smov (!%p2677_p9, %s4860_s16), 2  ;;  %s1543_s22 = smul.u32 3, %s4862_s21 }
 0x195   :  { %s2693_s13 = sld [smem:[#allocation4 + $0x26]]  ;;  %s4470_s2 = sld [smem:[#allocation4 + $0x27]] }
 0x196   :  { %s1544_s27 = sadd.s32 %s4864_s16, %s1543_s22  ;;  %s4472_s29 = sld [smem:[#allocation5 + $0x13]] }
 0x197   :  { %s2688_s5 = sshll.u32 %s1544_s27, 2  ;;  %s1489_s21 = scalar_lea.vmem [#allocation2], %s3126_s23 }
 0x198   :  { %p1539_p10 = scmp.gt.s32.totalorder %s2682_s10, 0  ;;  %p2683_p11 = scmp.lt.s32.totalorder %s2682_s10, 3  ;;  %v1490_v53 = vld [vmem:[%s1489_s21] sm:$0xf] }
 0x199   :  { %s1493_s16 = scalar_lea.vmem [#allocation6], %s3127_s17  ;;  %s1519_s1 = scalar_lea.vmem [#allocation2], %s3134_s3 }
 0x19a   :  { %s4866_s10 = smov (!%p1539_p10, %s2682_s10), 0  ;;  %v1494_v44 = vld [vmem:[%s1493_s16] sm:$0xf]  ;;  %s1523_s0 = scalar_lea.vmem [#allocation6], %s3135_s4 }
 0x19b   :  { %s4868_s10 = smov (!%p2683_p11, %s4866_s10), 3  ;;  %p1559_p12 = scmp.gt.s32.totalorder %s2693_s13, 0  ;;  %v1520_v45 = vld [vmem:[%s1519_s1] sm:$0xf]  ;;  %vm1495_vm13 = vcmp.ge.f32.partialorder %v1490_v53, %v1494_v44 }
 0x19c   :  { %p2694_p13 = scmp.lt.s32.totalorder %s2693_s13, 2  ;;  %s1546_s11 = sadd.s32 %s4868_s10, %s2688_s5  ;;  %v1524_v0 = vld [vmem:[%s1523_s0] sm:$0xf]  ;;  %v1496_v19 = vsel %vm1495_vm13, 1.0, %v3382_v40 }
 0x19d   :  { %s3143_s26 = sshll.u32 %s4868_s10, 2  ;;  %s3142_s6 = sshll.u32 %s1546_s11, 2  ;;  %vm1525_vm14 = vcmp.ge.f32.partialorder %v1520_v45, %v1524_v0 }
 0x19e   :  { %p1564_p0 = scmp.gt.s32.totalorder %s4470_s2, 0  ;;  %p2700_p1 = scmp.lt.s32.totalorder %s4470_s2, 2  ;;  %v1526_v20 = vsel %vm1525_vm14, 2.0, %v3382_v40 }
 0x19f   :  { %s1560_s14 = scalar_select %p1559_p12, %s2693_s13, 0  ;;  %v1527_v55 = vadd.f32 %v1526_v20, %v1496_v19 }
 0x1a0   :  { %s1565_s8 = scalar_select %p1564_p0, %s4470_s2, 0 }
 0x1a1   :  { %s4870_s14 = smov (!%p2694_p13, %s1560_s14), 2  ;;  %p1569_p2 = scmp.gt.s32.totalorder %s4472_s29, 0 }
 0x1a2   :  { %p2706_p3 = scmp.lt.s32.totalorder %s4472_s29, 3  ;;  %s1573_s30 = smul.u32 3, %s4870_s14 }
 0x1a3   :  { %s1549_s25 = scalar_lea.vmem [#allocation2], %s3142_s6  ;;  %s1553_s12 = scalar_lea.vmem [#allocation6], %s3143_s26 }
 0x1a4   :  { %v1550_v47 = vld [vmem:[%s1549_s25] sm:$0xf]  ;;  %s4872_s8 = smov (!%p2700_p1, %s1565_s8), 2  ;;  %s4874_s29 = smov (!%p1569_p2, %s4472_s29), 0 }
 0x1a5   :  { %v1554_v54 = vld [vmem:[%s1553_s12] sm:$0xf]  ;;  %s1574_s18 = sadd.s32 %s4872_s8, %s1573_s30  ;;  %s2716_s24 = sld [smem:[#allocation4 + $0x28]] }
 0x1a6   :  { %vm1555_vm15 = vcmp.ge.f32.partialorder %v1550_v47, %v1554_v54  ;;  %s4876_s29 = smov (!%p2706_p3, %s4874_s29), 3  ;;  %s2711_s17 = sshll.u32 %s1574_s18, 2 }
 0x1a7   :  { %s2722_s20 = sld [smem:[#allocation4 + $0x29]]  ;;  %s1576_s23 = sadd.s32 %s4876_s29, %s2711_s17  ;;  %v1556_v56 = vsel %vm1555_vm15, 4.0, %v3382_v40 }
 0x1a8   :  { %s3151_s28 = sshll.u32 %s4876_s29, 2  ;;  %s3150_s7 = sshll.u32 %s1576_s23, 2  ;;  %v1557_v57 = vadd.f32 %v1556_v56, %v1527_v55 }
 0x1a9   :  { %s1583_s9 = scalar_lea.vmem [#allocation6], %s3151_s28  ;;  %s2728_s15 = sld [smem:[#allocation5 + $0x14]] }
 0x1aa   :  { %v1584_v58 = vld [vmem:[%s1583_s9] sm:$0xf]  ;;  %s1579_s4 = scalar_lea.vmem [#allocation2], %s3150_s7  ;;  %s2739_s19 = sld [smem:[#allocation4 + $0x2a]] }
 0x1ab   :  { %v1580_v59 = vld [vmem:[%s1579_s4] sm:$0xf]  ;;  %p1590_p4 = scmp.gt.s32.totalorder %s2716_s24, 0  ;;  %p2717_p5 = scmp.lt.s32.totalorder %s2716_s24, 2 }
 0x1ac   :  { %vm1585_vm0 = vcmp.ge.f32.partialorder %v1580_v59, %v1584_v58  ;;  %s2745_s3 = sld [smem:[#allocation4 + $0x2b]]  ;;  %s2751_s29 = sld [smem:[#allocation5 + $0x15]] }
 0x1ad   :  { %v1586_v60 = vsel %vm1585_vm0, 8.0, %v3382_v40  ;;  %s4878_s24 = smov (!%p1590_p4, %s2716_s24), 0  ;;  %p1595_p6 = scmp.gt.s32.totalorder %s2722_s20, 0 }
 0x1ae   :  { %v1587_v61 = vadd.f32 %v1586_v60, %v1557_v57  ;;  %p2723_p7 = scmp.lt.s32.totalorder %s2722_s20, 2  ;;  %s4880_s24 = smov (!%p2717_p5, %s4878_s24), 2 }
 0x1af   :  { %s4882_s20 = smov (!%p1595_p6, %s2722_s20), 0  ;;  %p1600_p8 = scmp.gt.s32.totalorder %s2728_s15, 0 }
 0x1b0   :  { %1588 = vst [vmem:[#allocation11 + $0x10] sm:$0xf] %v1587_v61  ;;  %p2729_p9 = scmp.lt.s32.totalorder %s2728_s15, 3  ;;  %s4884_s20 = smov (!%p2723_p7, %s4882_s20), 2 }
 0x1b1   :  { %s4886_s15 = smov (!%p1600_p8, %s2728_s15), 0  ;;  %s1604_s10 = smul.u32 3, %s4880_s24 }
 0x1b2   :  { %p1620_p10 = scmp.gt.s32.totalorder %s2739_s19, 0  ;;  %s4888_s15 = smov (!%p2729_p9, %s4886_s15), 3 }
 0x1b3   :  { %s1605_s22 = sadd.s32 %s4884_s20, %s1604_s10  ;;  %p2740_p11 = scmp.lt.s32.totalorder %s2739_s19, 2 }
 0x1b4   :  { %s2734_s13 = sshll.u32 %s1605_s22, 2  ;;  %s3159_s27 = sshll.u32 %s4888_s15, 2 }
 0x1b5   :  { %s4496_s2 = sadd.s32 %s4888_s15, %s2734_s13  ;;  %p1625_p12 = scmp.gt.s32.totalorder %s2745_s3, 0 }
 0x1b6   :  { %s3158_s5 = sshll.u32 %s4496_s2, 2  ;;  %p2746_p13 = scmp.lt.s32.totalorder %s2745_s3, 2 }
 0x1b7   :  { %s4890_s19 = smov (!%p1620_p10, %s2739_s19), 0  ;;  %s4892_s3 = smov (!%p1625_p12, %s2745_s3), 0 }
 0x1b8   :  { %s4894_s19 = smov (!%p2740_p11, %s4890_s19), 2  ;;  %s4896_s3 = smov (!%p2746_p13, %s4892_s3), 2 }
 0x1b9   :  { %s1634_s11 = smul.u32 3, %s4894_s19  ;;  %s2762_s26 = sld [smem:[#allocation4 + $0x2c]] }
 0x1ba   :  { %s2768_s21 = sld [smem:[#allocation4 + $0x2d]]  ;;  %s2774_s6 = sld [smem:[#allocation5 + $0x16]] }
 0x1bb   :  { %s1635_s16 = sadd.s32 %s4896_s3, %s1634_s11  ;;  %s4499_s0 = sld [smem:[#allocation4 + $0x2e]] }
 0x1bc   :  { %s2757_s1 = sshll.u32 %s1635_s16, 2  ;;  %s4501_s14 = sld [smem:[#allocation4 + $0x2f]] }
 0x1bd   :  { %s4503_s8 = sld [smem:[#allocation5 + $0x17]]  ;;  %s4505_s30 = sld [smem:[#allocation4 + $0x30]] }
 0x1be   :  { %s4507_s25 = sld [smem:[#allocation4 + $0x31]]  ;;  %p1630_p0 = scmp.gt.s32.totalorder %s2751_s29, 0 }
 0x1bf   :  { %p2752_p1 = scmp.lt.s32.totalorder %s2751_s29, 3  ;;  %p1650_p2 = scmp.gt.s32.totalorder %s2762_s26, 0 }
 0x1c0   :  { %p2763_p3 = scmp.lt.s32.totalorder %s2762_s26, 2  ;;  %s4898_s29 = smov (!%p1630_p0, %s2751_s29), 0 }
 0x1c1   :  { %s4900_s26 = smov (!%p1650_p2, %s2762_s26), 0  ;;  %s4902_s29 = smov (!%p2752_p1, %s4898_s29), 3 }
 0x1c2   :  { %s4904_s26 = smov (!%p2763_p3, %s4900_s26), 2  ;;  %s1637_s12 = sadd.s32 %s4902_s29, %s2757_s1 }
 0x1c3   :  { %s3167_s18 = sshll.u32 %s4902_s29, 2  ;;  %s3166_s24 = sshll.u32 %s1637_s12, 2 }
 0x1c4   :  { %p1655_p4 = scmp.gt.s32.totalorder %s2768_s21, 0  ;;  %p2769_p5 = scmp.lt.s32.totalorder %s2768_s21, 2 }
 0x1c5   :  { %p1660_p6 = scmp.gt.s32.totalorder %s2774_s6, 0  ;;  %p2775_p7 = scmp.lt.s32.totalorder %s2774_s6, 3 }
 0x1c6   :  { %s4906_s21 = smov (!%p1655_p4, %s2768_s21), 0  ;;  %s1664_s20 = smul.u32 3, %s4904_s26 }
 0x1c7   :  { %s1661_s17 = scalar_select %p1660_p6, %s2774_s6, 0 }
 0x1c8   :  { %s4908_s21 = smov (!%p2769_p5, %s4906_s21), 2  ;;  %p1680_p8 = scmp.gt.s32.totalorder %s4499_s0, 0 }
 0x1c9   :  { %p2786_p9 = scmp.lt.s32.totalorder %s4499_s0, 2  ;;  %s4910_s17 = smov (!%p2775_p7, %s1661_s17), 3 }
 0x1ca   :  { %s1665_s23 = sadd.s32 %s4908_s21, %s1664_s20  ;;  %p1685_p10 = scmp.gt.s32.totalorder %s4501_s14, 0 }
 0x1cb   :  { %s2780_s28 = sshll.u32 %s1665_s23, 2  ;;  %s3175_s7 = sshll.u32 %s4910_s17, 2 }
 0x1cc   :  { %s1610_s9 = scalar_lea.vmem [#allocation2], %s3158_s5  ;;  %s1614_s4 = scalar_lea.vmem [#allocation6], %s3159_s27 }
 0x1cd   :  { %v1611_v62 = vld [vmem:[%s1610_s9] sm:$0xf]  ;;  %s1667_s19 = sadd.s32 %s4910_s17, %s2780_s28  ;;  %s1640_s3 = scalar_lea.vmem [#allocation2], %s3166_s24 }
 0x1ce   :  { %v1615_v63 = vld [vmem:[%s1614_s4] sm:$0xf]  ;;  %s1644_s10 = scalar_lea.vmem [#allocation6], %s3167_s18  ;;  %s3174_s22 = sshll.u32 %s1667_s19, 2 }
 0x1cf   :  { %v1641_v1 = vld [vmem:[%s1640_s3] sm:$0xf]  ;;  %p2792_p11 = scmp.lt.s32.totalorder %s4501_s14, 2  ;;  %p1690_p12 = scmp.gt.s32.totalorder %s4503_s8, 0  ;;  %vm1616_vm1 = vcmp.ge.f32.partialorder %v1611_v62, %v1615_v63 }
 0x1d0   :  { %v1645_v2 = vld [vmem:[%s1644_s10] sm:$0xf]  ;;  %s1681_s13 = scalar_select %p1680_p8, %s4499_s0, 0  ;;  %v1617_v4 = vsel %vm1616_vm1, 1.0, %v3382_v40 }
 0x1d1   :  { %vm1646_vm2 = vcmp.ge.f32.partialorder %v1641_v1, %v1645_v2  ;;  %s4912_s14 = smov (!%p1685_p10, %s4501_s14), 0  ;;  %s1670_s27 = scalar_lea.vmem [#allocation2], %s3174_s22 }
 0x1d2   :  { %s4914_s13 = smov (!%p2786_p9, %s1681_s13), 2  ;;  %s4916_s14 = smov (!%p2792_p11, %s4912_s14), 2  ;;  %v1647_v5 = vsel %vm1646_vm2, 2.0, %v3382_v40  ;;  %v1671_v6 = vld [vmem:[%s1670_s27] sm:$0xf] }
 0x1d3   :  { %s1691_s15 = scalar_select %p1690_p12, %s4503_s8, 0  ;;  %v1648_v8 = vadd.f32 %v1647_v5, %v1617_v4 }
 0x1d4   :  { %s1674_s2 = scalar_lea.vmem [#allocation6], %s3175_s7  ;;  %p2798_p13 = scmp.lt.s32.totalorder %s4503_s8, 3 }
 0x1d5   :  { %v1675_v7 = vld [vmem:[%s1674_s2] sm:$0xf]  ;;  %s1694_s5 = smul.u32 3, %s4914_s13  ;;  %p1711_p0 = scmp.gt.s32.totalorder %s4505_s30, 0 }
 0x1d6   :  { %p2809_p1 = scmp.lt.s32.totalorder %s4505_s30, 2  ;;  %s4918_s15 = smov (!%p2798_p13, %s1691_s15), 3  ;;  %vm1676_vm3 = vcmp.ge.f32.partialorder %v1671_v6, %v1675_v7 }
 0x1d7   :  { %s1695_s29 = sadd.s32 %s4916_s14, %s1694_s5  ;;  %p1716_p2 = scmp.gt.s32.totalorder %s4507_s25, 0  ;;  %v1677_v9 = vsel %vm1676_vm3, 4.0, %v3382_v40 }
 0x1d8   :  { %s2803_s11 = sshll.u32 %s1695_s29, 2  ;;  %s3183_s26 = sshll.u32 %s4918_s15, 2  ;;  %v1678_v11 = vadd.f32 %v1677_v9, %v1648_v8 }
 0x1d9   :  { %s1697_s21 = sadd.s32 %s4918_s15, %s2803_s11  ;;  %s1704_s6 = scalar_lea.vmem [#allocation6], %s3183_s26 }
 0x1da   :  { %s3182_s16 = sshll.u32 %s1697_s21, 2  ;;  %v1705_v10 = vld [vmem:[%s1704_s6] sm:$0xf]  ;;  %p2815_p3 = scmp.lt.s32.totalorder %s4507_s25, 2 }
 0x1db   :  { %s2820_s1 = sld [smem:[#allocation5 + $0x18]]  ;;  %s1700_s0 = scalar_lea.vmem [#allocation2], %s3182_s16 }
 0x1dc   :  { %v1701_v12 = vld [vmem:[%s1700_s0] sm:$0xf]  ;;  %s1712_s8 = scalar_select %p1711_p0, %s4505_s30, 0 }
 0x1dd   :  { %vm1706_vm4 = vcmp.ge.f32.partialorder %v1701_v12, %v1705_v10  ;;  %s4920_s25 = smov (!%p1716_p2, %s4507_s25), 0  ;;  %s2831_s12 = sld [smem:[#allocation4 + $0x32]] }
 0x1de   :  { %v1707_v13 = vsel %vm1706_vm4, 8.0, %v3382_v40  ;;  %s4922_s8 = smov (!%p2809_p1, %s1712_s8), 2  ;;  %s4924_s25 = smov (!%p2815_p3, %s4920_s25), 2 }
 0x1df   :  { %v1708_v14 = vadd.f32 %v1707_v13, %v1678_v11  ;;  %s1725_s14 = smul.u32 3, %s4922_s8  ;;  %s2837_s24 = sld [smem:[#allocation4 + $0x33]] }
 0x1e0   :  { %s2843_s20 = sld [smem:[#allocation5 + $0x19]]  ;;  %s2854_s4 = sld [smem:[#allocation4 + $0x34]] }
 0x1e1   :  { %1709 = vst [vmem:[#allocation11 + $0x14] sm:$0xf] %v1708_v14  ;;  %p1721_p4 = scmp.gt.s32.totalorder %s2820_s1, 0  ;;  %p2821_p5 = scmp.lt.s32.totalorder %s2820_s1, 3 }
 0x1e2   :  { %s1726_s18 = sadd.s32 %s4924_s25, %s1725_s14  ;;  %s2860_s3 = sld [smem:[#allocation4 + $0x35]] }
 0x1e3   :  { %s4926_s1 = smov (!%p1721_p4, %s2820_s1), 0  ;;  %s2826_s17 = sshll.u32 %s1726_s18, 2 }
 0x1e4   :  { %s4928_s1 = smov (!%p2821_p5, %s4926_s1), 3  ;;  %p1741_p6 = scmp.gt.s32.totalorder %s2831_s12, 0 }
 0x1e5   :  { %p2832_p7 = scmp.lt.s32.totalorder %s2831_s12, 2  ;;  %s4547_s30 = sadd.s32 %s4928_s1, %s2826_s17 }
 0x1e6   :  { %s3191_s23 = sshll.u32 %s4928_s1, 2  ;;  %s3190_s28 = sshll.u32 %s4547_s30, 2 }
 0x1e7   :  { %p1746_p8 = scmp.gt.s32.totalorder %s2837_s24, 0  ;;  %s4930_s12 = smov (!%p1741_p6, %s2831_s12), 0 }
 0x1e8   :  { %s4932_s12 = smov (!%p2832_p7, %s4930_s12), 2  ;;  %p2838_p9 = scmp.lt.s32.totalorder %s2837_s24, 2 }
 0x1e9   :  { %s1747_s7 = scalar_select %p1746_p8, %s2837_s24, 0 }
 0x1ea   :  { %p1751_p10 = scmp.gt.s32.totalorder %s2843_s20, 0  ;;  %p2844_p11 = scmp.lt.s32.totalorder %s2843_s20, 3 }
 0x1eb   :  { %s1755_s25 = smul.u32 3, %s4932_s12  ;;  %s4934_s7 = smov (!%p2838_p9, %s1747_s7), 2 }
 0x1ec   :  { %s4936_s20 = smov (!%p1751_p10, %s2843_s20), 0  ;;  %s2866_s15 = sld [smem:[#allocation5 + $0x1a]] }
 0x1ed   :  { %s1756_s9 = sadd.s32 %s4934_s7, %s1755_s25  ;;  %s4938_s20 = smov (!%p2844_p11, %s4936_s20), 3 }
 0x1ee   :  { %s2849_s19 = sshll.u32 %s1756_s9, 2  ;;  %s3199_s22 = sshll.u32 %s4938_s20, 2 }
 0x1ef   :  { %s4554_s10 = sadd.s32 %s4938_s20, %s2849_s19  ;;  %p1771_p12 = scmp.gt.s32.totalorder %s2854_s4, 0 }
 0x1f0   :  { %s3198_s13 = sshll.u32 %s4554_s10, 2  ;;  %p2855_p13 = scmp.lt.s32.totalorder %s2854_s4, 2 }
 0x1f1   :  { %s2877_s27 = sld [smem:[#allocation4 + $0x36]]  ;;  %s4558_s2 = sld [smem:[#allocation4 + $0x37]] }
 0x1f2   :  { %s4940_s4 = smov (!%p1771_p12, %s2854_s4), 0  ;;  %p1776_p0 = scmp.gt.s32.totalorder %s2860_s3, 0 }
 0x1f3   :  { %p2861_p1 = scmp.lt.s32.totalorder %s2860_s3, 2  ;;  %s4942_s4 = smov (!%p2855_p13, %s4940_s4), 2 }
 0x1f4   :  { %s4944_s3 = smov (!%p1776_p0, %s2860_s3), 0  ;;  %p1781_p2 = scmp.gt.s32.totalorder %s2866_s15, 0 }
 0x1f5   :  { %p2867_p3 = scmp.lt.s32.totalorder %s2866_s15, 3  ;;  %s4946_s3 = smov (!%p2861_p1, %s4944_s3), 2 }
 0x1f6   :  { %s4948_s15 = smov (!%p1781_p2, %s2866_s15), 0  ;;  %s1785_s5 = smul.u32 3, %s4942_s4 }
 0x1f7   :  { %p1801_p4 = scmp.gt.s32.totalorder %s2877_s27, 0  ;;  %s4950_s15 = smov (!%p2867_p3, %s4948_s15), 3 }
 0x1f8   :  { %s1786_s29 = sadd.s32 %s4946_s3, %s1785_s5  ;;  %p2878_p5 = scmp.lt.s32.totalorder %s2877_s27, 2 }
 0x1f9   :  { %s2872_s11 = sshll.u32 %s1786_s29, 2  ;;  %s3207_s26 = sshll.u32 %s4950_s15, 2 }
 0x1fa   :  { %s4564_s21 = sadd.s32 %s4950_s15, %s2872_s11  ;;  %p1806_p6 = scmp.gt.s32.totalorder %s4558_s2, 0 }
 0x1fb   :  { %s3206_s16 = sshll.u32 %s4564_s21, 2  ;;  %p2884_p7 = scmp.lt.s32.totalorder %s4558_s2, 2 }
 0x1fc   :  { %s4952_s27 = smov (!%p1801_p4, %s2877_s27), 0  ;;  %s4954_s2 = smov (!%p1806_p6, %s4558_s2), 0 }
 0x1fd   :  { %s1735_s6 = scalar_lea.vmem [#allocation6], %s3191_s23  ;;  %s4956_s27 = smov (!%p2878_p5, %s4952_s27), 2 }
 0x1fe   :  { %v1736_v15 = vld [vmem:[%s1735_s6] sm:$0xf]  ;;  %s1731_s0 = scalar_lea.vmem [#allocation2], %s3190_s28  ;;  %s1765_s8 = scalar_lea.vmem [#allocation6], %s3199_s22 }
 0x1ff   :  { %v1732_v16 = vld [vmem:[%s1731_s0] sm:$0xf]  ;;  %s4958_s2 = smov (!%p2884_p7, %s4954_s2), 2  ;;  %s1761_s14 = scalar_lea.vmem [#allocation2], %s3198_s13 }
 0x200   :  { %v1766_v17 = vld [vmem:[%s1765_s8] sm:$0xf]  ;;  %s2889_s12 = sld [smem:[#allocation5 + $0x1b]]  ;;  %s1815_s18 = smul.u32 3, %s4956_s27  ;;  %vm1737_vm5 = vcmp.ge.f32.partialorder %v1732_v16, %v1736_v15 }
 0x201   :  { %v1762_v18 = vld [vmem:[%s1761_s14] sm:$0xf]  ;;  %s2900_s24 = sld [smem:[#allocation4 + $0x38]]  ;;  %s4578_s17 = sld [smem:[#allocation4 + $0x39]]  ;;  %v1738_v41 = vsel %vm1737_vm5, 1.0, %v3382_v40 }
 0x202   :  { %s1816_s1 = sadd.s32 %s4958_s2, %s1815_s18  ;;  %s4580_s23 = sld [smem:[#allocation5 + $0x1c]]  ;;  %vm1767_vm6 = vcmp.ge.f32.partialorder %v1762_v18, %v1766_v17 }
 0x203   :  { %s2895_s30 = sshll.u32 %s1816_s1, 2  ;;  %s4582_s20 = sld [smem:[#allocation4 + $0x3a]]  ;;  %v1768_v42 = vsel %vm1767_vm6, 2.0, %v3382_v40 }
 0x204   :  { %s4584_s28 = sld [smem:[#allocation4 + $0x3b]]  ;;  %s4586_s7 = sld [smem:[#allocation5 + $0x1d]]  ;;  %v1769_v23 = vadd.f32 %v1768_v42, %v1738_v41 }
 0x205   :  { %s4588_s25 = sld [smem:[#allocation4 + $0x3c]]  ;;  %s4590_s9 = sld [smem:[#allocation4 + $0x3d]] }
 0x206   :  { %p1811_p8 = scmp.gt.s32.totalorder %s2889_s12, 0  ;;  %p2890_p9 = scmp.lt.s32.totalorder %s2889_s12, 3 }
 0x207   :  { %s1791_s4 = scalar_lea.vmem [#allocation2], %s3206_s16  ;;  %s1795_s19 = scalar_lea.vmem [#allocation6], %s3207_s26 }
 0x208   :  { %v1792_v21 = vld [vmem:[%s1791_s4] sm:$0xf]  ;;  %p1832_p10 = scmp.gt.s32.totalorder %s2900_s24, 0  ;;  %p2901_p11 = scmp.lt.s32.totalorder %s2900_s24, 2 }
 0x209   :  { %v1796_v22 = vld [vmem:[%s1795_s19] sm:$0xf]  ;;  %s4960_s12 = smov (!%p1811_p8, %s2889_s12), 0  ;;  %p1837_p12 = scmp.gt.s32.totalorder %s4578_s17, 0 }
 0x20a   :  { %s4962_s24 = smov (!%p1832_p10, %s2900_s24), 0  ;;  %vm1797_vm7 = vcmp.ge.f32.partialorder %v1792_v21, %v1796_v22  ;;  %s4964_s12 = smov (!%p2890_p9, %s4960_s12), 3 }
 0x20b   :  { %s4966_s24 = smov (!%p2901_p11, %s4962_s24), 2  ;;  %s1818_s3 = sadd.s32 %s4964_s12, %s2895_s30  ;;  %v1798_v24 = vsel %vm1797_vm7, 4.0, %v3382_v40 }
 0x20c   :  { %s3215_s10 = sshll.u32 %s4964_s12, 2  ;;  %s3214_s22 = sshll.u32 %s1818_s3, 2  ;;  %v1799_v25 = vadd.f32 %v1798_v24, %v1769_v23 }
 0x20d   :  { %s1825_s13 = scalar_lea.vmem [#allocation6], %s3215_s10  ;;  %s1821_s15 = scalar_lea.vmem [#allocation2], %s3214_s22 }
 0x20e   :  { %v1826_v26 = vld [vmem:[%s1825_s13] sm:$0xf]  ;;  %p2907_p13 = scmp.lt.s32.totalorder %s4578_s17, 2  ;;  %p1842_p0 = scmp.gt.s32.totalorder %s4580_s23, 0 }
 0x20f   :  { %v1822_v28 = vld [vmem:[%s1821_s15] sm:$0xf]  ;;  %s4968_s17 = smov (!%p1837_p12, %s4578_s17), 0  ;;  %p2913_p1 = scmp.lt.s32.totalorder %s4580_s23, 3 }
 0x210   :  { %vm1827_vm8 = vcmp.ge.f32.partialorder %v1822_v28, %v1826_v26  ;;  %s1843_s27 = scalar_select %p1842_p0, %s4580_s23, 0 }
 0x211   :  { %v1828_v29 = vsel %vm1827_vm8, 8.0, %v3382_v40  ;;  %s4970_s17 = smov (!%p2907_p13, %s4968_s17), 2  ;;  %s1846_s2 = smul.u32 3, %s4966_s24 }
 0x212   :  { %v1829_v30 = vadd.f32 %v1828_v29, %v1799_v25  ;;  %p1862_p2 = scmp.gt.s32.totalorder %s4582_s20, 0  ;;  %p2924_p3 = scmp.lt.s32.totalorder %s4582_s20, 2 }
 0x213   :  { %s4972_s27 = smov (!%p2913_p1, %s1843_s27), 3  ;;  %s1847_s5 = sadd.s32 %s4970_s17, %s1846_s2 }
 0x214   :  { %1830 = vst [vmem:[#allocation11 + $0x18] sm:$0xf] %v1829_v30  ;;  %p1867_p4 = scmp.gt.s32.totalorder %s4584_s28, 0  ;;  %s2918_s29 = sshll.u32 %s1847_s5, 2 }
 0x215   :  { %s3223_s11 = sshll.u32 %s4972_s27, 2  ;;  %s4613_s26 = sadd.s32 %s4972_s27, %s2918_s29 }
 0x216   :  { %s3222_s21 = sshll.u32 %s4613_s26, 2  ;;  %p2930_p5 = scmp.lt.s32.totalorder %s4584_s28, 2 }
 0x217   :  { %p1872_p6 = scmp.gt.s32.totalorder %s4586_s7, 0  ;;  %s4974_s20 = smov (!%p1862_p2, %s4582_s20), 0 }
 0x218   :  { %s4976_s28 = smov (!%p1867_p4, %s4584_s28), 0  ;;  %s4978_s20 = smov (!%p2924_p3, %s4974_s20), 2 }
 0x219   :  { %s4980_s28 = smov (!%p2930_p5, %s4976_s28), 2  ;;  %p2936_p7 = scmp.lt.s32.totalorder %s4586_s7, 3 }
 0x21a   :  { %s1873_s16 = scalar_select %p1872_p6, %s4586_s7, 0 }
 0x21b   :  { %s1876_s6 = smul.u32 3, %s4978_s20  ;;  %p1892_p8 = scmp.gt.s32.totalorder %s4588_s25, 0 }
 0x21c   :  { %p2947_p9 = scmp.lt.s32.totalorder %s4588_s25, 2  ;;  %s4982_s16 = smov (!%p2936_p7, %s1873_s16), 3 }
 0x21d   :  { %s1877_s0 = sadd.s32 %s4980_s28, %s1876_s6  ;;  %p1897_p10 = scmp.gt.s32.totalorder %s4590_s9, 0 }
 0x21e   :  { %s2941_s8 = sshll.u32 %s1877_s0, 2  ;;  %s3231_s14 = sshll.u32 %s4982_s16, 2 }
 0x21f   :  { %s1879_s12 = sadd.s32 %s4982_s16, %s2941_s8  ;;  %p2953_p11 = scmp.lt.s32.totalorder %s4590_s9, 2 }
 0x220   :  { %s3230_s18 = sshll.u32 %s1879_s12, 2  ;;  %s2958_s24 = sld [smem:[#allocation5 + $0x1e]] }
 0x221   :  { %s4984_s25 = smov (!%p1892_p8, %s4588_s25), 0  ;;  %s4986_s9 = smov (!%p1897_p10, %s4590_s9), 0 }
 0x222   :  { %s4988_s25 = smov (!%p2947_p9, %s4984_s25), 2  ;;  %s4990_s9 = smov (!%p2953_p11, %s4986_s9), 2 }
 0x223   :  { %s1906_s17 = smul.u32 3, %s4988_s25  ;;  %s2969_s1 = sld [smem:[#allocation4 + $0x3e]] }
 0x224   :  { %s4632_s30 = sld [smem:[#allocation4 + $0x3f]]  ;;  %s1852_s25 = scalar_lea.vmem [#allocation2], %s3222_s21 }
 0x225   :  { %s1907_s23 = sadd.s32 %s4990_s9, %s1906_s17  ;;  %s4634_s28 = sld [smem:[#allocation5 + $0x1f]]  ;;  %v1853_v31 = vld [vmem:[%s1852_s25] sm:$0xf] }
 0x226   :  { %p1902_p12 = scmp.gt.s32.totalorder %s2958_s24, 0  ;;  %p2959_p13 = scmp.lt.s32.totalorder %s2958_s24, 3 }
 0x227   :  { %s2964_s20 = sshll.u32 %s1907_s23, 2  ;;  %s1856_s9 = scalar_lea.vmem [#allocation6], %s3223_s11 }
 0x228   :  { %s4992_s24 = smov (!%p1902_p12, %s2958_s24), 0  ;;  %v1857_v32 = vld [vmem:[%s1856_s9] sm:$0xf]  ;;  %s1882_s3 = scalar_lea.vmem [#allocation2], %s3230_s18 }
 0x229   :  { %s4994_s24 = smov (!%p2959_p13, %s4992_s24), 3  ;;  %p1922_p0 = scmp.gt.s32.totalorder %s2969_s1, 0  ;;  %v1883_v34 = vld [vmem:[%s1882_s3] sm:$0xf]  ;;  %vm1858_vm9 = vcmp.ge.f32.partialorder %v1853_v31, %v1857_v32 }
 0x22a   :  { %p2970_p1 = scmp.lt.s32.totalorder %s2969_s1, 2  ;;  %s1909_s7 = sadd.s32 %s4994_s24, %s2964_s20  ;;  %v1859_v36 = vsel %vm1858_vm9, 1.0, %v3382_v40 }
 0x22b   :  { %s3239_s4 = sshll.u32 %s4994_s24, 2  ;;  %s3238_s19 = sshll.u32 %s1909_s7, 2 }
 0x22c   :  { %s1886_s10 = scalar_lea.vmem [#allocation6], %s3231_s14  ;;  %p1927_p2 = scmp.gt.s32.totalorder %s4632_s30, 0 }
 0x22d   :  { %v1887_v35 = vld [vmem:[%s1886_s10] sm:$0xf]  ;;  %s1923_s22 = scalar_select %p1922_p0, %s2969_s1, 0 }
 0x22e   :  { %s1928_s13 = scalar_select %p1927_p2, %s4632_s30, 0  ;;  %vm1888_vm10 = vcmp.ge.f32.partialorder %v1883_v34, %v1887_v35 }
 0x22f   :  { %s4996_s22 = smov (!%p2970_p1, %s1923_s22), 2  ;;  %p2976_p3 = scmp.lt.s32.totalorder %s4632_s30, 2  ;;  %v1889_v37 = vsel %vm1888_vm10, 2.0, %v3382_v40 }
 0x230   :  { %p1932_p4 = scmp.gt.s32.totalorder %s4634_s28, 0  ;;  %p2982_p5 = scmp.lt.s32.totalorder %s4634_s28, 3  ;;  %v1890_v46 = vadd.f32 %v1889_v37, %v1859_v36 }
 0x231   :  { %s1936_s15 = smul.u32 3, %s4996_s22  ;;  %s1912_s27 = scalar_lea.vmem [#allocation2], %s3238_s19 }
 0x232   :  { %v1913_v38 = vld [vmem:[%s1912_s27] sm:$0xf]  ;;  %s1916_s2 = scalar_lea.vmem [#allocation6], %s3239_s4  ;;  %s4998_s13 = smov (!%p2976_p3, %s1928_s13), 2 }
 0x233   :  { %v1917_v39 = vld [vmem:[%s1916_s2] sm:$0xf]  ;;  %s5000_s28 = smov (!%p1932_p4, %s4634_s28), 0  ;;  %s1937_s5 = sadd.s32 %s4998_s13, %s1936_s15 }
 0x234   :  { %vm1918_vm11 = vcmp.ge.f32.partialorder %v1913_v38, %v1917_v39  ;;  %s5002_s28 = smov (!%p2982_p5, %s5000_s28), 3  ;;  %s2987_s29 = sshll.u32 %s1937_s5, 2 }
 0x235   :  { %s1939_s11 = sadd.s32 %s5002_s28, %s2987_s29  ;;  %s3247_s26 = sshll.u32 %s5002_s28, 2  ;;  %v1919_v43 = vsel %vm1918_vm11, 4.0, %v3382_v40 }
 0x236   :  { %s3246_s21 = sshll.u32 %s1939_s11, 2  ;;  %v1920_v48 = vadd.f32 %v1919_v43, %v1890_v46  ;;  %s1946_s16 = scalar_lea.vmem [#allocation6], %s3247_s26 }
 0x237   :  { %v1947_v49 = vld [vmem:[%s1946_s16] sm:$0xf]  ;;  %s1942_s6 = scalar_lea.vmem [#allocation2], %s3246_s21  ;;  %s3383_s0 = smov [#allocation11]  }
 0x238   :  { %v1943_v50 = vld [vmem:[%s1942_s6] sm:$0xf]  ;;  %s1958_s8 = sshll.u32 %s3383_s0, 4  ;;  %s1959_s8 = int_to_ptr.vmem [resolvable:$true] %s1958_s8 }
 0x239   :  { %vm1948_vm12 = vcmp.ge.f32.partialorder %v1943_v50, %v1947_v49  ;;  %s3334_s14 = scalar_lea.vmem %s1959_s8, 512  ;;  %p3339_p7 = scmp.lt.s32.totalorder %s1959_s8, %s1959_s8 }
 0x23a   :  { %v1949_v27 = vsel %vm1948_vm12, 8.0, %v3382_v40  ;;  %p3335_p6 = scmp.ne.s32.totalorder %s1959_s8, %s3334_s14  ;;  %p3340_p8 = scmp.lt.s32.totalorder %s3334_s14, %s3334_s14 }
 0x23b   :  { %v1950_v33 = vadd.f32 %v1949_v27, %v1920_v48 }
 0x23c   :  { %p3341_p9 = por %p3340_p8, %p3339_p7 }
 0x23d   :  { %1951 = vst [vmem:[#allocation11 + $0x1c] sm:$0xf] %v1950_v33 }
 0x23e   :  { %p3342_p10 = pnand %p3341_p9, %p3335_p6 }
 0x240   :  { %3345 = shalt.err (!%p3342_p10)
}
 0x241   :  { %s4698_s24 = sld [smem:[#allocation18_spill]] }
 0x247   :  { %s3346_s17 = scalar_lea.hbm %s4698_s24, 512 }
 0x248   :  { %p3347_p11 = scmp.ne.s32.totalorder %s4698_s24, %s3346_s17  ;;  %p3350_p12 = scmp.lt.u32.totalorder %s3346_s17, %s4698_s24 }
 0x24a   :  { %p3352_p13 = pnand %p3350_p12, %p3347_p11 }
 0x24c   :  { %3355 = shalt.err (!%p3352_p13)
}
 0x24d   :  { %1961 = dma.vmem_to_hbm [thread:$0]  %s1959_s8, 512, %s4698_s24, [#allocation8]  }
 0x24e   :  { %3362 = dma.done.wait [#allocation8], 512  }
 0x24f   :  { %3363 = vsyncadd [#allocation8], 4294966784 }
 0x250   :  { %1965 = vsyncpa [#allocation7], 1 }
 0x251   :  { %1966 = vsyncpa [#allocation10], 1 }
 0x252   :  { %1967 = vsyncpa [#allocation8], 1 }

</bundles_post_ra>
